<compile_context>
chip_gen: v7x
topology: tpu7x:2x2x1
jax: 0.10.0
libtpu: 0.0.40
codegen_flags: <defaults>
</compile_context>

<pallas_src>
import jax
import jax.numpy as jnp
from jax.experimental import pallas as pl
from jax.experimental.pallas import tpu as pltpu

NEG_BIAS = -1e30  # finite "minus infinity" bias for padded class rows


def combined_cnn_kernel(x_ref, nf_ref, nl_ref, seg_ref,
                        w1_ref, b1_ref, w2_ref, b2_ref,
                        w3_ref, b3_ref, w4_ref, b4_ref,
                        wfc_ref, bfc_ref, out_ref):
    rows = x_ref.shape[1]                 # b_blk * T
    mm_dtype = w1_ref.dtype               # bf16 (default) or f32 MXU operands

    not_first = nf_ref[...]               # (1, rows): 0.0 where t == 0 in a sample, else 1.0
    not_last = nl_ref[...]                # (1, rows): 0.0 where t == T-1 in a sample, else 1.0

    def conv_bn_relu(h, w_ref, b_ref):
        # h: (Cin, rows) f32.  w_ref: (3, Cout, Cin) = taps for x[t-1], x[t], x[t+1].
        h_prev = pltpu.roll(h, shift=1, axis=1) * not_first          # h[:, t-1], zeroed at t==0
        h_next = pltpu.roll(h, shift=rows - 1, axis=1) * not_last    # h[:, t+1], zeroed at t==T-1
        y = jnp.dot(w_ref[0], h_prev.astype(mm_dtype), preferred_element_type=jnp.float32)
        y = y + jnp.dot(w_ref[1], h.astype(mm_dtype), preferred_element_type=jnp.float32)
        y = y + jnp.dot(w_ref[2], h_next.astype(mm_dtype), preferred_element_type=jnp.float32)
        # Conv+BN bias (folded) and ReLU; Dropout is the identity in eval mode.
        return jnp.maximum(y + b_ref[...], 0.0)

    h = conv_bn_relu(x_ref[...], w1_ref, b1_ref)       # (16, rows)
    h = conv_bn_relu(h, w2_ref, b2_ref)                # (32, rows)
    h = conv_bn_relu(h, w3_ref, b3_ref)                # (64, rows)
    h = conv_bn_relu(h, w4_ref, b4_ref)                # (128, rows)

    # AdaptiveAvgPool1d(1): per-sample time-SUM as one MXU dot against the 0/1 segment
    # matrix (the 1/T is folded into the FC weight in the wrapper).
    pooled = jnp.dot(h.astype(mm_dtype), seg_ref[...],
                     preferred_element_type=jnp.float32)             # (128, b_blk)

    # Flatten + Linear(128, n_classes) with a pre-transposed, 1/T-scaled, class-padded weight.
    logits = jnp.dot(wfc_ref[...], pooled.astype(mm_dtype),
                     preferred_element_type=jnp.float32) + bfc_ref[...]   # (n_pad, b_blk)

    # LogSoftmax over the class (sublane) axis; padded classes sit at ~-1e30 -> exp == 0.
    m = jnp.max(logits, axis=0, keepdims=True)
    s = logits - m
    lse = jnp.log(jnp.sum(jnp.exp(s), axis=0, keepdims=True))
    out_ref[0] = (s - lse).astype(out_ref.dtype)                     # (n_pad, b_blk)


def combined_cnn_forward(x, params, *, num_blocks=None, mm_dtype=jnp.bfloat16):
    """x: (B, C, T) f32, or (B, C, H, W) which is flattened like the PyTorch forward().
    params: 4 x (w_taps (3, Cout, Cin), b (Cout, 1)) with BatchNorm folded in, plus
            (wfc (128, n_classes), bfc (1, n_classes))."""
    if x.ndim == 4:
        x = x.reshape(x.shape[0], x.shape[1], -1)
    B, C, T = x.shape
    conv_params = params[:4]
    wfc, bfc = params[4]
    n_classes = wfc.shape[1]

    # Pre-transposed, class-padded FC weight with AdaptiveAvgPool's 1/T folded in.
    n_pad = 128 * pl.cdiv(n_classes, 128)
    wfc_t = jnp.zeros((n_pad, wfc.shape[0]), jnp.float32).at[:n_classes, :].set(wfc.T / T)
    wfc_t = wfc_t.astype(mm_dtype)
    bfc_t = jnp.full((n_pad, 1), NEG_BIAS, jnp.float32).at[:n_classes, 0].set(bfc[0])

    # Grid sizing: one step by default (single-TC v5e/v6e); split only when the per-block
    # activation working set would crowd VMEM (v7x has only 64 MiB).
    if num_blocks is None:
        bytes_per_row = 1600                      # ~peak live activation bytes per time step
        vmem_budget = 20 * 1024 * 1024            # headroom under the 32 MiB scoped limit
        target = min(B, max(1, pl.cdiv(B * T * bytes_per_row, vmem_budget)))
        num_blocks = 1
        for nb in range(target, 0, -1):           # largest split with 128-aligned lane extent
            if nb == 1 or (pl.cdiv(B, nb) * T) % 128 == 0:
                num_blocks = nb
                break
    b_blk = pl.cdiv(B, num_blocks)
    b_pad = num_blocks * b_blk
    if b_pad != B:
        x = jnp.pad(x, ((0, b_pad - B), (0, 0), (0, 0)))
    rows_blk = b_blk * T

    # Channels-on-sublane / time-on-lanes input slab: column index = b * T + t.
    x_cr = jnp.transpose(x.astype(jnp.float32), (1, 0, 2)).reshape(C, b_pad * T)

    # 0/1 boundary masks for the t-1 / t+1 taps and the per-sample pooling matrix
    # (identical for every grid block, so they are passed once with constant index maps).
    t_idx = jnp.arange(rows_blk, dtype=jnp.int32) % T
    not_first = (t_idx != 0).astype(jnp.float32).reshape(1, rows_blk)
    not_last = (t_idx != T - 1).astype(jnp.float32).reshape(1, rows_blk)
    b_idx = jnp.arange(rows_blk, dtype=jnp.int32) // T
    seg = (b_idx[:, None] == jnp.arange(b_blk, dtype=jnp.int32)[None, :]).astype(mm_dtype)

    conv_in = []
    for w_taps, b in conv_params:
        conv_in += [w_taps.astype(mm_dtype), b.astype(jnp.float32)]

    def full(a):
        return pl.BlockSpec(a.shape, lambda i: (0,) * a.ndim)

    conv_flops = 2 * b_pad * T * sum(int(w.size) for w, _ in conv_params)
    pool_flops = 2 * b_pad * T * 128
    fc_flops = 2 * b_pad * 128 * n_pad
    param_elems = (sum(int(w.size) + int(b.size) for w, b in conv_params)
                   + int(wfc_t.size) + int(bfc_t.size))
    bytes_accessed = 4 * (int(x_cr.size) + b_pad * n_pad + param_elems + 2 * rows_blk) \
        + 2 * int(seg.size)

    out = pl.pallas_call(
        combined_cnn_kernel,
        out_shape=jax.ShapeDtypeStruct((num_blocks, n_pad, b_blk), jnp.float32),
        grid=(num_blocks,),
        in_specs=[pl.BlockSpec((C, rows_blk), lambda i: (0, i)),
                  full(not_first), full(not_last), full(seg),
                  *[full(a) for a in conv_in],
                  full(wfc_t), full(bfc_t)],
        out_specs=pl.BlockSpec((1, n_pad, b_blk), lambda i: (i, 0, 0)),
        compiler_params=pltpu.CompilerParams(
            dimension_semantics=("parallel",),
            vmem_limit_bytes=32 * 1024 * 1024),
        cost_estimate=pl.CostEstimate(flops=conv_flops + pool_flops + fc_flops,
                                      transcendentals=b_pad * n_pad,
                                      bytes_accessed=int(bytes_accessed)),
    )(x_cr, not_first, not_last, seg, *conv_in, wfc_t, bfc_t)

    # (num_blocks, n_pad, b_blk) -> (B, n_classes); the slab is tiny so this costs nothing.
    out = jnp.transpose(out, (0, 2, 1)).reshape(b_pad, n_pad)
    return out[:B, :n_classes]


def init_params(key, c_in, n_classes, eps=1e-5):
    """Deterministic synthetic parameters; BatchNorm (eval) folded into conv weight/bias.
    Conv weights are stored per-tap as (3, Cout, Cin) for the three accumulating matmuls."""
    chans = [c_in, 16, 32, 64, 128]
    keys = iter(jax.random.split(key, 32))
    params = []
    for cin, cout in zip(chans[:-1], chans[1:]):
        w = jax.random.normal(next(keys), (cout, cin, 3), jnp.float32) / jnp.sqrt(cin * 3.0)
        b = 0.1 * jax.random.normal(next(keys), (cout,), jnp.float32)
        gamma = 1.0 + 0.1 * jax.random.normal(next(keys), (cout,), jnp.float32)
        beta = 0.1 * jax.random.normal(next(keys), (cout,), jnp.float32)
        r_mean = 0.1 * jax.random.normal(next(keys), (cout,), jnp.float32)
        r_var = jnp.abs(jax.random.normal(next(keys), (cout,), jnp.float32)) + 0.5
        scale = gamma / jnp.sqrt(r_var + eps)
        w_f = w * scale[:, None, None]                      # (Cout, Cin, 3), BN folded
        b_f = (b - r_mean) * scale + beta                   # (Cout,)
        w_taps = jnp.transpose(w_f, (2, 0, 1))              # (3, Cout, Cin): taps t-1, t, t+1
        params.append((w_taps, b_f.reshape(cout, 1)))
    wfc = jax.random.normal(next(keys), (n_classes, 128), jnp.float32) / jnp.sqrt(128.0)
    bfc = 0.1 * jax.random.normal(next(keys), (n_classes,), jnp.float32)
    params.append((wfc.T, bfc.reshape(1, n_classes)))
    return params


def ref_forward(x_nct, params):
    """Pure-JAX reference matching PyTorch eval-mode semantics (NCT layout)."""
    h = x_nct
    for w_taps, b in params[:4]:
        w_oih = jnp.transpose(w_taps, (1, 2, 0))            # (Cout, Cin, 3)
        h = jax.lax.conv_general_dilated(h, w_oih, window_strides=(1,), padding=((1, 1),),
                                         dimension_numbers=("NCH", "OIH", "NCH"),
                                         precision=jax.lax.Precision.HIGHEST)
        h = jnp.maximum(h + b.reshape(1, -1, 1), 0.0)
    pooled = jnp.mean(h, axis=-1)                            # (B, 128)
    wfc, bfc = params[4]
    logits = jnp.dot(pooled, wfc, precision=jax.lax.Precision.HIGHEST) + bfc
    return jax.nn.log_softmax(logits, axis=-1)


if __name__ == "__main__":
    key = jax.random.PRNGKey(0)
    k_x, k_p = jax.random.split(key)

    B, C, H, W = 2, 4, 16, 16
    n_classes = 5

    x_4d = jax.random.normal(k_x, (B, C, H, W), jnp.float32)
    params = init_params(k_p, C, n_classes)

    # PyTorch forward(): 4D NCHW is viewed as (B, C, T) with T = H*W.
    x_nct = x_4d.reshape(B, C, H * W)
    ref = ref_forward(x_nct, params)

    # f32 MXU path: tight tolerance against the HIGHEST-precision reference.
    out_f32 = jax.block_until_ready(combined_cnn_forward(x_4d, params, mm_dtype=jnp.float32))
    assert out_f32.shape == (B, n_classes), out_f32.shape
    assert jnp.allclose(out_f32, ref, atol=1e-3, rtol=1e-3), (out_f32, ref)

    # Default fast path: bf16 MXU operands with f32 accumulation (bf16-level tolerance).
    out_bf16 = jax.block_until_ready(combined_cnn_forward(x_4d, params))
    assert out_bf16.shape == (B, n_classes), out_bf16.shape
    assert jnp.allclose(out_bf16, ref, atol=3e-2, rtol=3e-2), (out_bf16, ref)

    print("KERNEL_OK")
</pallas_src>

<mosaic_0001>
module attributes {stable_mosaic.version = 11 : i64} {
  func.func @combined_cnn_kernel(%arg0: i32, %arg1: memref<4x512xf32, #tpu.memory_space<vmem>>, %arg2: memref<1x512xf32, #tpu.memory_space<vmem>>, %arg3: memref<1x512xf32, #tpu.memory_space<vmem>>, %arg4: memref<512x2xf32, #tpu.memory_space<vmem>>, %arg5: memref<3x16x4xf32, #tpu.memory_space<vmem>>, %arg6: memref<16x1xf32, #tpu.memory_space<vmem>>, %arg7: memref<3x32x16xf32, #tpu.memory_space<vmem>>, %arg8: memref<32x1xf32, #tpu.memory_space<vmem>>, %arg9: memref<3x64x32xf32, #tpu.memory_space<vmem>>, %arg10: memref<64x1xf32, #tpu.memory_space<vmem>>, %arg11: memref<3x128x64xf32, #tpu.memory_space<vmem>>, %arg12: memref<128x1xf32, #tpu.memory_space<vmem>>, %arg13: memref<128x128xf32, #tpu.memory_space<vmem>>, %arg14: memref<128x1xf32, #tpu.memory_space<vmem>>, %arg15: memref<1x128x2xf32, #tpu.memory_space<vmem>>) attributes {dimension_semantics = [#tpu.dimension_semantics<parallel>], iteration_bounds = array<i64: 1>, scalar_prefetch = 0 : i64, scratch_operands = 0 : i64, tpu.core_type = #tpu.core_type<tc>, window_params = [{transform_indices = @transform_0, window_bounds = array<i64: 4, 512>}, {pipeline_mode = #tpu.pipeline_mode<synchronous>, transform_indices = @transform_1, window_bounds = array<i64: 1, 512>}, {pipeline_mode = #tpu.pipeline_mode<synchronous>, transform_indices = @transform_2, window_bounds = array<i64: 1, 512>}, {pipeline_mode = #tpu.pipeline_mode<synchronous>, transform_indices = @transform_3, window_bounds = array<i64: 512, 2>}, {pipeline_mode = #tpu.pipeline_mode<synchronous>, transform_indices = @transform_4, window_bounds = array<i64: 3, 16, 4>}, {pipeline_mode = #tpu.pipeline_mode<synchronous>, transform_indices = @transform_5, window_bounds = array<i64: 16, 1>}, {pipeline_mode = #tpu.pipeline_mode<synchronous>, transform_indices = @transform_6, window_bounds = array<i64: 3, 32, 16>}, {pipeline_mode = #tpu.pipeline_mode<synchronous>, transform_indices = @transform_7, window_bounds = array<i64: 32, 1>}, {pipeline_mode = #tpu.pipeline_mode<synchronous>, transform_indices = @transform_8, window_bounds = array<i64: 3, 64, 32>}, {pipeline_mode = #tpu.pipeline_mode<synchronous>, transform_indices = @transform_9, window_bounds = array<i64: 64, 1>}, {pipeline_mode = #tpu.pipeline_mode<synchronous>, transform_indices = @transform_10, window_bounds = array<i64: 3, 128, 64>}, {pipeline_mode = #tpu.pipeline_mode<synchronous>, transform_indices = @transform_11, window_bounds = array<i64: 128, 1>}, {pipeline_mode = #tpu.pipeline_mode<synchronous>, transform_indices = @transform_12, window_bounds = array<i64: 128, 128>}, {pipeline_mode = #tpu.pipeline_mode<synchronous>, transform_indices = @transform_13, window_bounds = array<i64: 128, 1>}, {transform_indices = @transform_14, window_bounds = array<i64: 1, 128, 2>}]} {
    %c0 = arith.constant 0 : index
    %c0_0 = arith.constant 0 : index
    %0 = vector.load %arg2[%c0, %c0_0] : memref<1x512xf32, #tpu.memory_space<vmem>>, vector<1x512xf32>
    %c0_1 = arith.constant 0 : index
    %c0_2 = arith.constant 0 : index
    %1 = vector.load %arg3[%c0_1, %c0_2] : memref<1x512xf32, #tpu.memory_space<vmem>>, vector<1x512xf32>
    %c0_3 = arith.constant 0 : index
    %c0_4 = arith.constant 0 : index
    %2 = vector.load %arg1[%c0_3, %c0_4] : memref<4x512xf32, #tpu.memory_space<vmem>>, vector<4x512xf32>
    %c1_i32 = arith.constant 1 : i32
    %3 = tpu.dynamic_rotate %2 by %c1_i32 dim 1 : vector<4x512xf32>, i32 -> vector<4x512xf32>
    %4 = vector.broadcast %0 : vector<1x512xf32> to vector<4x512xf32>
    %5 = arith.mulf %3, %4 : vector<4x512xf32>
    %c511_i32 = arith.constant 511 : i32
    %6 = tpu.dynamic_rotate %2 by %c511_i32 dim 1 : vector<4x512xf32>, i32 -> vector<4x512xf32>
    %7 = vector.broadcast %1 : vector<1x512xf32> to vector<4x512xf32>
    %8 = arith.mulf %6, %7 : vector<4x512xf32>
    %c0_5 = arith.constant 0 : index
    %c0_6 = arith.constant 0 : index
    %c0_7 = arith.constant 0 : index
    %9 = vector.load %arg5[%c0_5, %c0_6, %c0_7] : memref<3x16x4xf32, #tpu.memory_space<vmem>>, vector<1x16x4xf32>
    %10 = vector.shape_cast %9 : vector<1x16x4xf32> to vector<16x4xf32>
    %cst = arith.constant dense<0.000000e+00> : vector<16x512xf32>
    %11 = tpu.matmul %10, %5, %cst {dimension_numbers = #tpu.dot_dimension_numbers<[1], [0], [0], [1], [0, 0, 1, 1], [], []>} : vector<16x4xf32>, vector<4x512xf32>, vector<16x512xf32> -> vector<16x512xf32>
    %c1 = arith.constant 1 : index
    %c0_8 = arith.constant 0 : index
    %c0_9 = arith.constant 0 : index
    %12 = vector.load %arg5[%c1, %c0_8, %c0_9] : memref<3x16x4xf32, #tpu.memory_space<vmem>>, vector<1x16x4xf32>
    %13 = vector.shape_cast %12 : vector<1x16x4xf32> to vector<16x4xf32>
    %cst_10 = arith.constant dense<0.000000e+00> : vector<16x512xf32>
    %14 = tpu.matmul %13, %2, %cst_10 {dimension_numbers = #tpu.dot_dimension_numbers<[1], [0], [0], [1], [0, 0, 1, 1], [], []>} : vector<16x4xf32>, vector<4x512xf32>, vector<16x512xf32> -> vector<16x512xf32>
    %15 = arith.addf %11, %14 : vector<16x512xf32>
    %c2 = arith.constant 2 : index
    %c0_11 = arith.constant 0 : index
    %c0_12 = arith.constant 0 : index
    %16 = vector.load %arg5[%c2, %c0_11, %c0_12] : memref<3x16x4xf32, #tpu.memory_space<vmem>>, vector<1x16x4xf32>
    %17 = vector.shape_cast %16 : vector<1x16x4xf32> to vector<16x4xf32>
    %cst_13 = arith.constant dense<0.000000e+00> : vector<16x512xf32>
    %18 = tpu.matmul %17, %8, %cst_13 {dimension_numbers = #tpu.dot_dimension_numbers<[1], [0], [0], [1], [0, 0, 1, 1], [], []>} : vector<16x4xf32>, vector<4x512xf32>, vector<16x512xf32> -> vector<16x512xf32>
    %19 = arith.addf %15, %18 : vector<16x512xf32>
    %c0_14 = arith.constant 0 : index
    %c0_15 = arith.constant 0 : index
    %20 = vector.load %arg6[%c0_14, %c0_15] : memref<16x1xf32, #tpu.memory_space<vmem>>, vector<16x1xf32>
    %21 = vector.broadcast %20 : vector<16x1xf32> to vector<16x512xf32>
    %22 = arith.addf %19, %21 : vector<16x512xf32>
    %cst_16 = arith.constant 0.000000e+00 : f32
    %23 = vector.broadcast %cst_16 : f32 to vector<16x512xf32>
    %24 = arith.maximumf %22, %23 : vector<16x512xf32>
    %c1_i32_17 = arith.constant 1 : i32
    %25 = tpu.dynamic_rotate %24 by %c1_i32_17 dim 1 : vector<16x512xf32>, i32 -> vector<16x512xf32>
    %26 = vector.broadcast %0 : vector<1x512xf32> to vector<16x512xf32>
    %27 = arith.mulf %25, %26 : vector<16x512xf32>
    %c511_i32_18 = arith.constant 511 : i32
    %28 = tpu.dynamic_rotate %24 by %c511_i32_18 dim 1 : vector<16x512xf32>, i32 -> vector<16x512xf32>
    %29 = vector.broadcast %1 : vector<1x512xf32> to vector<16x512xf32>
    %30 = arith.mulf %28, %29 : vector<16x512xf32>
    %c0_19 = arith.constant 0 : index
    %c0_20 = arith.constant 0 : index
    %c0_21 = arith.constant 0 : index
    %31 = vector.load %arg7[%c0_19, %c0_20, %c0_21] : memref<3x32x16xf32, #tpu.memory_space<vmem>>, vector<1x32x16xf32>
    %32 = vector.shape_cast %31 : vector<1x32x16xf32> to vector<32x16xf32>
    %cst_22 = arith.constant dense<0.000000e+00> : vector<32x512xf32>
    %33 = tpu.matmul %32, %27, %cst_22 {dimension_numbers = #tpu.dot_dimension_numbers<[1], [0], [0], [1], [0, 0, 1, 1], [], []>} : vector<32x16xf32>, vector<16x512xf32>, vector<32x512xf32> -> vector<32x512xf32>
    %c1_23 = arith.constant 1 : index
    %c0_24 = arith.constant 0 : index
    %c0_25 = arith.constant 0 : index
    %34 = vector.load %arg7[%c1_23, %c0_24, %c0_25] : memref<3x32x16xf32, #tpu.memory_space<vmem>>, vector<1x32x16xf32>
    %35 = vector.shape_cast %34 : vector<1x32x16xf32> to vector<32x16xf32>
    %cst_26 = arith.constant dense<0.000000e+00> : vector<32x512xf32>
    %36 = tpu.matmul %35, %24, %cst_26 {dimension_numbers = #tpu.dot_dimension_numbers<[1], [0], [0], [1], [0, 0, 1, 1], [], []>} : vector<32x16xf32>, vector<16x512xf32>, vector<32x512xf32> -> vector<32x512xf32>
    %37 = arith.addf %33, %36 : vector<32x512xf32>
    %c2_27 = arith.constant 2 : index
    %c0_28 = arith.constant 0 : index
    %c0_29 = arith.constant 0 : index
    %38 = vector.load %arg7[%c2_27, %c0_28, %c0_29] : memref<3x32x16xf32, #tpu.memory_space<vmem>>, vector<1x32x16xf32>
    %39 = vector.shape_cast %38 : vector<1x32x16xf32> to vector<32x16xf32>
    %cst_30 = arith.constant dense<0.000000e+00> : vector<32x512xf32>
    %40 = tpu.matmul %39, %30, %cst_30 {dimension_numbers = #tpu.dot_dimension_numbers<[1], [0], [0], [1], [0, 0, 1, 1], [], []>} : vector<32x16xf32>, vector<16x512xf32>, vector<32x512xf32> -> vector<32x512xf32>
    %41 = arith.addf %37, %40 : vector<32x512xf32>
    %c0_31 = arith.constant 0 : index
    %c0_32 = arith.constant 0 : index
    %42 = vector.load %arg8[%c0_31, %c0_32] : memref<32x1xf32, #tpu.memory_space<vmem>>, vector<32x1xf32>
    %43 = vector.broadcast %42 : vector<32x1xf32> to vector<32x512xf32>
    %44 = arith.addf %41, %43 : vector<32x512xf32>
    %cst_33 = arith.constant 0.000000e+00 : f32
    %45 = vector.broadcast %cst_33 : f32 to vector<32x512xf32>
    %46 = arith.maximumf %44, %45 : vector<32x512xf32>
    %c1_i32_34 = arith.constant 1 : i32
    %47 = tpu.dynamic_rotate %46 by %c1_i32_34 dim 1 : vector<32x512xf32>, i32 -> vector<32x512xf32>
    %48 = vector.broadcast %0 : vector<1x512xf32> to vector<32x512xf32>
    %49 = arith.mulf %47, %48 : vector<32x512xf32>
    %c511_i32_35 = arith.constant 511 : i32
    %50 = tpu.dynamic_rotate %46 by %c511_i32_35 dim 1 : vector<32x512xf32>, i32 -> vector<32x512xf32>
    %51 = vector.broadcast %1 : vector<1x512xf32> to vector<32x512xf32>
    %52 = arith.mulf %50, %51 : vector<32x512xf32>
    %c0_36 = arith.constant 0 : index
    %c0_37 = arith.constant 0 : index
    %c0_38 = arith.constant 0 : index
    %53 = vector.load %arg9[%c0_36, %c0_37, %c0_38] : memref<3x64x32xf32, #tpu.memory_space<vmem>>, vector<1x64x32xf32>
    %54 = vector.shape_cast %53 : vector<1x64x32xf32> to vector<64x32xf32>
    %cst_39 = arith.constant dense<0.000000e+00> : vector<64x512xf32>
    %55 = tpu.matmul %54, %49, %cst_39 {dimension_numbers = #tpu.dot_dimension_numbers<[1], [0], [0], [1], [0, 0, 1, 1], [], []>} : vector<64x32xf32>, vector<32x512xf32>, vector<64x512xf32> -> vector<64x512xf32>
    %c1_40 = arith.constant 1 : index
    %c0_41 = arith.constant 0 : index
    %c0_42 = arith.constant 0 : index
    %56 = vector.load %arg9[%c1_40, %c0_41, %c0_42] : memref<3x64x32xf32, #tpu.memory_space<vmem>>, vector<1x64x32xf32>
    %57 = vector.shape_cast %56 : vector<1x64x32xf32> to vector<64x32xf32>
    %cst_43 = arith.constant dense<0.000000e+00> : vector<64x512xf32>
    %58 = tpu.matmul %57, %46, %cst_43 {dimension_numbers = #tpu.dot_dimension_numbers<[1], [0], [0], [1], [0, 0, 1, 1], [], []>} : vector<64x32xf32>, vector<32x512xf32>, vector<64x512xf32> -> vector<64x512xf32>
    %59 = arith.addf %55, %58 : vector<64x512xf32>
    %c2_44 = arith.constant 2 : index
    %c0_45 = arith.constant 0 : index
    %c0_46 = arith.constant 0 : index
    %60 = vector.load %arg9[%c2_44, %c0_45, %c0_46] : memref<3x64x32xf32, #tpu.memory_space<vmem>>, vector<1x64x32xf32>
    %61 = vector.shape_cast %60 : vector<1x64x32xf32> to vector<64x32xf32>
    %cst_47 = arith.constant dense<0.000000e+00> : vector<64x512xf32>
    %62 = tpu.matmul %61, %52, %cst_47 {dimension_numbers = #tpu.dot_dimension_numbers<[1], [0], [0], [1], [0, 0, 1, 1], [], []>} : vector<64x32xf32>, vector<32x512xf32>, vector<64x512xf32> -> vector<64x512xf32>
    %63 = arith.addf %59, %62 : vector<64x512xf32>
    %c0_48 = arith.constant 0 : index
    %c0_49 = arith.constant 0 : index
    %64 = vector.load %arg10[%c0_48, %c0_49] : memref<64x1xf32, #tpu.memory_space<vmem>>, vector<64x1xf32>
    %65 = vector.broadcast %64 : vector<64x1xf32> to vector<64x512xf32>
    %66 = arith.addf %63, %65 : vector<64x512xf32>
    %cst_50 = arith.constant 0.000000e+00 : f32
    %67 = vector.broadcast %cst_50 : f32 to vector<64x512xf32>
    %68 = arith.maximumf %66, %67 : vector<64x512xf32>
    %c1_i32_51 = arith.constant 1 : i32
    %69 = tpu.dynamic_rotate %68 by %c1_i32_51 dim 1 : vector<64x512xf32>, i32 -> vector<64x512xf32>
    %70 = vector.broadcast %0 : vector<1x512xf32> to vector<64x512xf32>
    %71 = arith.mulf %69, %70 : vector<64x512xf32>
    %c511_i32_52 = arith.constant 511 : i32
    %72 = tpu.dynamic_rotate %68 by %c511_i32_52 dim 1 : vector<64x512xf32>, i32 -> vector<64x512xf32>
    %73 = vector.broadcast %1 : vector<1x512xf32> to vector<64x512xf32>
    %74 = arith.mulf %72, %73 : vector<64x512xf32>
    %c0_53 = arith.constant 0 : index
    %c0_54 = arith.constant 0 : index
    %c0_55 = arith.constant 0 : index
    %75 = vector.load %arg11[%c0_53, %c0_54, %c0_55] : memref<3x128x64xf32, #tpu.memory_space<vmem>>, vector<1x128x64xf32>
    %76 = vector.shape_cast %75 : vector<1x128x64xf32> to vector<128x64xf32>
    %cst_56 = arith.constant dense<0.000000e+00> : vector<128x512xf32>
    %77 = tpu.matmul %76, %71, %cst_56 {dimension_numbers = #tpu.dot_dimension_numbers<[1], [0], [0], [1], [0, 0, 1, 1], [], []>} : vector<128x64xf32>, vector<64x512xf32>, vector<128x512xf32> -> vector<128x512xf32>
    %c1_57 = arith.constant 1 : index
    %c0_58 = arith.constant 0 : index
    %c0_59 = arith.constant 0 : index
    %78 = vector.load %arg11[%c1_57, %c0_58, %c0_59] : memref<3x128x64xf32, #tpu.memory_space<vmem>>, vector<1x128x64xf32>
    %79 = vector.shape_cast %78 : vector<1x128x64xf32> to vector<128x64xf32>
    %cst_60 = arith.constant dense<0.000000e+00> : vector<128x512xf32>
    %80 = tpu.matmul %79, %68, %cst_60 {dimension_numbers = #tpu.dot_dimension_numbers<[1], [0], [0], [1], [0, 0, 1, 1], [], []>} : vector<128x64xf32>, vector<64x512xf32>, vector<128x512xf32> -> vector<128x512xf32>
    %81 = arith.addf %77, %80 : vector<128x512xf32>
    %c2_61 = arith.constant 2 : index
    %c0_62 = arith.constant 0 : index
    %c0_63 = arith.constant 0 : index
    %82 = vector.load %arg11[%c2_61, %c0_62, %c0_63] : memref<3x128x64xf32, #tpu.memory_space<vmem>>, vector<1x128x64xf32>
    %83 = vector.shape_cast %82 : vector<1x128x64xf32> to vector<128x64xf32>
    %cst_64 = arith.constant dense<0.000000e+00> : vector<128x512xf32>
    %84 = tpu.matmul %83, %74, %cst_64 {dimension_numbers = #tpu.dot_dimension_numbers<[1], [0], [0], [1], [0, 0, 1, 1], [], []>} : vector<128x64xf32>, vector<64x512xf32>, vector<128x512xf32> -> vector<128x512xf32>
    %85 = arith.addf %81, %84 : vector<128x512xf32>
    %c0_65 = arith.constant 0 : index
    %c0_66 = arith.constant 0 : index
    %86 = vector.load %arg12[%c0_65, %c0_66] : memref<128x1xf32, #tpu.memory_space<vmem>>, vector<128x1xf32>
    %87 = vector.broadcast %86 : vector<128x1xf32> to vector<128x512xf32>
    %88 = arith.addf %85, %87 : vector<128x512xf32>
    %cst_67 = arith.constant 0.000000e+00 : f32
    %89 = vector.broadcast %cst_67 : f32 to vector<128x512xf32>
    %90 = arith.maximumf %88, %89 : vector<128x512xf32>
    %c0_68 = arith.constant 0 : index
    %c0_69 = arith.constant 0 : index
    %91 = vector.load %arg4[%c0_68, %c0_69] : memref<512x2xf32, #tpu.memory_space<vmem>>, vector<512x2xf32>
    %cst_70 = arith.constant dense<0.000000e+00> : vector<128x2xf32>
    %92 = tpu.matmul %90, %91, %cst_70 {dimension_numbers = #tpu.dot_dimension_numbers<[1], [0], [0], [1], [0, 0, 1, 1], [], []>} : vector<128x512xf32>, vector<512x2xf32>, vector<128x2xf32> -> vector<128x2xf32>
    %c0_71 = arith.constant 0 : index
    %c0_72 = arith.constant 0 : index
    %93 = vector.load %arg13[%c0_71, %c0_72] : memref<128x128xf32, #tpu.memory_space<vmem>>, vector<128x128xf32>
    %cst_73 = arith.constant dense<0.000000e+00> : vector<128x2xf32>
    %94 = tpu.matmul %93, %92, %cst_73 {dimension_numbers = #tpu.dot_dimension_numbers<[1], [0], [0], [1], [0, 0, 1, 1], [], []>} : vector<128x128xf32>, vector<128x2xf32>, vector<128x2xf32> -> vector<128x2xf32>
    %c0_74 = arith.constant 0 : index
    %c0_75 = arith.constant 0 : index
    %95 = vector.load %arg14[%c0_74, %c0_75] : memref<128x1xf32, #tpu.memory_space<vmem>>, vector<128x1xf32>
    %96 = vector.broadcast %95 : vector<128x1xf32> to vector<128x2xf32>
    %97 = arith.addf %94, %96 : vector<128x2xf32>
    %cst_76 = arith.constant dense<0xFF800000> : vector<2xf32>
    %98 = vector.multi_reduction <maximumf>, %97, %cst_76 [0] : vector<128x2xf32> to vector<2xf32>
    %99 = vector.shape_cast %98 : vector<2xf32> to vector<1x2xf32>
    %100 = vector.broadcast %99 : vector<1x2xf32> to vector<128x2xf32>
    %101 = arith.subf %97, %100 : vector<128x2xf32>
    %102 = math.exp %101 : vector<128x2xf32>
    %cst_77 = arith.constant dense<0.000000e+00> : vector<2xf32>
    %103 = vector.multi_reduction <add>, %102, %cst_77 [0] : vector<128x2xf32> to vector<2xf32>
    %104 = vector.shape_cast %103 : vector<2xf32> to vector<1x2xf32>
    %105 = math.log %104 : vector<1x2xf32>
    %106 = vector.broadcast %105 : vector<1x2xf32> to vector<128x2xf32>
    %107 = arith.subf %101, %106 : vector<128x2xf32>
    %c0_78 = arith.constant 0 : index
    %c0_79 = arith.constant 0 : index
    %c0_80 = arith.constant 0 : index
    %108 = vector.load %arg15[%c0_78, %c0_79, %c0_80] : memref<1x128x2xf32, #tpu.memory_space<vmem>>, vector<1x128x2xf32>
    %109 = vector.shape_cast %108 : vector<1x128x2xf32> to vector<128x2xf32>
    %110 = vector.shape_cast %107 : vector<128x2xf32> to vector<1x128x2xf32>
    tpu.vector_store %arg15[%c0_78, %c0_79, %c0_80], %110 {strides = array<i32>} : memref<1x128x2xf32, #tpu.memory_space<vmem>>, vector<1x128x2xf32>,
    return
  }
  func.func @transform_0(%arg0: i32) -> (i32, i32) {
    %c0_i32 = arith.constant 0 : i32
    %c0_i32_0 = arith.constant 0 : i32
    return %c0_i32, %arg0 : i32, i32
  }
  func.func @transform_1(%arg0: i32) -> (i32, i32) {
    %c0_i32 = arith.constant 0 : i32
    %c0_i32_0 = arith.constant 0 : i32
    %c0_i32_1 = arith.constant 0 : i32
    return %c0_i32, %c0_i32_0 : i32, i32
  }
  func.func @transform_2(%arg0: i32) -> (i32, i32) {
    %c0_i32 = arith.constant 0 : i32
    %c0_i32_0 = arith.constant 0 : i32
    %c0_i32_1 = arith.constant 0 : i32
    return %c0_i32, %c0_i32_0 : i32, i32
  }
  func.func @transform_3(%arg0: i32) -> (i32, i32) {
    %c0_i32 = arith.constant 0 : i32
    %c0_i32_0 = arith.constant 0 : i32
    %c0_i32_1 = arith.constant 0 : i32
    return %c0_i32, %c0_i32_0 : i32, i32
  }
  func.func @transform_4(%arg0: i32) -> (i32, i32, i32) {
    %c0_i32 = arith.constant 0 : i32
    %c0_i32_0 = arith.constant 0 : i32
    %c0_i32_1 = arith.constant 0 : i32
    %c0_i32_2 = arith.constant 0 : i32
    return %c0_i32, %c0_i32_0, %c0_i32_1 : i32, i32, i32
  }
  func.func @transform_5(%arg0: i32) -> (i32, i32) {
    %c0_i32 = arith.constant 0 : i32
    %c0_i32_0 = arith.constant 0 : i32
    %c0_i32_1 = arith.constant 0 : i32
    return %c0_i32, %c0_i32_0 : i32, i32
  }
  func.func @transform_6(%arg0: i32) -> (i32, i32, i32) {
    %c0_i32 = arith.constant 0 : i32
    %c0_i32_0 = arith.constant 0 : i32
    %c0_i32_1 = arith.constant 0 : i32
    %c0_i32_2 = arith.constant 0 : i32
    return %c0_i32, %c0_i32_0, %c0_i32_1 : i32, i32, i32
  }
  func.func @transform_7(%arg0: i32) -> (i32, i32) {
    %c0_i32 = arith.constant 0 : i32
    %c0_i32_0 = arith.constant 0 : i32
    %c0_i32_1 = arith.constant 0 : i32
    return %c0_i32, %c0_i32_0 : i32, i32
  }
  func.func @transform_8(%arg0: i32) -> (i32, i32, i32) {
    %c0_i32 = arith.constant 0 : i32
    %c0_i32_0 = arith.constant 0 : i32
    %c0_i32_1 = arith.constant 0 : i32
    %c0_i32_2 = arith.constant 0 : i32
    return %c0_i32, %c0_i32_0, %c0_i32_1 : i32, i32, i32
  }
  func.func @transform_9(%arg0: i32) -> (i32, i32) {
    %c0_i32 = arith.constant 0 : i32
    %c0_i32_0 = arith.constant 0 : i32
    %c0_i32_1 = arith.constant 0 : i32
    return %c0_i32, %c0_i32_0 : i32, i32
  }
  func.func @transform_10(%arg0: i32) -> (i32, i32, i32) {
    %c0_i32 = arith.constant 0 : i32
    %c0_i32_0 = arith.constant 0 : i32
    %c0_i32_1 = arith.constant 0 : i32
    %c0_i32_2 = arith.constant 0 : i32
    return %c0_i32, %c0_i32_0, %c0_i32_1 : i32, i32, i32
  }
  func.func @transform_11(%arg0: i32) -> (i32, i32) {
    %c0_i32 = arith.constant 0 : i32
    %c0_i32_0 = arith.constant 0 : i32
    %c0_i32_1 = arith.constant 0 : i32
    return %c0_i32, %c0_i32_0 : i32, i32
  }
  func.func @transform_12(%arg0: i32) -> (i32, i32) {
    %c0_i32 = arith.constant 0 : i32
    %c0_i32_0 = arith.constant 0 : i32
    %c0_i32_1 = arith.constant 0 : i32
    return %c0_i32, %c0_i32_0 : i32, i32
  }
  func.func @transform_13(%arg0: i32) -> (i32, i32) {
    %c0_i32 = arith.constant 0 : i32
    %c0_i32_0 = arith.constant 0 : i32
    %c0_i32_1 = arith.constant 0 : i32
    return %c0_i32, %c0_i32_0 : i32, i32
  }
  func.func @transform_14(%arg0: i32) -> (i32, i32, i32) {
    %c0_i32 = arith.constant 0 : i32
    %c0_i32_0 = arith.constant 0 : i32
    %c0_i32_1 = arith.constant 0 : i32
    return %arg0, %c0_i32, %c0_i32_0 : i32, i32, i32
  }
}

</mosaic_0001>

<bundles_post_ra>
// kernel: tpu_custom_call.1
= control target key start
LH: loop header
LB: loop body
LE: loop exit
PB: predicated region body
PF: predicated region fallthrough
CT: control target
= control target key end

     0   :  { %vm147_vm0 = vcmask 1043456   ;;  %v5986_v2 = vmov 0.0   ;;  %s5987_s17 = smov 1   ;;  %vm140_vm1 = vcmask 31744   ;;  %s5988_s21 = smov 127   ;;  %v5989_v7 = vmov 0   ;;  %s8025_s0 = inlined_call_operand.vmem [shape: f32[4,512], index: 0, kind: input, shape index: {}]   ;;  %s8026_s4 = inlined_call_operand.vmem [shape: f32[3,16,4], index: 4, kind: input, shape index: {}]   ;;  %s8027_s5 = inlined_call_operand.vmem [shape: f32[16,1], index: 5, kind: input, shape index: {}]   ;;  %s8028_s1 = inlined_call_operand.vmem [shape: f32[1,512], index: 1, kind: input, shape index: {}]   ;;  %s8029_s2 = inlined_call_operand.vmem [shape: f32[1,512], index: 2, kind: input, shape index: {}]   ;;  %s8030_s6 = inlined_call_operand.vmem [shape: f32[3,32,16], index: 6, kind: input, shape index: {}]   ;;  %s8031_s7 = inlined_call_operand.vmem [shape: f32[32,1], index: 7, kind: input, shape index: {}]   ;;  %s8032_s8 = inlined_call_operand.vmem [shape: f32[3,64,32], index: 8, kind: input, shape index: {}]   ;;  %s8033_s9 = inlined_call_operand.vmem [shape: f32[64,1], index: 9, kind: input, shape index: {}]   ;;  %s8034_s10 = inlined_call_operand.vmem [shape: f32[3,128,64], index: 10, kind: input, shape index: {}]   ;;  %s8035_s11 = inlined_call_operand.vmem [shape: f32[128,1], index: 11, kind: input, shape index: {}]   ;;  %s8036_s13 = inlined_call_operand.vmem [shape: f32[128,1], index: 13, kind: input, shape index: {}]   ;;  %s8037_s3 = inlined_call_operand.vmem [shape: f32[512,2], index: 3, kind: input, shape index: {}]   ;;  %s8038_s12 = inlined_call_operand.vmem [shape: f32[128,128], index: 12, kind: input, shape index: {}]   ;;  %s8039_s14 = inlined_call_operand.vmem [shape: f32[1,128,2], index: 14, kind: output, shape index: {}]  }
   0x1   :  { %v50_v0 = vld [vmem:[%s8025_s0 + $0x8] sm:$0xff]  ;;  %v49_v1 = vld [vmem:[%s8025_s0] sm:$0xff]  ;;  %220 = vmatprep.mubr.f32.mxu0 %v5986_v2  ;;  %297 = vmatprep.mubr.f32.mxu1 %v5986_v2  ;;  %v4940_v5 = vld [vmem:[%s8026_s4 + $0x10] sm:$0xff]  ;;  %v65_v10 = vlaneseq  ;;  %vm766_vm4 = vcmask 130048   ;;  %vm1559_vm5 = vcmask 261120   ;;  %vm2752_vm6 = vcmask 523264  }
   0x2   :  { %61 = vrot.lane.b32.xlu1 %v50_v0, %s5987_s17  ;;  %57 = vrot.lane.b32.xlu0 %v49_v1, %s5987_s17  ;;  %v54_v3 = vcombine.high %v50_v0, %v50_v0  ;;  %v53_v4 = vcombine.high %v49_v1, %v49_v1  ;;  %v4941_v6 = vld [vmem:[%s8026_s4 + $0x18] sm:$0xff]  ;;  %v665_v8 = vld [vmem:[%s8027_s5] sm:$0xff]  ;;  %vm4779_vm7 = vcmask 15360  }
   0x3   :  { %5948 = vset.pattern.permute.xlu0 %v5989_v7  ;;  %5949 = vset.pattern.permute.xlu1 %v5989_v7  ;;  %v666_v9 = vld [vmem:[%s8027_s5 + $0x8] sm:$0xff]  ;;  %v74_v11 = vshrl.u32 %v65_v10, 7  ;;  %v6105_v12 = vand.u32 127, %v65_v10  ;;  %v47_v17 = vld [vmem:[%s8028_s1] sm:$0xf] }
   0x4   :  { %4946 = vmatprep.subr.msk.mxu1 %vm147_vm0, %v54_v3  ;;  %4942 = vmatprep.subr.msk.mxu0 %vm147_vm0, %v53_v4  ;;  %v48_v20 = vld [vmem:[%s8029_s2] sm:$0xf]  ;;  %v136_v44 = vld [vmem:[%s8026_s4 + $0x8] sm:$0xff] }
   0x5   :  { %4943 = vmatpush1.msk.msra.mxu0 %vm147_vm0, %v49_v1  ;;  %4947 = vmatpush1.msk.msra.mxu1 %vm147_vm0, %v50_v0  ;;  %v75_v13 = vsub.s32 0, %v74_v11  ;;  %v87_v14 = vsub.s32 3, %v74_v11  ;;  %v79_v15 = vsub.s32 1, %v74_v11  ;;  %v83_v16 = vsub.s32 2, %v74_v11  ;;  %v135_v36 = vld [vmem:[%s8026_s4] sm:$0xff]  ;;  %v4959_v54 = vld [vmem:[%s8026_s4 + $0x28] sm:$0xff] }
   0x6   :  { %63 = vrot.lane.b32.xlu1 %v54_v3, %s5987_s17  ;;  %59 = vrot.lane.b32.xlu0 %v53_v4, %s5987_s17  ;;  %vm67_vm2 = vcmp.lt.s32.totalorder %v6105_v12, 1  ;;  %vm105_vm3 = vcmp.lt.s32.totalorder %v6105_v12, 127  ;;  %v4958_v53 = vld [vmem:[%s8026_s4 + $0x20] sm:$0xff]  ;;  %v2734_v12 = vld [vmem:[%s8034_s10 + $0x78] sm:$0xff] }
   0x7   :  { %4944 = vmatmul.mubr.msk.f32.vlgmr.msra.gmra.mrb[0].mxu0 %vm140_vm1, %v4940_v5  ;;  %4948 = vmatmul.mubr.msk.f32.vlgmr.msra.gmra.mrb[0].mxu1 %vm140_vm1, %v4940_v5  ;;  %v6114_v21 = vrot.slane %v47_v17, %v75_v13  ;;  %v6116_v22 = vrot.slane %v47_v17, %v87_v14  ;;  %v6118_v23 = vrot.slane %v47_v17, %v79_v15 }
   0x8   :  { %226 = vmatprep.mubr.f32.mxu0 %v5986_v2  ;;  %303 = vmatprep.mubr.f32.mxu1 %v5986_v2  ;;  %v6120_v24 = vrot.slane %v47_v17, %v83_v16  ;;  %v6123_v27 = vrot.slane %v48_v20, %v79_v15  ;;  %v6146_v40 = vrot.slane %v48_v20, %v75_v13 }
   0x9   :  { %v6151_v42 = vrot.slane %v48_v20, %v83_v16  ;;  %v6153_v43 = vrot.slane %v48_v20, %v87_v14 }
   0xa   :  { %101 = vrot.lane.b32.xlu1 %v50_v0, %s5988_s21  ;;  %99 = vrot.lane.b32.xlu0 %v53_v4, %s5988_s21 }
   0xb   :  { %4945 = vmatmul.mubr.msk.f32.gmra.mrb[2].mxu0 %vm140_vm1, %v4941_v6  ;;  %4949 = vmatmul.mubr.msk.f32.gmra.mrb[2].mxu1 %vm140_vm1, %v4941_v6 }
   0xc   :  { %392 = vmatprep.mubr.f32.mxu0 %v5986_v2  ;;  %469 = vmatprep.mubr.f32.mxu1 %v5986_v2 }
   0xe   :  { %103 = vrot.lane.b32.xlu1 %v54_v3, %s5988_s21  ;;  %97 = vrot.lane.b32.xlu0 %v49_v1, %s5988_s21 }
  0x12   :  { %669 = vperm.xlu0 %5948, %v665_v8   ;;  %674 = vperm.xlu1 %5949, %v666_v9  }
  0x74   :  { %v62_v18 = vpop.permute.xlu1 %61  ;;  %v58_v19 = vpop.permute.xlu0 %57 }
  0x78   :  { %v64_v25 = vpop.permute.xlu1 %63  ;;  %v60_v26 = vpop.permute.xlu0 %59 }
  0x79   :  { %v68_v28 = vsel %vm67_vm2, %v62_v18, %v64_v25  ;;  %v71_v29 = vsel %vm67_vm2, %v64_v25, %v58_v19  ;;  %v69_v30 = vsel %vm67_vm2, %v60_v26, %v62_v18  ;;  %v70_v31 = vsel %vm67_vm2, %v58_v19, %v60_v26 }
  0x7a   :  { %v93_v32 = vmul.f32 %v6114_v21, %v71_v29  ;;  %v96_v33 = vmul.f32 %v6116_v22, %v68_v28  ;;  %v94_v34 = vmul.f32 %v6118_v23, %v70_v31  ;;  %v95_v35 = vmul.f32 %v6120_v24, %v69_v30  ;;  %v4968_v28 = vld [vmem:[%s8030_s6 + $0x20] sm:$0xff]  ;;  %v4969_v29 = vld [vmem:[%s8030_s6 + $0x28] sm:$0xff]  ;;  %v4970_v30 = vld [vmem:[%s8030_s6 + $0x30] sm:$0xff] }
  0x7b   :  { %v4971_v31 = vld [vmem:[%s8030_s6 + $0x38] sm:$0xff] }
  0x7c   :  { %v102_v37 = vpop.permute.xlu1 %101  ;;  %4954 = vmatprep.subr.msk.mxu1 %vm147_vm0, %v96_v33  ;;  %v100_v38 = vpop.permute.xlu0 %99  ;;  %4950 = vmatprep.subr.msk.mxu0 %vm147_vm0, %v94_v34  ;;  %v1360_v33 = vld [vmem:[%s8031_s7 + $0x10] sm:$0xff]  ;;  %v1359_v34 = vld [vmem:[%s8031_s7 + $0x8] sm:$0xff] }
  0x7d   :  { %v107_v39 = vsel %vm105_vm3, %v100_v38, %v102_v37  ;;  %4951 = vmatpush1.msk.msra.mxu0 %vm147_vm0, %v93_v32  ;;  %4955 = vmatpush1.msk.msra.mxu1 %vm147_vm0, %v95_v35  ;;  %v1358_v32 = vld [vmem:[%s8031_s7] sm:$0xff]  ;;  %v1361_v35 = vld [vmem:[%s8031_s7 + $0x18] sm:$0xff] }
  0x7e   :  { %v132_v41 = vmul.f32 %v6123_v27, %v107_v39  ;;  %4952 = vmatmul.mubr.msk.f32.vlgmr.msra.gmra.mrb[0].mxu0 %vm140_vm1, %v135_v36  ;;  %4956 = vmatmul.mubr.msk.f32.vlgmr.msra.gmra.mrb[0].mxu1 %vm140_vm1, %v135_v36 }
  0x7f   :  { %398 = vmatprep.mubr.f32.mxu0 %v5986_v2  ;;  %475 = vmatprep.mubr.f32.mxu1 %v5986_v2 }
  0x80   :  { %v104_v45 = vpop.permute.xlu1 %103  ;;  %v98_v46 = vpop.permute.xlu0 %97  ;;  %4960 = vmatprep.subr.msk.mxu0 %vm147_vm0, %v132_v41 }
  0x81   :  { %v106_v47 = vsel %vm105_vm3, %v102_v37, %v104_v45  ;;  %v108_v48 = vsel %vm105_vm3, %v98_v46, %v100_v38  ;;  %v109_v49 = vsel %vm105_vm3, %v104_v45, %v98_v46 }
  0x82   :  { %v133_v50 = vmul.f32 %v6151_v42, %v106_v47  ;;  %v131_v51 = vmul.f32 %v6146_v40, %v108_v48  ;;  %v134_v52 = vmul.f32 %v6153_v43, %v109_v49  ;;  %4953 = vmatmul.mubr.msk.f32.gmra.mrb[2].mxu0 %vm140_vm1, %v136_v44  ;;  %4957 = vmatmul.mubr.msk.f32.gmra.mrb[2].mxu1 %vm140_vm1, %v136_v44 }
  0x83   :  { %567 = vmatprep.mubr.f32.mxu0 %v5986_v2  ;;  %644 = vmatprep.mubr.f32.mxu1 %v5986_v2 }
  0x84   :  { %4961 = vmatpush1.msk.msra.mxu0 %vm147_vm0, %v131_v51  ;;  %4964 = vmatprep.subr.msk.mxu1 %vm147_vm0, %v134_v52 }
  0x85   :  { %4965 = vmatpush1.msk.msra.mxu1 %vm147_vm0, %v133_v50 }
  0x86   :  { %4962 = vmatmul.mubr.msk.f32.vlgmr.msra.gmra.mrb[0].mxu0 %vm140_vm1, %v4958_v53  ;;  %4966 = vmatmul.mubr.msk.f32.vlgmr.msra.gmra.mrb[0].mxu1 %vm140_vm1, %v4958_v53 }
  0x87   :  { %573 = vmatprep.mubr.f32.mxu0 %v5986_v2  ;;  %650 = vmatprep.mubr.f32.mxu1 %v5986_v2 }
  0x8a   :  { %4963 = vmatmul.mubr.msk.f32.gmra.mrb[2].mxu0 %vm140_vm1, %v4959_v54  ;;  %4967 = vmatmul.mubr.msk.f32.gmra.mrb[2].mxu1 %vm140_vm1, %v4959_v54 }
  0x8b   :  { %843 = vmatprep.mubr.f32.mxu1 %v5986_v2  ;;  %1033 = vmatprep.mubr.f32.mxu0 %v5986_v2 }
  0x91   :  { %v670_v55 = vpop.permute.xlu0 %669  ;;  %v675_v61 = vpop.permute.xlu1 %674 }
 0x159   :  { %v646_v56 = vpop.f32.mrb[0].mxu1  ;;  %v569_v57 = vpop.f32.mrb[0].mxu0 }
 0x15a   :  { %v677_v58 = vadd.f32 %v670_v55, %v569_v57  ;;  %v571_v59 = vpop.f32.mrb[1].mxu0  ;;  %v648_v60 = vpop.f32.mrb[1].mxu1  ;;  %v679_v0 = vadd.f32 %v670_v55, %v646_v56 }
 0x15b   :  { %v678_v63 = vadd.f32 %v670_v55, %v571_v59  ;;  %v680_v1 = vadd.f32 %v670_v55, %v648_v60 }
 0x15c   :  { %v685_v62 = vmax.f32 %v677_v58, 0.0  ;;  %v687_v15 = vmax.f32 %v679_v0, 0.0 }
 0x15d   :  { %v575_v3 = vpop.f32.mrb[2].mxu0  ;;  %v652_v4 = vpop.f32.mrb[2].mxu1  ;;  %v686_v11 = vmax.f32 %v678_v63, 0.0  ;;  %v688_v16 = vmax.f32 %v680_v1, 0.0 }
 0x15e   :  { %v681_v5 = vadd.f32 %v675_v61, %v575_v3  ;;  %v683_v6 = vadd.f32 %v675_v61, %v652_v4  ;;  %v654_v7 = vpop.f32.mrb[3].mxu1  ;;  %693 = vrot.lane.b32.xlu1 %v685_v62, %s5987_s17  ;;  %v577_v8 = vpop.f32.mrb[3].mxu0  ;;  %v757_v3 = vld [vmem:[%s8030_s6] sm:$0xff] }
 0x15f   :  { %v684_v9 = vadd.f32 %v675_v61, %v654_v7  ;;  %v682_v10 = vadd.f32 %v675_v61, %v577_v8  ;;  %v758_v8 = vld [vmem:[%s8030_s6 + $0x8] sm:$0xff] }
 0x160   :  { %v689_v13 = vmax.f32 %v681_v5, 0.0  ;;  %v691_v14 = vmax.f32 %v683_v6, 0.0 }
 0x161   :  { %v692_v17 = vmax.f32 %v684_v9, 0.0  ;;  %v690_v18 = vmax.f32 %v682_v10, 0.0 }
 0x162   :  { %v5442_v19 = vpack.c.bf16 %v689_v13, %v685_v62  ;;  %697 = vrot.lane.b32.xlu1 %v686_v11, %s5987_s17  ;;  %695 = vrot.lane.b32.xlu0 %v689_v13, %s5987_s17  ;;  %v5446_v20 = vpack.c.bf16 %v691_v14, %v687_v15 }
 0x163   :  { %v5440_v25 = vpack.c.bf16 %v690_v18, %v686_v11  ;;  %v5444_v26 = vpack.c.bf16 %v692_v17, %v688_v16 }
 0x165   :  { %5441 = vmatprep.subr.bf16.mxu1 %v5440_v25 }
 0x166   :  { %705 = vrot.lane.b32.xlu1 %v688_v16, %s5987_s17  ;;  %699 = vrot.lane.b32.xlu0 %v690_v18, %s5987_s17 }
 0x167   :  { %5443 = vmatpush1.bf16.msra.mxu1 %v5442_v19 }
 0x168   :  { %5445 = vmatprep.subr.bf16.mxu1 %v5444_v26 }
 0x16a   :  { %701 = vrot.lane.b32.xlu1 %v687_v15, %s5987_s17  ;;  %707 = vrot.lane.b32.xlu0 %v692_v17, %s5987_s17 }
 0x16b   :  { %4972 = vmatmul.mubr.msk.f32.vlgmr.msra.gmra.mrb[4].mxu1 %vm766_vm4, %v4968_v28 }
 0x16c   :  { %5447 = vmatpush1.bf16.msra.mxu1 %v5446_v20  ;;  %849 = vmatprep.mubr.f32.mxu1 %v5986_v2 }
 0x16e   :  { %729 = vrot.lane.b32.xlu1 %v686_v11, %s5988_s21  ;;  %703 = vrot.lane.b32.xlu0 %v691_v14, %s5987_s17 }
 0x16f   :  { %4973 = vmatmul.mubr.msk.f32.gmra.mrb[6].mxu1 %vm766_vm4, %v4969_v29 }
 0x170   :  { %855 = vmatprep.mubr.f32.mxu1 %v5986_v2 }
 0x172   :  { %733 = vrot.lane.b32.xlu1 %v687_v15, %s5988_s21  ;;  %735 = vrot.lane.b32.xlu0 %v691_v14, %s5988_s21 }
 0x173   :  { %4974 = vmatmul.mubr.msk.f32.gmra.mrb[8].mxu1 %vm766_vm4, %v4970_v30 }
 0x174   :  { %861 = vmatprep.mubr.f32.mxu1 %v5986_v2 }
 0x176   :  { %725 = vrot.lane.b32.xlu1 %v685_v62, %s5988_s21  ;;  %727 = vrot.lane.b32.xlu0 %v689_v13, %s5988_s21  ;;  %v759_v13 = vld [vmem:[%s8030_s6 + $0x10] sm:$0xff] }
 0x177   :  { %4975 = vmatmul.mubr.msk.f32.gmra.mrb[10].mxu1 %vm766_vm4, %v4971_v31 }
 0x178   :  { %932 = vmatprep.mubr.f32.mxu1 %v5986_v2 }
 0x17a   :  { %737 = vrot.lane.b32.xlu1 %v688_v16, %s5988_s21  ;;  %731 = vrot.lane.b32.xlu0 %v690_v18, %s5988_s21 }
 0x17b   :  { %4976 = vmatmul.mubr.msk.f32.vlgmr.msra.gmra.mrb[12].mxu1 %vm766_vm4, %v4968_v28 }
 0x17c   :  { %938 = vmatprep.mubr.f32.mxu1 %v5986_v2 }
 0x17e   :  { %1364 = vperm.xlu1 %5949, %v1358_v32   ;;  %739 = vrot.lane.b32.xlu0 %v692_v17, %s5988_s21 }
 0x17f   :  { %4977 = vmatmul.mubr.msk.f32.gmra.mrb[14].mxu1 %vm766_vm4, %v4969_v29  ;;  %v760_v29 = vld [vmem:[%s8030_s6 + $0x18] sm:$0xff] }
 0x180   :  { %944 = vmatprep.mubr.f32.mxu1 %v5986_v2 }
 0x182   :  { %1374 = vperm.xlu1 %5949, %v1360_v33   ;;  %1369 = vperm.xlu0 %5948, %v1359_v34  }
 0x183   :  { %4978 = vmatmul.mubr.msk.f32.gmra.mrb[16].mxu1 %vm766_vm4, %v4970_v30 }
 0x184   :  { %950 = vmatprep.mubr.f32.mxu1 %v5986_v2 }
 0x186   :  { %1379 = vperm.xlu0 %5948, %v1361_v35  }
 0x187   :  { %4979 = vmatmul.mubr.msk.f32.gmra.mrb[18].mxu1 %vm766_vm4, %v4971_v31 }
 0x188   :  { %1122 = vmatprep.mubr.f32.mxu1 %v5986_v2 }
 0x1d0   :  { %v694_v36 = vpop.permute.xlu1 %693 }
 0x1d4   :  { %v698_v37 = vpop.permute.xlu1 %697  ;;  %v696_v38 = vpop.permute.xlu0 %695 }
 0x1d5   :  { %v713_v39 = vsel %vm67_vm2, %v694_v36, %v698_v37 }
 0x1d6   :  { %v718_v46 = vmul.f32 %v713_v39, %v6118_v23 }
 0x1d8   :  { %v706_v41 = vpop.permute.xlu1 %705  ;;  %v700_v44 = vpop.permute.xlu0 %699 }
 0x1d9   :  { %v714_v45 = vsel %vm67_vm2, %v696_v38, %v700_v44  ;;  %v715_v48 = vsel %vm67_vm2, %v706_v41, %v694_v36 }
 0x1da   :  { %v722_v47 = vmul.f32 %v714_v45, %v6118_v23  ;;  %v717_v53 = vmul.f32 %v715_v48, %v6114_v21  ;;  %v4991_v48 = vld [vmem:[%s8030_s6 + $0x58] sm:$0xff] }
 0x1dc   :  { %v702_v49 = vpop.permute.xlu1 %701  ;;  %v708_v50 = vpop.permute.xlu0 %707  ;;  %v5448_v51 = vpack.c.bf16 %v722_v47, %v718_v46  ;;  %v4989_v46 = vld [vmem:[%s8030_s6 + $0x48] sm:$0xff]  ;;  %v4990_v47 = vld [vmem:[%s8030_s6 + $0x50] sm:$0xff] }
 0x1dd   :  { %v716_v52 = vsel %vm67_vm2, %v708_v50, %v696_v38  ;;  %v709_v55 = vsel %vm67_vm2, %v702_v49, %v706_v41  ;;  %v711_v56 = vsel %vm67_vm2, %v698_v37, %v702_v49  ;;  %v4988_v41 = vld [vmem:[%s8030_s6 + $0x40] sm:$0xff] }
 0x1de   :  { %v721_v54 = vmul.f32 %v716_v52, %v6114_v21  ;;  %5449 = vmatprep.subr.bf16.mxu0 %v5448_v51  ;;  %v719_v62 = vmul.f32 %v711_v56, %v6120_v24  ;;  %v720_v63 = vmul.f32 %v709_v55, %v6116_v22 }
 0x1e0   :  { %v5450_v57 = vpack.c.bf16 %v721_v54, %v717_v53  ;;  %v730_v58 = vpop.permute.xlu1 %729  ;;  %v704_v59 = vpop.permute.xlu0 %703 }
 0x1e1   :  { %v710_v60 = vsel %vm67_vm2, %v704_v59, %v708_v50  ;;  %v712_v61 = vsel %vm67_vm2, %v700_v44, %v704_v59 }
 0x1e2   :  { %v723_v0 = vmul.f32 %v712_v61, %v6120_v24  ;;  %v724_v1 = vmul.f32 %v710_v60, %v6116_v22  ;;  %5451 = vmatpush1.bf16.msra.mxu0 %v5450_v57 }
 0x1e4   :  { %v5454_v4 = vpack.c.bf16 %v723_v0, %v719_v62  ;;  %v734_v5 = vpop.permute.xlu1 %733  ;;  %v736_v6 = vpop.permute.xlu0 %735  ;;  %v5452_v7 = vpack.c.bf16 %v724_v1, %v720_v63 }
 0x1e5   :  { %4980 = vmatmul.mubr.msk.f32.vlgmr.msra.gmra.mrb[4].mxu0 %vm766_vm4, %v757_v3  ;;  %v743_v11 = vsel %vm105_vm3, %v730_v58, %v734_v5 }
 0x1e6   :  { %5453 = vmatprep.subr.bf16.mxu1 %v5452_v7  ;;  %1039 = vmatprep.mubr.f32.mxu0 %v5986_v2  ;;  %v750_v17 = vmul.f32 %v743_v11, %v6123_v27 }
 0x1e7   :  { %5455 = vmatpush1.bf16.msra.mxu1 %v5454_v4 }
 0x1e8   :  { %v726_v9 = vpop.permute.xlu1 %725  ;;  %v728_v10 = vpop.permute.xlu0 %727 }
 0x1e9   :  { %4981 = vmatmul.mubr.msk.f32.gmra.mrb[6].mxu0 %vm766_vm4, %v758_v8  ;;  %v745_v14 = vsel %vm105_vm3, %v726_v9, %v730_v58 }
 0x1ea   :  { %4984 = vmatmul.mubr.msk.f32.vlgmr.msra.gmra.mrb[12].mxu1 %vm766_vm4, %v757_v3  ;;  %1045 = vmatprep.mubr.f32.mxu0 %v5986_v2  ;;  %v749_v20 = vmul.f32 %v745_v14, %v6146_v40 }
 0x1eb   :  { %1128 = vmatprep.mubr.f32.mxu1 %v5986_v2 }
 0x1ec   :  { %v738_v15 = vpop.permute.xlu1 %737  ;;  %v732_v16 = vpop.permute.xlu0 %731 }
 0x1ed   :  { %v744_v18 = vsel %vm105_vm3, %v732_v16, %v736_v6  ;;  %v746_v19 = vsel %vm105_vm3, %v728_v10, %v732_v16  ;;  %4982 = vmatmul.mubr.msk.f32.gmra.mrb[8].mxu0 %vm766_vm4, %v759_v13  ;;  %v741_v25 = vsel %vm105_vm3, %v734_v5, %v738_v15  ;;  %v747_v30 = vsel %vm105_vm3, %v738_v15, %v726_v9 }
 0x1ee   :  { %v753_v26 = vmul.f32 %v746_v19, %v6146_v40  ;;  %v754_v28 = vmul.f32 %v744_v18, %v6123_v27  ;;  %4985 = vmatmul.mubr.msk.f32.gmra.mrb[14].mxu1 %vm766_vm4, %v758_v8  ;;  %1051 = vmatprep.mubr.f32.mxu0 %v5986_v2  ;;  %v751_v34 = vmul.f32 %v741_v25, %v6151_v42 }
 0x1ef   :  { %1134 = vmatprep.mubr.f32.mxu1 %v5986_v2  ;;  %v752_v37 = vmul.f32 %v747_v30, %v6153_v43 }
 0x1f0   :  { %v5458_v31 = vpack.c.bf16 %v753_v26, %v749_v20  ;;  %v740_v32 = vpop.permute.xlu0 %739  ;;  %v5456_v33 = vpack.c.bf16 %v754_v28, %v750_v17 }
 0x1f1   :  { %v742_v35 = vsel %vm105_vm3, %v736_v6, %v740_v32  ;;  %v748_v36 = vsel %vm105_vm3, %v740_v32, %v728_v10  ;;  %4983 = vmatmul.mubr.msk.f32.gmra.mrb[10].mxu0 %vm766_vm4, %v760_v29 }
 0x1f2   :  { %v755_v38 = vmul.f32 %v742_v35, %v6151_v42  ;;  %v756_v39 = vmul.f32 %v748_v36, %v6153_v43  ;;  %4986 = vmatmul.mubr.msk.f32.gmra.mrb[16].mxu1 %vm766_vm4, %v759_v13  ;;  %5457 = vmatprep.subr.bf16.mxu0 %v5456_v33 }
 0x1f3   :  { %5459 = vmatpush1.bf16.msra.mxu0 %v5458_v31  ;;  %1140 = vmatprep.mubr.f32.mxu1 %v5986_v2 }
 0x1f4   :  { %v5462_v44 = vpack.c.bf16 %v755_v38, %v751_v34  ;;  %1228 = vmatprep.mubr.f32.mxu0 %v5986_v2  ;;  %v5460_v45 = vpack.c.bf16 %v756_v39, %v752_v37 }
 0x1f6   :  { %4987 = vmatmul.mubr.msk.f32.gmra.mrb[18].mxu1 %vm766_vm4, %v760_v29  ;;  %4992 = vmatmul.mubr.msk.f32.vlgmr.msra.gmra.mrb[4].mxu0 %vm766_vm4, %v4988_v41 }
 0x1f7   :  { %5461 = vmatprep.subr.bf16.mxu1 %v5460_v45  ;;  %1234 = vmatprep.mubr.f32.mxu0 %v5986_v2 }
 0x1f8   :  { %5463 = vmatpush1.bf16.msra.mxu1 %v5462_v44  ;;  %1317 = vmatprep.mubr.f32.mxu1 %v5986_v2 }
 0x1fa   :  { %4993 = vmatmul.mubr.msk.f32.gmra.mrb[6].mxu0 %vm766_vm4, %v4989_v46 }
 0x1fb   :  { %4996 = vmatmul.mubr.msk.f32.vlgmr.msra.gmra.mrb[12].mxu1 %vm766_vm4, %v4988_v41  ;;  %1240 = vmatprep.mubr.f32.mxu0 %v5986_v2 }
 0x1fc   :  { %1323 = vmatprep.mubr.f32.mxu1 %v5986_v2 }
 0x1fd   :  { %v1365_v61 = vpop.permute.xlu1 %1364 }
 0x1fe   :  { %4994 = vmatmul.mubr.msk.f32.gmra.mrb[8].mxu0 %vm766_vm4, %v4990_v47 }
 0x1ff   :  { %4997 = vmatmul.mubr.msk.f32.gmra.mrb[14].mxu1 %vm766_vm4, %v4989_v46  ;;  %1246 = vmatprep.mubr.f32.mxu0 %v5986_v2 }
 0x200   :  { %1329 = vmatprep.mubr.f32.mxu1 %v5986_v2 }
 0x201   :  { %v1370_v4 = vpop.permute.xlu0 %1369  ;;  %v1375_v32 = vpop.permute.xlu1 %1374 }
 0x202   :  { %4995 = vmatmul.mubr.msk.f32.gmra.mrb[10].mxu0 %vm766_vm4, %v4991_v48 }
 0x203   :  { %4998 = vmatmul.mubr.msk.f32.gmra.mrb[16].mxu1 %vm766_vm4, %v4990_v47  ;;  %1648 = vmatprep.mubr.f32.mxu0 %v5986_v2 }
 0x204   :  { %1335 = vmatprep.mubr.f32.mxu1 %v5986_v2 }
 0x205   :  { %v1380_v45 = vpop.permute.xlu0 %1379 }
 0x207   :  { %4999 = vmatmul.mubr.msk.f32.gmra.mrb[18].mxu1 %vm766_vm4, %v4991_v48 }
 0x208   :  { %1761 = vmatprep.mubr.f32.mxu1 %v5986_v2 }
 0x23e   :  { %v845_v49 = vpop.f32.mrb[4].mxu1 }
 0x23f   :  { %v847_v50 = vpop.f32.mrb[5].mxu1 }
 0x242   :  { %v851_v51 = vpop.f32.mrb[6].mxu1 }
 0x243   :  { %v853_v52 = vpop.f32.mrb[7].mxu1 }
 0x246   :  { %v857_v53 = vpop.f32.mrb[8].mxu1 }
 0x247   :  { %v859_v54 = vpop.f32.mrb[9].mxu1 }
 0x24a   :  { %v863_v55 = vpop.f32.mrb[10].mxu1 }
 0x24b   :  { %v865_v56 = vpop.f32.mrb[11].mxu1 }
 0x2c9   :  { %v1230_v57 = vpop.f32.mrb[4].mxu0 }
 0x2ca   :  { %v5704_v58 = vadd.f32 %v1230_v57, %v845_v49  ;;  %v1232_v59 = vpop.f32.mrb[5].mxu0 }
 0x2cb   :  { %v5705_v60 = vadd.f32 %v1232_v59, %v847_v50 }
 0x2cc   :  { %v1382_v63 = vadd.f32 %v5704_v58, %v1365_v61 }
 0x2cd   :  { %v1236_v62 = vpop.f32.mrb[6].mxu0  ;;  %v1383_v5 = vadd.f32 %v5705_v60, %v1365_v61 }
 0x2ce   :  { %v5706_v0 = vadd.f32 %v1236_v62, %v851_v51  ;;  %v1319_v1 = vpop.f32.mrb[12].mxu1  ;;  %v1238_v3 = vpop.f32.mrb[7].mxu0  ;;  %v6353_v15 = vmax.f32 %v1382_v63, 0.0 }
 0x2cf   :  { %v1384_v6 = vadd.f32 %v1365_v61, %v1319_v1  ;;  %v5707_v7 = vadd.f32 %v1238_v3, %v853_v52  ;;  %v1321_v8 = vpop.f32.mrb[13].mxu1  ;;  %v6357_v20 = vmax.f32 %v1383_v5, 0.0 }
 0x2d0   :  { %v1386_v9 = vadd.f32 %v5706_v0, %v1370_v4  ;;  %v1385_v13 = vadd.f32 %v1365_v61, %v1321_v8  ;;  %v5000_v8 = vld [vmem:[%s8032_s8 + $0x40] sm:$0xff] }
 0x2d1   :  { %v6351_v10 = vmax.f32 %v1384_v6, 0.0  ;;  %v1387_v11 = vadd.f32 %v5707_v7, %v1370_v4  ;;  %v1242_v14 = vpop.f32.mrb[8].mxu0 }
 0x2d2   :  { %v6355_v16 = vmax.f32 %v1386_v9, 0.0  ;;  %v5708_v17 = vadd.f32 %v1242_v14, %v857_v53  ;;  %v1325_v18 = vpop.f32.mrb[14].mxu1  ;;  %v1244_v19 = vpop.f32.mrb[9].mxu0  ;;  %v6365_v33 = vmax.f32 %v1385_v13, 0.0  ;;  %v5001_v9 = vld [vmem:[%s8032_s8 + $0x48] sm:$0xff]  ;;  %v5003_v13 = vld [vmem:[%s8032_s8 + $0x58] sm:$0xff] }
 0x2d3   :  { %v6359_v25 = vmax.f32 %v1387_v11, 0.0  ;;  %v1388_v26 = vadd.f32 %v1370_v4, %v1325_v18  ;;  %v5709_v28 = vadd.f32 %v1244_v19, %v859_v54  ;;  %1430 = vrot.lane.b32.xlu1 %v6351_v10, %s5987_s17  ;;  %v1327_v29 = vpop.f32.mrb[15].mxu1  ;;  %v5002_v11 = vld [vmem:[%s8032_s8 + $0x50] sm:$0xff]  ;;  %v5004_v14 = vld [vmem:[%s8032_s8 + $0x60] sm:$0xff]  ;;  %v2352_v19 = vld [vmem:[%s8033_s9 + $0x8] sm:$0xff] }
 0x2d4   :  { %v1389_v30 = vadd.f32 %v1370_v4, %v1327_v29  ;;  %v5466_v31 = vpack.c.bf16 %v6355_v16, %v6353_v15  ;;  %v1390_v37 = vadd.f32 %v5708_v17, %v1375_v32  ;;  %v5005_v17 = vld [vmem:[%s8032_s8 + $0x68] sm:$0xff]  ;;  %v2353_v18 = vld [vmem:[%s8033_s9 + $0x10] sm:$0xff]  ;;  %v2358_v29 = vld [vmem:[%s8033_s9 + $0x38] sm:$0xff] }
 0x2d5   :  { %v6367_v34 = vmax.f32 %v1388_v26, 0.0  ;;  %v1248_v35 = vpop.f32.mrb[10].mxu0  ;;  %v5464_v36 = vpack.c.bf16 %v6359_v25, %v6357_v20  ;;  %v1391_v47 = vadd.f32 %v5709_v28, %v1375_v32  ;;  %v2357_v26 = vld [vmem:[%s8033_s9 + $0x30] sm:$0xff]  ;;  %v2356_v28 = vld [vmem:[%s8033_s9 + $0x28] sm:$0xff] }
 0x2d6   :  { %v6371_v38 = vmax.f32 %v1389_v30, 0.0  ;;  %v5710_v39 = vadd.f32 %v1248_v35, %v863_v55  ;;  %v1331_v41 = vpop.f32.mrb[16].mxu1  ;;  %v1250_v44 = vpop.f32.mrb[11].mxu0  ;;  %v6381_v54 = vmax.f32 %v1390_v37, 0.0 }
 0x2d7   :  { %v5474_v46 = vpack.c.bf16 %v6367_v34, %v6351_v10  ;;  %v5711_v48 = vadd.f32 %v1250_v44, %v865_v56  ;;  %1438 = vrot.lane.b32.xlu1 %v6365_v33, %s5987_s17  ;;  %1432 = vrot.lane.b32.xlu0 %v6367_v34, %s5987_s17  ;;  %v1333_v49 = vpop.f32.mrb[17].mxu1  ;;  %v1392_v52 = vadd.f32 %v1375_v32, %v1331_v41  ;;  %v6385_v58 = vmax.f32 %v1391_v47, 0.0 }
 0x2d8   :  { %v1394_v50 = vadd.f32 %v5710_v39, %v1380_v45  ;;  %5465 = vmatprep.subr.bf16.mxu0 %v5464_v36  ;;  %v5472_v51 = vpack.c.bf16 %v6371_v38, %v6365_v33  ;;  %v1393_v56 = vadd.f32 %v1375_v32, %v1333_v49 }
 0x2d9   :  { %v1395_v53 = vadd.f32 %v5711_v48, %v1380_v45  ;;  %5467 = vmatpush1.bf16.msra.mxu0 %v5466_v31  ;;  %v6395_v0 = vmax.f32 %v1392_v52, 0.0 }
 0x2da   :  { %v6383_v55 = vmax.f32 %v1394_v50, 0.0  ;;  %v1337_v57 = vpop.f32.mrb[18].mxu1  ;;  %5473 = vmatprep.subr.bf16.mxu1 %v5472_v51  ;;  %v6401_v4 = vmax.f32 %v1393_v56, 0.0 }
 0x2db   :  { %v6387_v59 = vmax.f32 %v1395_v53, 0.0  ;;  %v1396_v60 = vadd.f32 %v1380_v45, %v1337_v57  ;;  %1414 = vrot.lane.b32.xlu1 %v6353_v15, %s5987_s17  ;;  %1440 = vrot.lane.b32.xlu0 %v6371_v38, %s5987_s17  ;;  %v1339_v61 = vpop.f32.mrb[19].mxu1 }
 0x2dc   :  { %v1397_v62 = vadd.f32 %v1380_v45, %v1339_v61  ;;  %5475 = vmatpush1.bf16.msra.mxu1 %v5474_v46  ;;  %v5470_v63 = vpack.c.bf16 %v6383_v55, %v6381_v54 }
 0x2dd   :  { %v6397_v1 = vmax.f32 %v1396_v60, 0.0  ;;  %v5468_v3 = vpack.c.bf16 %v6387_v59, %v6385_v58 }
 0x2de   :  { %v6403_v5 = vmax.f32 %v1397_v62, 0.0 }
 0x2df   :  { %v5478_v6 = vpack.c.bf16 %v6397_v1, %v6395_v0  ;;  %1422 = vrot.lane.b32.xlu1 %v6357_v20, %s5987_s17  ;;  %1416 = vrot.lane.b32.xlu0 %v6355_v16, %s5987_s17 }
 0x2e0   :  { %5469 = vmatprep.subr.bf16.mxu0 %v5468_v3  ;;  %v5476_v7 = vpack.c.bf16 %v6403_v5, %v6401_v4 }
 0x2e1   :  { %5471 = vmatpush1.bf16.msra.mxu0 %v5470_v63 }
 0x2e2   :  { %5477 = vmatprep.subr.bf16.mxu1 %v5476_v7 }
 0x2e3   :  { %1424 = vrot.lane.b32.xlu0 %v6359_v25, %s5987_s17  ;;  %1434 = vrot.lane.b32.xlu1 %v6395_v0, %s5987_s17 }
 0x2e4   :  { %5479 = vmatpush1.bf16.msra.mxu1 %v5478_v6  ;;  %5008 = vmatmul.mubr.msk.f32.vlgmr.msra.gmra.mrb[12].mxu0 %vm1559_vm5, %v5000_v8 }
 0x2e5   :  { %1654 = vmatprep.mubr.f32.mxu0 %v5986_v2 }
 0x2e7   :  { %1442 = vrot.lane.b32.xlu1 %v6401_v4, %s5987_s17  ;;  %1436 = vrot.lane.b32.xlu0 %v6397_v1, %s5987_s17 }
 0x2e8   :  { %5016 = vmatmul.mubr.msk.f32.vlgmr.msra.gmra.mrb[20].mxu1 %vm1559_vm5, %v5000_v8  ;;  %5009 = vmatmul.mubr.msk.f32.gmra.mrb[14].mxu0 %vm1559_vm5, %v5001_v9 }
 0x2e9   :  { %1767 = vmatprep.mubr.f32.mxu1 %v5986_v2  ;;  %1660 = vmatprep.mubr.f32.mxu0 %v5986_v2 }
 0x2eb   :  { %1418 = vrot.lane.b32.xlu1 %v6381_v54, %s5987_s17  ;;  %1444 = vrot.lane.b32.xlu0 %v6403_v5, %s5987_s17 }
 0x2ec   :  { %5017 = vmatmul.mubr.msk.f32.gmra.mrb[22].mxu1 %vm1559_vm5, %v5001_v9  ;;  %5010 = vmatmul.mubr.msk.f32.gmra.mrb[16].mxu0 %vm1559_vm5, %v5002_v11 }
 0x2ed   :  { %1773 = vmatprep.mubr.f32.mxu1 %v5986_v2  ;;  %1666 = vmatprep.mubr.f32.mxu0 %v5986_v2 }
 0x2ef   :  { %1426 = vrot.lane.b32.xlu1 %v6385_v58, %s5987_s17  ;;  %1420 = vrot.lane.b32.xlu0 %v6383_v55, %s5987_s17 }
 0x2f0   :  { %5018 = vmatmul.mubr.msk.f32.gmra.mrb[24].mxu1 %vm1559_vm5, %v5002_v11  ;;  %5011 = vmatmul.mubr.msk.f32.gmra.mrb[18].mxu0 %vm1559_vm5, %v5003_v13 }
 0x2f1   :  { %1779 = vmatprep.mubr.f32.mxu1 %v5986_v2  ;;  %1672 = vmatprep.mubr.f32.mxu0 %v5986_v2 }
 0x2f3   :  { %1478 = vrot.lane.b32.xlu1 %v6353_v15, %s5988_s21  ;;  %1428 = vrot.lane.b32.xlu0 %v6387_v59, %s5987_s17  ;;  %v5006_v15 = vld [vmem:[%s8032_s8 + $0x70] sm:$0xff] }
 0x2f4   :  { %5019 = vmatmul.mubr.msk.f32.gmra.mrb[26].mxu1 %vm1559_vm5, %v5003_v13  ;;  %5012 = vmatmul.mubr.msk.f32.gmra.mrb[20].mxu0 %vm1559_vm5, %v5004_v14 }
 0x2f5   :  { %1785 = vmatprep.mubr.f32.mxu1 %v5986_v2  ;;  %1678 = vmatprep.mubr.f32.mxu0 %v5986_v2 }
 0x2f7   :  { %1486 = vrot.lane.b32.xlu1 %v6357_v20, %s5988_s21  ;;  %1480 = vrot.lane.b32.xlu0 %v6355_v16, %s5988_s21  ;;  %v5007_v16 = vld [vmem:[%s8032_s8 + $0x78] sm:$0xff]  ;;  %v2355_v20 = vld [vmem:[%s8033_s9 + $0x20] sm:$0xff] }
 0x2f8   :  { %5020 = vmatmul.mubr.msk.f32.gmra.mrb[28].mxu1 %vm1559_vm5, %v5004_v14  ;;  %5013 = vmatmul.mubr.msk.f32.gmra.mrb[22].mxu0 %vm1559_vm5, %v5005_v17 }
 0x2f9   :  { %1791 = vmatprep.mubr.f32.mxu1 %v5986_v2  ;;  %1684 = vmatprep.mubr.f32.mxu0 %v5986_v2 }
 0x2fb   :  { %1494 = vrot.lane.b32.xlu1 %v6351_v10, %s5988_s21  ;;  %1488 = vrot.lane.b32.xlu0 %v6359_v25, %s5988_s21  ;;  %v2351_v10 = vld [vmem:[%s8033_s9] sm:$0xff]  ;;  %v2354_v25 = vld [vmem:[%s8033_s9 + $0x18] sm:$0xff] }
 0x2fc   :  { %5021 = vmatmul.mubr.msk.f32.gmra.mrb[30].mxu1 %vm1559_vm5, %v5005_v17  ;;  %5014 = vmatmul.mubr.msk.f32.gmra.mrb[24].mxu0 %vm1559_vm5, %v5006_v15 }
 0x2fd   :  { %1797 = vmatprep.mubr.f32.mxu1 %v5986_v2  ;;  %1690 = vmatprep.mubr.f32.mxu0 %v5986_v2 }
 0x2ff   :  { %1502 = vrot.lane.b32.xlu1 %v6365_v33, %s5988_s21  ;;  %1496 = vrot.lane.b32.xlu0 %v6367_v34, %s5988_s21 }
 0x300   :  { %5022 = vmatmul.mubr.msk.f32.gmra.mrb[32].mxu1 %vm1559_vm5, %v5006_v15  ;;  %5015 = vmatmul.mubr.msk.f32.gmra.mrb[26].mxu0 %vm1559_vm5, %v5007_v16 }
 0x301   :  { %1803 = vmatprep.mubr.f32.mxu1 %v5986_v2  ;;  %1898 = vmatprep.mubr.f32.mxu0 %v5986_v2 }
 0x303   :  { %1482 = vrot.lane.b32.xlu1 %v6381_v54, %s5988_s21  ;;  %1504 = vrot.lane.b32.xlu0 %v6371_v38, %s5988_s21 }
 0x304   :  { %5023 = vmatmul.mubr.msk.f32.gmra.mrb[34].mxu1 %vm1559_vm5, %v5007_v16 }
 0x305   :  { %2011 = vmatprep.mubr.f32.mxu1 %v5986_v2 }
 0x307   :  { %1490 = vrot.lane.b32.xlu1 %v6385_v58, %s5988_s21  ;;  %1484 = vrot.lane.b32.xlu0 %v6383_v55, %s5988_s21 }
 0x30b   :  { %1498 = vrot.lane.b32.xlu1 %v6395_v0, %s5988_s21  ;;  %1500 = vrot.lane.b32.xlu0 %v6397_v1, %s5988_s21 }
 0x30f   :  { %1506 = vrot.lane.b32.xlu1 %v6401_v4, %s5988_s21  ;;  %1492 = vrot.lane.b32.xlu0 %v6387_v59, %s5988_s21 }
 0x313   :  { %2361 = vperm.xlu1 %5949, %v2351_v10   ;;  %1508 = vrot.lane.b32.xlu0 %v6403_v5, %s5988_s21 }
 0x317   :  { %2371 = vperm.xlu1 %5949, %v2353_v18   ;;  %2366 = vperm.xlu0 %5948, %v2352_v19  }
 0x31b   :  { %2381 = vperm.xlu1 %5949, %v2355_v20   ;;  %2376 = vperm.xlu0 %5948, %v2354_v25  }
 0x31f   :  { %2391 = vperm.xlu1 %5949, %v2357_v26   ;;  %2386 = vperm.xlu0 %5948, %v2356_v28  }
 0x323   :  { %2396 = vperm.xlu0 %5948, %v2358_v29  }
 0x345   :  { %v1431_v30 = vpop.permute.xlu1 %1430 }
 0x349   :  { %v1439_v31 = vpop.permute.xlu1 %1438  ;;  %v1433_v32 = vpop.permute.xlu0 %1432 }
 0x34a   :  { %v1446_v33 = vsel %vm67_vm2, %v1431_v30, %v1439_v31 }
 0x34b   :  { %v1465_v37 = vmul.f32 %v1446_v33, %v6116_v22 }
 0x34d   :  { %v1415_v34 = vpop.permute.xlu1 %1414  ;;  %v1441_v35 = vpop.permute.xlu0 %1440 }
 0x34e   :  { %v1447_v36 = vsel %vm67_vm2, %v1433_v32, %v1441_v35  ;;  %v1458_v48 = vsel %vm67_vm2, %v1439_v31, %v1415_v34 }
 0x34f   :  { %v1469_v38 = vmul.f32 %v1447_v36, %v6116_v22  ;;  %v1462_v58 = vmul.f32 %v1458_v48, %v6114_v21 }
 0x351   :  { %v1423_v39 = vpop.permute.xlu1 %1422  ;;  %v1417_v41 = vpop.permute.xlu0 %1416  ;;  %v5488_v44 = vpack.c.bf16 %v1469_v38, %v1465_v37 }
 0x352   :  { %v1459_v45 = vsel %vm67_vm2, %v1441_v35, %v1417_v41  ;;  %v1450_v46 = vsel %vm67_vm2, %v1423_v39, %v1431_v30  ;;  %v1454_v47 = vsel %vm67_vm2, %v1415_v34, %v1423_v39  ;;  %v1542_v35 = vld [vmem:[%s8032_s8] sm:$0xff]  ;;  %v1543_v39 = vld [vmem:[%s8032_s8 + $0x8] sm:$0xff] }
 0x353   :  { %5489 = vmatprep.subr.bf16.mxu1 %v5488_v44  ;;  %v1466_v51 = vmul.f32 %v1459_v45, %v6114_v21  ;;  %v1463_v54 = vmul.f32 %v1454_v47, %v6118_v23  ;;  %v1464_v55 = vmul.f32 %v1450_v46, %v6120_v24 }
 0x355   :  { %v1425_v49 = vpop.permute.xlu0 %1424  ;;  %v1435_v50 = vpop.permute.xlu1 %1434  ;;  %v5482_v63 = vpack.c.bf16 %v1466_v51, %v1462_v58 }
 0x356   :  { %v1451_v52 = vsel %vm67_vm2, %v1425_v49, %v1433_v32  ;;  %v1455_v53 = vsel %vm67_vm2, %v1417_v41, %v1425_v49 }
 0x357   :  { %v1467_v56 = vmul.f32 %v1455_v53, %v6118_v23  ;;  %v1468_v57 = vmul.f32 %v1451_v52, %v6120_v24  ;;  %v1544_v52 = vld [vmem:[%s8032_s8 + $0x10] sm:$0xff] }
 0x359   :  { %v5490_v59 = vpack.c.bf16 %v1468_v57, %v1464_v55  ;;  %v1443_v60 = vpop.permute.xlu1 %1442  ;;  %v1437_v61 = vpop.permute.xlu0 %1436  ;;  %v5480_v62 = vpack.c.bf16 %v1467_v56, %v1463_v54 }
 0x35a   :  { %v1448_v0 = vsel %vm67_vm2, %v1435_v50, %v1443_v60 }
 0x35b   :  { %5481 = vmatprep.subr.bf16.mxu0 %v5480_v62  ;;  %5491 = vmatpush1.bf16.msra.mxu1 %v5490_v59  ;;  %v1473_v5 = vmul.f32 %v1448_v0, %v6116_v22 }
 0x35c   :  { %5483 = vmatpush1.bf16.msra.mxu0 %v5482_v63 }
 0x35d   :  { %v1419_v1 = vpop.permute.xlu1 %1418  ;;  %v1445_v3 = vpop.permute.xlu0 %1444 }
 0x35e   :  { %v1449_v4 = vsel %vm67_vm2, %v1437_v61, %v1445_v3  ;;  %v1460_v17 = vsel %vm67_vm2, %v1443_v60, %v1419_v1 }
 0x35f   :  { %v1477_v6 = vmul.f32 %v1449_v4, %v6116_v22  ;;  %v1470_v29 = vmul.f32 %v1460_v17, %v6114_v21 }
 0x361   :  { %v1427_v7 = vpop.permute.xlu1 %1426  ;;  %v1421_v8 = vpop.permute.xlu0 %1420  ;;  %v5492_v9 = vpack.c.bf16 %v1477_v6, %v1473_v5 }
 0x362   :  { %v1461_v11 = vsel %vm67_vm2, %v1445_v3, %v1421_v8  ;;  %v1452_v13 = vsel %vm67_vm2, %v1427_v7, %v1435_v50  ;;  %v1456_v14 = vsel %vm67_vm2, %v1419_v1, %v1427_v7  ;;  %v1545_v1 = vld [vmem:[%s8032_s8 + $0x18] sm:$0xff]  ;;  %v1546_v7 = vld [vmem:[%s8032_s8 + $0x20] sm:$0xff] }
 0x363   :  { %5493 = vmatprep.subr.bf16.mxu1 %v5492_v9  ;;  %v1474_v10 = vmul.f32 %v1461_v11, %v6114_v21  ;;  %v1471_v20 = vmul.f32 %v1456_v14, %v6118_v23  ;;  %v1472_v25 = vmul.f32 %v1452_v13, %v6120_v24  ;;  %v1547_v13 = vld [vmem:[%s8032_s8 + $0x28] sm:$0xff] }
 0x365   :  { %v1479_v15 = vpop.permute.xlu1 %1478  ;;  %v1429_v16 = vpop.permute.xlu0 %1428  ;;  %v5486_v34 = vpack.c.bf16 %v1474_v10, %v1470_v29 }
 0x366   :  { %v1453_v18 = vsel %vm67_vm2, %v1429_v16, %v1437_v61  ;;  %v1457_v19 = vsel %vm67_vm2, %v1421_v8, %v1429_v16 }
 0x367   :  { %v1475_v26 = vmul.f32 %v1457_v19, %v6118_v23  ;;  %v1476_v28 = vmul.f32 %v1453_v18, %v6120_v24 }
 0x369   :  { %v5494_v30 = vpack.c.bf16 %v1476_v28, %v1472_v25  ;;  %v1487_v31 = vpop.permute.xlu1 %1486  ;;  %v1481_v32 = vpop.permute.xlu0 %1480  ;;  %v5484_v33 = vpack.c.bf16 %v1475_v26, %v1471_v20  ;;  %v1548_v28 = vld [vmem:[%s8032_s8 + $0x30] sm:$0xff] }
 0x36a   :  { %v1518_v44 = vsel %vm105_vm3, %v1479_v15, %v1487_v31 }
 0x36b   :  { %5485 = vmatprep.subr.bf16.mxu0 %v5484_v33  ;;  %5495 = vmatpush1.bf16.msra.mxu1 %v5494_v30  ;;  %v1526_v53 = vmul.f32 %v1518_v44, %v6146_v40 }
 0x36c   :  { %5487 = vmatpush1.bf16.msra.mxu0 %v5486_v34 }
 0x36d   :  { %v1495_v36 = vpop.permute.xlu1 %1494  ;;  %v1489_v37 = vpop.permute.xlu0 %1488 }
 0x36e   :  { %5032 = vmatmul.mubr.msk.f32.vlgmr.msra.gmra.mrb[20].mxu1 %vm1559_vm5, %v1542_v35  ;;  %v1519_v38 = vsel %vm105_vm3, %v1481_v32, %v1489_v37  ;;  %v1514_v41 = vsel %vm105_vm3, %v1487_v31, %v1495_v36 }
 0x36f   :  { %5024 = vmatmul.mubr.msk.f32.vlgmr.msra.gmra.mrb[12].mxu0 %vm1559_vm5, %v1542_v35  ;;  %2017 = vmatprep.mubr.f32.mxu1 %v5986_v2  ;;  %v1530_v47 = vmul.f32 %v1519_v38, %v6146_v40  ;;  %v1527_v49 = vmul.f32 %v1514_v41, %v6123_v27 }
 0x370   :  { %1904 = vmatprep.mubr.f32.mxu0 %v5986_v2 }
 0x371   :  { %v1503_v45 = vpop.permute.xlu1 %1502  ;;  %v1497_v46 = vpop.permute.xlu0 %1496  ;;  %v5498_v58 = vpack.c.bf16 %v1530_v47, %v1526_v53  ;;  %v5042_v47 = vld [vmem:[%s8032_s8 + $0x90] sm:$0xff] }
 0x372   :  { %v1515_v48 = vsel %vm105_vm3, %v1489_v37, %v1497_v46  ;;  %5033 = vmatmul.mubr.msk.f32.gmra.mrb[22].mxu1 %vm1559_vm5, %v1543_v39  ;;  %v1510_v50 = vsel %vm105_vm3, %v1495_v36, %v1503_v45  ;;  %v1522_v54 = vsel %vm105_vm3, %v1503_v45, %v1479_v15  ;;  %v5040_v45 = vld [vmem:[%s8032_s8 + $0x80] sm:$0xff] }
 0x373   :  { %v1531_v51 = vmul.f32 %v1515_v48, %v6123_v27  ;;  %5025 = vmatmul.mubr.msk.f32.gmra.mrb[14].mxu0 %vm1559_vm5, %v1543_v39  ;;  %2023 = vmatprep.mubr.f32.mxu1 %v5986_v2  ;;  %v1528_v59 = vmul.f32 %v1510_v50, %v6151_v42  ;;  %v1529_v62 = vmul.f32 %v1522_v54, %v6153_v43  ;;  %v1549_v39 = vld [vmem:[%s8032_s8 + $0x38] sm:$0xff]  ;;  %v5045_v50 = vld [vmem:[%s8032_s8 + $0xa8] sm:$0xff] }
 0x374   :  { %1910 = vmatprep.mubr.f32.mxu0 %v5986_v2  ;;  %v5043_v48 = vld [vmem:[%s8032_s8 + $0x98] sm:$0xff] }
 0x375   :  { %v1483_v55 = vpop.permute.xlu1 %1482  ;;  %v1505_v56 = vpop.permute.xlu0 %1504  ;;  %v5496_v57 = vpack.c.bf16 %v1531_v51, %v1527_v49  ;;  %v5044_v49 = vld [vmem:[%s8032_s8 + $0xa0] sm:$0xff]  ;;  %v5046_v51 = vld [vmem:[%s8032_s8 + $0xb0] sm:$0xff] }
 0x376   :  { %v1511_v60 = vsel %vm105_vm3, %v1497_v46, %v1505_v56  ;;  %v1523_v61 = vsel %vm105_vm3, %v1505_v56, %v1481_v32  ;;  %5034 = vmatmul.mubr.msk.f32.gmra.mrb[24].mxu1 %vm1559_vm5, %v1544_v52  ;;  %v5041_v46 = vld [vmem:[%s8032_s8 + $0x88] sm:$0xff] }
 0x377   :  { %v1532_v63 = vmul.f32 %v1511_v60, %v6151_v42  ;;  %v1533_v0 = vmul.f32 %v1523_v61, %v6153_v43  ;;  %5026 = vmatmul.mubr.msk.f32.gmra.mrb[16].mxu0 %vm1559_vm5, %v1544_v52  ;;  %5497 = vmatprep.subr.bf16.mxu0 %v5496_v57  ;;  %v5047_v52 = vld [vmem:[%s8032_s8 + $0xb8] sm:$0xff] }
 0x378   :  { %5499 = vmatpush1.bf16.msra.mxu0 %v5498_v58  ;;  %1916 = vmatprep.mubr.f32.mxu0 %v5986_v2 }
 0x379   :  { %v5506_v3 = vpack.c.bf16 %v1532_v63, %v1528_v59  ;;  %v1491_v4 = vpop.permute.xlu1 %1490  ;;  %v1485_v5 = vpop.permute.xlu0 %1484  ;;  %2029 = vmatprep.mubr.f32.mxu1 %v5986_v2  ;;  %v5504_v6 = vpack.c.bf16 %v1533_v0, %v1529_v62 }
 0x37a   :  { %5035 = vmatmul.mubr.msk.f32.gmra.mrb[26].mxu1 %vm1559_vm5, %v1545_v1  ;;  %v1520_v11 = vsel %vm105_vm3, %v1483_v55, %v1491_v4 }
 0x37b   :  { %5027 = vmatmul.mubr.msk.f32.gmra.mrb[18].mxu0 %vm1559_vm5, %v1545_v1  ;;  %5505 = vmatprep.subr.bf16.mxu1 %v5504_v6  ;;  %v1534_v16 = vmul.f32 %v1520_v11, %v6146_v40 }
 0x37c   :  { %5507 = vmatpush1.bf16.msra.mxu1 %v5506_v3  ;;  %1922 = vmatprep.mubr.f32.mxu0 %v5986_v2 }
 0x37d   :  { %v1499_v8 = vpop.permute.xlu1 %1498  ;;  %v1501_v9 = vpop.permute.xlu0 %1500  ;;  %2035 = vmatprep.mubr.f32.mxu1 %v5986_v2 }
 0x37e   :  { %5036 = vmatmul.mubr.msk.f32.gmra.mrb[28].mxu1 %vm1559_vm5, %v1546_v7  ;;  %v1516_v14 = vsel %vm105_vm3, %v1491_v4, %v1499_v8 }
 0x37f   :  { %5028 = vmatmul.mubr.msk.f32.gmra.mrb[20].mxu0 %vm1559_vm5, %v1546_v7  ;;  %2041 = vmatprep.mubr.f32.mxu1 %v5986_v2  ;;  %v1535_v19 = vmul.f32 %v1516_v14, %v6123_v27 }
 0x380   :  { %1928 = vmatprep.mubr.f32.mxu0 %v5986_v2 }
 0x381   :  { %v1507_v17 = vpop.permute.xlu1 %1506  ;;  %v1493_v15 = vpop.permute.xlu0 %1492 }
 0x382   :  { %v1517_v10 = vsel %vm105_vm3, %v1493_v15, %v1501_v9  ;;  %v1521_v18 = vsel %vm105_vm3, %v1485_v5, %v1493_v15  ;;  %5037 = vmatmul.mubr.msk.f32.gmra.mrb[30].mxu1 %vm1559_vm5, %v1547_v13  ;;  %v1512_v20 = vsel %vm105_vm3, %v1499_v8, %v1507_v17  ;;  %v1524_v29 = vsel %vm105_vm3, %v1507_v17, %v1483_v55 }
 0x383   :  { %v1538_v25 = vmul.f32 %v1521_v18, %v6146_v40  ;;  %v1539_v26 = vmul.f32 %v1517_v10, %v6123_v27  ;;  %5029 = vmatmul.mubr.msk.f32.gmra.mrb[22].mxu0 %vm1559_vm5, %v1547_v13  ;;  %2047 = vmatprep.mubr.f32.mxu1 %v5986_v2  ;;  %v1536_v33 = vmul.f32 %v1512_v20, %v6151_v42 }
 0x384   :  { %1934 = vmatprep.mubr.f32.mxu0 %v5986_v2  ;;  %v1537_v36 = vmul.f32 %v1524_v29, %v6153_v43 }
 0x385   :  { %v5502_v30 = vpack.c.bf16 %v1538_v25, %v1534_v16  ;;  %v1509_v31 = vpop.permute.xlu0 %1508  ;;  %v5500_v32 = vpack.c.bf16 %v1539_v26, %v1535_v19 }
 0x386   :  { %v1513_v34 = vsel %vm105_vm3, %v1501_v9, %v1509_v31  ;;  %v1525_v35 = vsel %vm105_vm3, %v1509_v31, %v1485_v5  ;;  %5038 = vmatmul.mubr.msk.f32.gmra.mrb[32].mxu1 %vm1559_vm5, %v1548_v28 }
 0x387   :  { %v1540_v37 = vmul.f32 %v1513_v34, %v6151_v42  ;;  %v1541_v38 = vmul.f32 %v1525_v35, %v6153_v43  ;;  %5030 = vmatmul.mubr.msk.f32.gmra.mrb[24].mxu0 %vm1559_vm5, %v1548_v28  ;;  %5501 = vmatprep.subr.bf16.mxu0 %v5500_v32 }
 0x388   :  { %5503 = vmatpush1.bf16.msra.mxu0 %v5502_v30  ;;  %1940 = vmatprep.mubr.f32.mxu0 %v5986_v2 }
 0x389   :  { %v5510_v41 = vpack.c.bf16 %v1540_v37, %v1536_v33  ;;  %2053 = vmatprep.mubr.f32.mxu1 %v5986_v2  ;;  %v5508_v44 = vpack.c.bf16 %v1541_v38, %v1537_v36 }
 0x38a   :  { %5039 = vmatmul.mubr.msk.f32.gmra.mrb[34].mxu1 %vm1559_vm5, %v1549_v39 }
 0x38b   :  { %5031 = vmatmul.mubr.msk.f32.gmra.mrb[26].mxu0 %vm1559_vm5, %v1549_v39  ;;  %5509 = vmatprep.subr.bf16.mxu1 %v5508_v44 }
 0x38c   :  { %5511 = vmatpush1.bf16.msra.mxu1 %v5510_v41  ;;  %2157 = vmatprep.mubr.f32.mxu0 %v5986_v2 }
 0x38d   :  { %2270 = vmatprep.mubr.f32.mxu1 %v5986_v2 }
 0x38f   :  { %5048 = vmatmul.mubr.msk.f32.vlgmr.msra.gmra.mrb[12].mxu0 %vm1559_vm5, %v5040_v45  ;;  %5056 = vmatmul.mubr.msk.f32.vlgmr.msra.gmra.mrb[20].mxu1 %vm1559_vm5, %v5040_v45 }
 0x390   :  { %2163 = vmatprep.mubr.f32.mxu0 %v5986_v2  ;;  %2276 = vmatprep.mubr.f32.mxu1 %v5986_v2 }
 0x392   :  { %v2362_v53 = vpop.permute.xlu1 %2361 }
 0x393   :  { %5049 = vmatmul.mubr.msk.f32.gmra.mrb[14].mxu0 %vm1559_vm5, %v5041_v46  ;;  %5057 = vmatmul.mubr.msk.f32.gmra.mrb[22].mxu1 %vm1559_vm5, %v5041_v46 }
 0x394   :  { %2169 = vmatprep.mubr.f32.mxu0 %v5986_v2  ;;  %2282 = vmatprep.mubr.f32.mxu1 %v5986_v2 }
 0x396   :  { %v2367_v59 = vpop.permute.xlu0 %2366  ;;  %v2372_v26 = vpop.permute.xlu1 %2371 }
 0x397   :  { %5050 = vmatmul.mubr.msk.f32.gmra.mrb[16].mxu0 %vm1559_vm5, %v5042_v47  ;;  %5058 = vmatmul.mubr.msk.f32.gmra.mrb[24].mxu1 %vm1559_vm5, %v5042_v47 }
 0x398   :  { %2175 = vmatprep.mubr.f32.mxu0 %v5986_v2  ;;  %2288 = vmatprep.mubr.f32.mxu1 %v5986_v2 }
 0x39a   :  { %v2377_v30 = vpop.permute.xlu0 %2376 }
 0x39b   :  { %5051 = vmatmul.mubr.msk.f32.gmra.mrb[18].mxu0 %vm1559_vm5, %v5043_v48  ;;  %5059 = vmatmul.mubr.msk.f32.gmra.mrb[26].mxu1 %vm1559_vm5, %v5043_v48 }
 0x39c   :  { %2181 = vmatprep.mubr.f32.mxu0 %v5986_v2  ;;  %2294 = vmatprep.mubr.f32.mxu1 %v5986_v2 }
 0x39f   :  { %5052 = vmatmul.mubr.msk.f32.gmra.mrb[20].mxu0 %vm1559_vm5, %v5044_v49  ;;  %5060 = vmatmul.mubr.msk.f32.gmra.mrb[28].mxu1 %vm1559_vm5, %v5044_v49 }
 0x3a0   :  { %2187 = vmatprep.mubr.f32.mxu0 %v5986_v2  ;;  %2300 = vmatprep.mubr.f32.mxu1 %v5986_v2 }
 0x3a3   :  { %5053 = vmatmul.mubr.msk.f32.gmra.mrb[22].mxu0 %vm1559_vm5, %v5045_v50  ;;  %5061 = vmatmul.mubr.msk.f32.gmra.mrb[30].mxu1 %vm1559_vm5, %v5045_v50 }
 0x3a4   :  { %2193 = vmatprep.mubr.f32.mxu0 %v5986_v2  ;;  %2306 = vmatprep.mubr.f32.mxu1 %v5986_v2 }
 0x3a7   :  { %5054 = vmatmul.mubr.msk.f32.gmra.mrb[24].mxu0 %vm1559_vm5, %v5046_v51  ;;  %5062 = vmatmul.mubr.msk.f32.gmra.mrb[32].mxu1 %vm1559_vm5, %v5046_v51 }
 0x3a8   :  { %2199 = vmatprep.mubr.f32.mxu0 %v5986_v2  ;;  %2312 = vmatprep.mubr.f32.mxu1 %v5986_v2 }
 0x3ab   :  { %5055 = vmatmul.mubr.msk.f32.gmra.mrb[26].mxu0 %vm1559_vm5, %v5047_v52  ;;  %5063 = vmatmul.mubr.msk.f32.gmra.mrb[34].mxu1 %vm1559_vm5, %v5047_v52 }
 0x3ac   :  { %2865 = vmatprep.mubr.f32.mxu0 %v5986_v2  ;;  %3026 = vmatprep.mubr.f32.mxu1 %v5986_v2 }
 0x462   :  { %v2159_v54 = vpop.f32.mrb[12].mxu0  ;;  %v2272_v55 = vpop.f32.mrb[20].mxu1 }
 0x463   :  { %v2401_v56 = vadd.f32 %v2362_v53, %v2272_v55  ;;  %v2161_v57 = vpop.f32.mrb[13].mxu0  ;;  %v2274_v58 = vpop.f32.mrb[21].mxu1  ;;  %v2399_v60 = vadd.f32 %v2362_v53, %v2159_v54 }
 0x464   :  { %v2400_v62 = vadd.f32 %v2362_v53, %v2161_v57  ;;  %v2402_v63 = vadd.f32 %v2362_v53, %v2274_v58  ;;  %v2382_v58 = vpop.permute.xlu1 %2381 }
 0x465   :  { %v6751_v61 = vmax.f32 %v2401_v56, 0.0  ;;  %v6755_v9 = vmax.f32 %v2399_v60, 0.0 }
 0x466   :  { %v2165_v0 = vpop.f32.mrb[14].mxu0  ;;  %v2278_v1 = vpop.f32.mrb[22].mxu1  ;;  %v6761_v14 = vmax.f32 %v2400_v62, 0.0  ;;  %v6763_v17 = vmax.f32 %v2402_v63, 0.0 }
 0x467   :  { %v2403_v3 = vadd.f32 %v2367_v59, %v2165_v0  ;;  %v2405_v4 = vadd.f32 %v2367_v59, %v2278_v1  ;;  %v2167_v5 = vpop.f32.mrb[15].mxu0  ;;  %2495 = vrot.lane.b32.xlu1 %v6751_v61, %s5987_s17  ;;  %v2280_v6 = vpop.f32.mrb[23].mxu1 }
 0x468   :  { %v2404_v7 = vadd.f32 %v2367_v59, %v2167_v5  ;;  %v2406_v8 = vadd.f32 %v2367_v59, %v2280_v6  ;;  %v2387_v63 = vpop.permute.xlu0 %2386 }
 0x469   :  { %v6757_v11 = vmax.f32 %v2403_v3, 0.0  ;;  %v6759_v13 = vmax.f32 %v2405_v4, 0.0 }
 0x46a   :  { %v6765_v15 = vmax.f32 %v2404_v7, 0.0  ;;  %v6767_v16 = vmax.f32 %v2406_v8, 0.0  ;;  %v2171_v10 = vpop.f32.mrb[16].mxu0  ;;  %v2284_v18 = vpop.f32.mrb[24].mxu1 }
 0x46b   :  { %v5514_v19 = vpack.c.bf16 %v6757_v11, %v6755_v9  ;;  %v2173_v20 = vpop.f32.mrb[17].mxu0  ;;  %2463 = vrot.lane.b32.xlu1 %v6755_v9, %s5987_s17  ;;  %v2286_v25 = vpop.f32.mrb[25].mxu1  ;;  %2497 = vrot.lane.b32.xlu0 %v6759_v13, %s5987_s17  ;;  %v5530_v32 = vpack.c.bf16 %v6759_v13, %v6751_v61  ;;  %v2407_v36 = vadd.f32 %v2372_v26, %v2171_v10 }
 0x46c   :  { %v5512_v28 = vpack.c.bf16 %v6765_v15, %v6761_v14  ;;  %v5528_v29 = vpack.c.bf16 %v6767_v16, %v6763_v17  ;;  %v2408_v31 = vadd.f32 %v2372_v26, %v2173_v20  ;;  %v2410_v33 = vadd.f32 %v2372_v26, %v2286_v25 }
 0x46d   :  { %v2409_v44 = vadd.f32 %v2372_v26, %v2284_v18  ;;  %v6797_v55 = vmax.f32 %v2407_v36, 0.0 }
 0x46e   :  { %v2177_v34 = vpop.f32.mrb[18].mxu0  ;;  %v2290_v35 = vpop.f32.mrb[26].mxu1  ;;  %5513 = vmatprep.subr.bf16.mxu0 %v5512_v28  ;;  %5529 = vmatprep.subr.bf16.mxu1 %v5528_v29  ;;  %v6785_v47 = vmax.f32 %v2408_v31, 0.0  ;;  %v6789_v49 = vmax.f32 %v2410_v33, 0.0 }
 0x46f   :  { %v2411_v37 = vadd.f32 %v2377_v30, %v2177_v34  ;;  %v2413_v38 = vadd.f32 %v2377_v30, %v2290_v35  ;;  %v2179_v39 = vpop.f32.mrb[19].mxu0  ;;  %5515 = vmatpush1.bf16.msra.mxu0 %v5514_v19  ;;  %2511 = vrot.lane.b32.xlu1 %v6763_v17, %s5987_s17  ;;  %v2292_v41 = vpop.f32.mrb[27].mxu1  ;;  %v6801_v59 = vmax.f32 %v2409_v44, 0.0 }
 0x470   :  { %v2412_v45 = vadd.f32 %v2377_v30, %v2179_v39  ;;  %2465 = vrot.lane.b32.xlu0 %v6757_v11, %s5987_s17  ;;  %v2414_v46 = vadd.f32 %v2377_v30, %v2292_v41  ;;  %5531 = vmatpush1.bf16.msra.mxu1 %v5530_v32  ;;  %v2392_v39 = vpop.permute.xlu1 %2391 }
 0x471   :  { %v6787_v48 = vmax.f32 %v2411_v37, 0.0  ;;  %v6791_v50 = vmax.f32 %v2413_v38, 0.0 }
 0x472   :  { %v6793_v51 = vmax.f32 %v2412_v45, 0.0  ;;  %v6795_v52 = vmax.f32 %v2414_v46, 0.0  ;;  %v2183_v53 = vpop.f32.mrb[20].mxu0  ;;  %v2296_v54 = vpop.f32.mrb[28].mxu1 }
 0x473   :  { %v2185_v56 = vpop.f32.mrb[21].mxu0  ;;  %2479 = vrot.lane.b32.xlu1 %v6761_v14, %s5987_s17  ;;  %v2298_v57 = vpop.f32.mrb[29].mxu1  ;;  %v5518_v0 = vpack.c.bf16 %v6787_v48, %v6797_v55  ;;  %v5534_v3 = vpack.c.bf16 %v6791_v50, %v6801_v59  ;;  %v2415_v7 = vadd.f32 %v2382_v58, %v2183_v53  ;;  %v2417_v20 = vadd.f32 %v2382_v58, %v2296_v54 }
 0x474   :  { %2513 = vrot.lane.b32.xlu0 %v6767_v16, %s5987_s17  ;;  %v5516_v60 = vpack.c.bf16 %v6793_v51, %v6785_v47  ;;  %v5532_v62 = vpack.c.bf16 %v6795_v52, %v6789_v49  ;;  %v2416_v1 = vadd.f32 %v2382_v58, %v2185_v56  ;;  %v2418_v4 = vadd.f32 %v2382_v58, %v2298_v57  ;;  %v2397_v46 = vpop.permute.xlu0 %2396 }
 0x475   :  { %v6829_v36 = vmax.f32 %v2415_v7, 0.0  ;;  %v6833_v41 = vmax.f32 %v2417_v20, 0.0 }
 0x476   :  { %v2189_v5 = vpop.f32.mrb[22].mxu0  ;;  %v2302_v6 = vpop.f32.mrb[30].mxu1  ;;  %5517 = vmatprep.subr.bf16.mxu0 %v5516_v60  ;;  %5533 = vmatprep.subr.bf16.mxu1 %v5532_v62  ;;  %v6817_v28 = vmax.f32 %v2416_v1, 0.0  ;;  %v6821_v30 = vmax.f32 %v2418_v4, 0.0 }
 0x477   :  { %v2419_v8 = vadd.f32 %v2387_v63, %v2189_v5  ;;  %v2421_v10 = vadd.f32 %v2387_v63, %v2302_v6  ;;  %v2191_v18 = vpop.f32.mrb[23].mxu0  ;;  %5519 = vmatpush1.bf16.msra.mxu0 %v5518_v0  ;;  %2499 = vrot.lane.b32.xlu1 %v6801_v59, %s5987_s17  ;;  %v2304_v19 = vpop.f32.mrb[31].mxu1 }
 0x478   :  { %v2420_v25 = vadd.f32 %v2387_v63, %v2191_v18  ;;  %2481 = vrot.lane.b32.xlu0 %v6765_v15, %s5987_s17  ;;  %v2422_v26 = vadd.f32 %v2387_v63, %v2304_v19  ;;  %5535 = vmatpush1.bf16.msra.mxu1 %v5534_v3 }
 0x479   :  { %v6819_v29 = vmax.f32 %v2419_v8, 0.0  ;;  %v6823_v31 = vmax.f32 %v2421_v10, 0.0 }
 0x47a   :  { %v6825_v32 = vmax.f32 %v2420_v25, 0.0  ;;  %v6827_v33 = vmax.f32 %v2422_v26, 0.0  ;;  %v2195_v34 = vpop.f32.mrb[24].mxu0  ;;  %v2308_v35 = vpop.f32.mrb[32].mxu1 }
 0x47b   :  { %v2197_v37 = vpop.f32.mrb[25].mxu0  ;;  %2467 = vrot.lane.b32.xlu1 %v6797_v55, %s5987_s17  ;;  %v2310_v38 = vpop.f32.mrb[33].mxu1  ;;  %v5522_v53 = vpack.c.bf16 %v6819_v29, %v6829_v36  ;;  %v5538_v56 = vpack.c.bf16 %v6823_v31, %v6833_v41  ;;  %v2423_v62 = vadd.f32 %v2392_v39, %v2195_v34  ;;  %v2425_v4 = vadd.f32 %v2392_v39, %v2308_v35 }
 0x47c   :  { %2501 = vrot.lane.b32.xlu0 %v6791_v50, %s5987_s17  ;;  %v5520_v44 = vpack.c.bf16 %v6825_v32, %v6817_v28  ;;  %v5536_v45 = vpack.c.bf16 %v6827_v33, %v6821_v30  ;;  %v2424_v54 = vadd.f32 %v2392_v39, %v2197_v37  ;;  %v2426_v57 = vadd.f32 %v2392_v39, %v2310_v38  ;;  %v5064_v39 = vld [vmem:[%s8034_s10 + $0x80] sm:$0xff] }
 0x47d   :  { %v6861_v25 = vmax.f32 %v2423_v62, 0.0  ;;  %v6865_v26 = vmax.f32 %v2425_v4, 0.0 }
 0x47e   :  { %v2201_v58 = vpop.f32.mrb[26].mxu0  ;;  %v2314_v60 = vpop.f32.mrb[34].mxu1  ;;  %5521 = vmatprep.subr.bf16.mxu0 %v5520_v44  ;;  %5537 = vmatprep.subr.bf16.mxu1 %v5536_v45  ;;  %v6849_v7 = vmax.f32 %v2424_v54, 0.0  ;;  %v6853_v10 = vmax.f32 %v2426_v57, 0.0  ;;  %v5065_v44 = vld [vmem:[%s8034_s10 + $0x88] sm:$0xff]  ;;  %v5066_v45 = vld [vmem:[%s8034_s10 + $0x90] sm:$0xff] }
 0x47f   :  { %v2427_v63 = vadd.f32 %v2397_v46, %v2201_v58  ;;  %v2429_v0 = vadd.f32 %v2397_v46, %v2314_v60  ;;  %v2203_v1 = vpop.f32.mrb[27].mxu0  ;;  %5523 = vmatpush1.bf16.msra.mxu0 %v5522_v53  ;;  %2515 = vrot.lane.b32.xlu1 %v6789_v49, %s5987_s17  ;;  %v2316_v3 = vpop.f32.mrb[35].mxu1  ;;  %v5068_v53 = vld [vmem:[%s8034_s10 + $0xa0] sm:$0xff]  ;;  %v5069_v54 = vld [vmem:[%s8034_s10 + $0xa8] sm:$0xff]  ;;  %v5071_v57 = vld [vmem:[%s8034_s10 + $0xb8] sm:$0xff] }
 0x480   :  { %v2428_v5 = vadd.f32 %v2397_v46, %v2203_v1  ;;  %2469 = vrot.lane.b32.xlu0 %v6787_v48, %s5987_s17  ;;  %v2430_v6 = vadd.f32 %v2397_v46, %v2316_v3  ;;  %5539 = vmatpush1.bf16.msra.mxu1 %v5538_v56  ;;  %v5067_v46 = vld [vmem:[%s8034_s10 + $0x98] sm:$0xff]  ;;  %v5070_v56 = vld [vmem:[%s8034_s10 + $0xb0] sm:$0xff]  ;;  %v5072_v58 = vld [vmem:[%s8034_s10 + $0xc0] sm:$0xff] }
 0x481   :  { %v6851_v8 = vmax.f32 %v2427_v63, 0.0  ;;  %v6855_v18 = vmax.f32 %v2429_v0, 0.0  ;;  %v3945_v60 = vld [vmem:[%s8035_s11 + $0x8] sm:$0xff] }
 0x482   :  { %v6857_v19 = vmax.f32 %v2428_v5, 0.0  ;;  %v6859_v20 = vmax.f32 %v2430_v6, 0.0 }
 0x483   :  { %2483 = vrot.lane.b32.xlu1 %v6785_v47, %s5987_s17  ;;  %v5526_v37 = vpack.c.bf16 %v6851_v8, %v6861_v25  ;;  %v5542_v38 = vpack.c.bf16 %v6855_v18, %v6865_v26 }
 0x484   :  { %2517 = vrot.lane.b32.xlu0 %v6795_v52, %s5987_s17  ;;  %v5524_v34 = vpack.c.bf16 %v6857_v19, %v6849_v7  ;;  %v5540_v35 = vpack.c.bf16 %v6859_v20, %v6853_v10 }
 0x486   :  { %5525 = vmatprep.subr.bf16.mxu0 %v5524_v34  ;;  %5541 = vmatprep.subr.bf16.mxu1 %v5540_v35 }
 0x487   :  { %5527 = vmatpush1.bf16.msra.mxu0 %v5526_v37  ;;  %2503 = vrot.lane.b32.xlu1 %v6833_v41, %s5987_s17  ;;  %v3950_v37 = vld [vmem:[%s8035_s11 + $0x30] sm:$0xff] }
 0x488   :  { %2485 = vrot.lane.b32.xlu0 %v6793_v51, %s5987_s17  ;;  %5543 = vmatpush1.bf16.msra.mxu1 %v5542_v38 }
 0x48a   :  { %5080 = vmatmul.mubr.msk.f32.vlgmr.msra.gmra.mrb[28].mxu0 %vm2752_vm6, %v5064_v39 }
 0x48b   :  { %2471 = vrot.lane.b32.xlu1 %v6829_v36, %s5987_s17  ;;  %5096 = vmatmul.mubr.msk.f32.vlgmr.msra.gmra.mrb[36].mxu1 %vm2752_vm6, %v5064_v39  ;;  %v3949_v39 = vld [vmem:[%s8035_s11 + $0x28] sm:$0xff] }
 0x48c   :  { %2505 = vrot.lane.b32.xlu0 %v6823_v31, %s5987_s17  ;;  %2871 = vmatprep.mubr.f32.mxu0 %v5986_v2 }
 0x48d   :  { %3032 = vmatprep.mubr.f32.mxu1 %v5986_v2 }
 0x48e   :  { %5081 = vmatmul.mubr.msk.f32.gmra.mrb[30].mxu0 %vm2752_vm6, %v5065_v44 }
 0x48f   :  { %2519 = vrot.lane.b32.xlu1 %v6821_v30, %s5987_s17  ;;  %5097 = vmatmul.mubr.msk.f32.gmra.mrb[38].mxu1 %vm2752_vm6, %v5065_v44 }
 0x490   :  { %2473 = vrot.lane.b32.xlu0 %v6819_v29, %s5987_s17  ;;  %2877 = vmatprep.mubr.f32.mxu0 %v5986_v2 }
 0x491   :  { %3038 = vmatprep.mubr.f32.mxu1 %v5986_v2 }
 0x492   :  { %5082 = vmatmul.mubr.msk.f32.gmra.mrb[32].mxu0 %vm2752_vm6, %v5066_v45 }
 0x493   :  { %2487 = vrot.lane.b32.xlu1 %v6817_v28, %s5987_s17  ;;  %5098 = vmatmul.mubr.msk.f32.gmra.mrb[40].mxu1 %vm2752_vm6, %v5066_v45  ;;  %v3952_v45 = vld [vmem:[%s8035_s11 + $0x40] sm:$0xff] }
 0x494   :  { %2521 = vrot.lane.b32.xlu0 %v6827_v33, %s5987_s17  ;;  %2883 = vmatprep.mubr.f32.mxu0 %v5986_v2 }
 0x495   :  { %3044 = vmatprep.mubr.f32.mxu1 %v5986_v2 }
 0x496   :  { %5083 = vmatmul.mubr.msk.f32.gmra.mrb[34].mxu0 %vm2752_vm6, %v5067_v46 }
 0x497   :  { %2507 = vrot.lane.b32.xlu1 %v6865_v26, %s5987_s17  ;;  %5099 = vmatmul.mubr.msk.f32.gmra.mrb[42].mxu1 %vm2752_vm6, %v5067_v46 }
 0x498   :  { %2489 = vrot.lane.b32.xlu0 %v6825_v32, %s5987_s17  ;;  %2889 = vmatprep.mubr.f32.mxu0 %v5986_v2 }
 0x499   :  { %3050 = vmatprep.mubr.f32.mxu1 %v5986_v2 }
 0x49a   :  { %5084 = vmatmul.mubr.msk.f32.gmra.mrb[36].mxu0 %vm2752_vm6, %v5068_v53 }
 0x49b   :  { %2475 = vrot.lane.b32.xlu1 %v6861_v25, %s5987_s17  ;;  %5100 = vmatmul.mubr.msk.f32.gmra.mrb[44].mxu1 %vm2752_vm6, %v5068_v53 }
 0x49c   :  { %2509 = vrot.lane.b32.xlu0 %v6855_v18, %s5987_s17  ;;  %2895 = vmatprep.mubr.f32.mxu0 %v5986_v2 }
 0x49d   :  { %3056 = vmatprep.mubr.f32.mxu1 %v5986_v2 }
 0x49e   :  { %5085 = vmatmul.mubr.msk.f32.gmra.mrb[38].mxu0 %vm2752_vm6, %v5069_v54 }
 0x49f   :  { %2523 = vrot.lane.b32.xlu1 %v6853_v10, %s5987_s17  ;;  %5101 = vmatmul.mubr.msk.f32.gmra.mrb[46].mxu1 %vm2752_vm6, %v5069_v54  ;;  %v3951_v54 = vld [vmem:[%s8035_s11 + $0x38] sm:$0xff] }
 0x4a0   :  { %2477 = vrot.lane.b32.xlu0 %v6851_v8, %s5987_s17  ;;  %2901 = vmatprep.mubr.f32.mxu0 %v5986_v2 }
 0x4a1   :  { %3062 = vmatprep.mubr.f32.mxu1 %v5986_v2 }
 0x4a2   :  { %5086 = vmatmul.mubr.msk.f32.gmra.mrb[40].mxu0 %vm2752_vm6, %v5070_v56 }
 0x4a3   :  { %2491 = vrot.lane.b32.xlu1 %v6849_v7, %s5987_s17  ;;  %5102 = vmatmul.mubr.msk.f32.gmra.mrb[48].mxu1 %vm2752_vm6, %v5070_v56 }
 0x4a4   :  { %2525 = vrot.lane.b32.xlu0 %v6859_v20, %s5987_s17  ;;  %2907 = vmatprep.mubr.f32.mxu0 %v5986_v2 }
 0x4a5   :  { %3068 = vmatprep.mubr.f32.mxu1 %v5986_v2 }
 0x4a6   :  { %5087 = vmatmul.mubr.msk.f32.gmra.mrb[42].mxu0 %vm2752_vm6, %v5071_v57 }
 0x4a7   :  { %2591 = vrot.lane.b32.xlu1 %v6755_v9, %s5988_s21  ;;  %5103 = vmatmul.mubr.msk.f32.gmra.mrb[50].mxu1 %vm2752_vm6, %v5071_v57  ;;  %v5073_v9 = vld [vmem:[%s8034_s10 + $0xc8] sm:$0xff] }
 0x4a8   :  { %2493 = vrot.lane.b32.xlu0 %v6857_v19, %s5987_s17  ;;  %2913 = vmatprep.mubr.f32.mxu0 %v5986_v2 }
 0x4a9   :  { %3074 = vmatprep.mubr.f32.mxu1 %v5986_v2 }
 0x4aa   :  { %5088 = vmatmul.mubr.msk.f32.gmra.mrb[44].mxu0 %vm2752_vm6, %v5072_v58 }
 0x4ab   :  { %2607 = vrot.lane.b32.xlu1 %v6761_v14, %s5988_s21  ;;  %5104 = vmatmul.mubr.msk.f32.gmra.mrb[52].mxu1 %vm2752_vm6, %v5072_v58  ;;  %v5074_v14 = vld [vmem:[%s8034_s10 + $0xd0] sm:$0xff] }
 0x4ac   :  { %2593 = vrot.lane.b32.xlu0 %v6757_v11, %s5988_s21  ;;  %2919 = vmatprep.mubr.f32.mxu0 %v5986_v2  ;;  %v5076_v11 = vld [vmem:[%s8034_s10 + $0xe0] sm:$0xff] }
 0x4ad   :  { %3080 = vmatprep.mubr.f32.mxu1 %v5986_v2 }
 0x4ae   :  { %5089 = vmatmul.mubr.msk.f32.gmra.mrb[46].mxu0 %vm2752_vm6, %v5073_v9 }
 0x4af   :  { %2623 = vrot.lane.b32.xlu1 %v6751_v61, %s5988_s21  ;;  %5105 = vmatmul.mubr.msk.f32.gmra.mrb[54].mxu1 %vm2752_vm6, %v5073_v9  ;;  %v5075_v61 = vld [vmem:[%s8034_s10 + $0xd8] sm:$0xff] }
 0x4b0   :  { %2609 = vrot.lane.b32.xlu0 %v6765_v15, %s5988_s21  ;;  %2925 = vmatprep.mubr.f32.mxu0 %v5986_v2  ;;  %v5079_v15 = vld [vmem:[%s8034_s10 + $0xf8] sm:$0xff] }
 0x4b1   :  { %3086 = vmatprep.mubr.f32.mxu1 %v5986_v2 }
 0x4b2   :  { %5090 = vmatmul.mubr.msk.f32.gmra.mrb[48].mxu0 %vm2752_vm6, %v5074_v14 }
 0x4b3   :  { %2639 = vrot.lane.b32.xlu1 %v6763_v17, %s5988_s21  ;;  %5106 = vmatmul.mubr.msk.f32.gmra.mrb[56].mxu1 %vm2752_vm6, %v5074_v14  ;;  %v5078_v17 = vld [vmem:[%s8034_s10 + $0xf0] sm:$0xff] }
 0x4b4   :  { %2625 = vrot.lane.b32.xlu0 %v6759_v13, %s5988_s21  ;;  %2931 = vmatprep.mubr.f32.mxu0 %v5986_v2  ;;  %v5077_v13 = vld [vmem:[%s8034_s10 + $0xe8] sm:$0xff] }
 0x4b5   :  { %3092 = vmatprep.mubr.f32.mxu1 %v5986_v2 }
 0x4b6   :  { %5091 = vmatmul.mubr.msk.f32.gmra.mrb[50].mxu0 %vm2752_vm6, %v5075_v61 }
 0x4b7   :  { %2595 = vrot.lane.b32.xlu1 %v6797_v55, %s5988_s21  ;;  %5107 = vmatmul.mubr.msk.f32.gmra.mrb[58].mxu1 %vm2752_vm6, %v5075_v61 }
 0x4b8   :  { %2641 = vrot.lane.b32.xlu0 %v6767_v16, %s5988_s21  ;;  %2937 = vmatprep.mubr.f32.mxu0 %v5986_v2 }
 0x4b9   :  { %3098 = vmatprep.mubr.f32.mxu1 %v5986_v2 }
 0x4ba   :  { %5092 = vmatmul.mubr.msk.f32.gmra.mrb[52].mxu0 %vm2752_vm6, %v5076_v11 }
 0x4bb   :  { %2611 = vrot.lane.b32.xlu1 %v6785_v47, %s5988_s21  ;;  %5108 = vmatmul.mubr.msk.f32.gmra.mrb[60].mxu1 %vm2752_vm6, %v5076_v11  ;;  %v3954_v11 = vld [vmem:[%s8035_s11 + $0x50] sm:$0xff] }
 0x4bc   :  { %2597 = vrot.lane.b32.xlu0 %v6787_v48, %s5988_s21  ;;  %2943 = vmatprep.mubr.f32.mxu0 %v5986_v2 }
 0x4bd   :  { %3104 = vmatprep.mubr.f32.mxu1 %v5986_v2 }
 0x4be   :  { %5093 = vmatmul.mubr.msk.f32.gmra.mrb[54].mxu0 %vm2752_vm6, %v5077_v13 }
 0x4bf   :  { %2627 = vrot.lane.b32.xlu1 %v6801_v59, %s5988_s21  ;;  %5109 = vmatmul.mubr.msk.f32.gmra.mrb[62].mxu1 %vm2752_vm6, %v5077_v13 }
 0x4c0   :  { %2613 = vrot.lane.b32.xlu0 %v6793_v51, %s5988_s21  ;;  %2949 = vmatprep.mubr.f32.mxu0 %v5986_v2  ;;  %v3944_v51 = vld [vmem:[%s8035_s11] sm:$0xff] }
 0x4c1   :  { %3110 = vmatprep.mubr.f32.mxu1 %v5986_v2 }
 0x4c2   :  { %5094 = vmatmul.mubr.msk.f32.gmra.mrb[56].mxu0 %vm2752_vm6, %v5078_v17 }
 0x4c3   :  { %2643 = vrot.lane.b32.xlu1 %v6789_v49, %s5988_s21  ;;  %5110 = vmatmul.mubr.msk.f32.gmra.mrb[64].mxu1 %vm2752_vm6, %v5078_v17 }
 0x4c4   :  { %2629 = vrot.lane.b32.xlu0 %v6791_v50, %s5988_s21  ;;  %2955 = vmatprep.mubr.f32.mxu0 %v5986_v2 }
 0x4c5   :  { %3116 = vmatprep.mubr.f32.mxu1 %v5986_v2 }
 0x4c6   :  { %5095 = vmatmul.mubr.msk.f32.gmra.mrb[58].mxu0 %vm2752_vm6, %v5079_v15 }
 0x4c7   :  { %2599 = vrot.lane.b32.xlu1 %v6829_v36, %s5988_s21  ;;  %5111 = vmatmul.mubr.msk.f32.gmra.mrb[66].mxu1 %vm2752_vm6, %v5079_v15  ;;  %v3953_v15 = vld [vmem:[%s8035_s11 + $0x48] sm:$0xff] }
 0x4c8   :  { %2645 = vrot.lane.b32.xlu0 %v6795_v52, %s5988_s21  ;;  %3235 = vmatprep.mubr.f32.mxu0 %v5986_v2 }
 0x4c9   :  { %3396 = vmatprep.mubr.f32.mxu1 %v5986_v2 }
 0x4cb   :  { %2615 = vrot.lane.b32.xlu1 %v6817_v28, %s5988_s21 }
 0x4cc   :  { %2601 = vrot.lane.b32.xlu0 %v6819_v29, %s5988_s21 }
 0x4cf   :  { %2631 = vrot.lane.b32.xlu1 %v6833_v41, %s5988_s21 }
 0x4d0   :  { %2617 = vrot.lane.b32.xlu0 %v6825_v32, %s5988_s21 }
 0x4d3   :  { %2647 = vrot.lane.b32.xlu1 %v6821_v30, %s5988_s21 }
 0x4d4   :  { %2633 = vrot.lane.b32.xlu0 %v6823_v31, %s5988_s21 }
 0x4d7   :  { %2603 = vrot.lane.b32.xlu1 %v6861_v25, %s5988_s21 }
 0x4d8   :  { %2649 = vrot.lane.b32.xlu0 %v6827_v33, %s5988_s21  ;;  %v3946_v33 = vld [vmem:[%s8035_s11 + $0x10] sm:$0xff] }
 0x4d9   :  { %v2496_v16 = vpop.permute.xlu1 %2495 }
 0x4db   :  { %2619 = vrot.lane.b32.xlu1 %v6849_v7, %s5988_s21 }
 0x4dc   :  { %2605 = vrot.lane.b32.xlu0 %v6851_v8, %s5988_s21 }
 0x4dd   :  { %v2464_v47 = vpop.permute.xlu1 %2463  ;;  %v2498_v48 = vpop.permute.xlu0 %2497 }
 0x4df   :  { %2635 = vrot.lane.b32.xlu1 %v6865_v26, %s5988_s21 }
 0x4e0   :  { %2637 = vrot.lane.b32.xlu0 %v6855_v18, %s5988_s21 }
 0x4e1   :  { %v2512_v49 = vpop.permute.xlu1 %2511 }
 0x4e2   :  { %v2466_v50 = vpop.permute.xlu0 %2465  ;;  %v2527_v52 = vsel %vm67_vm2, %v2496_v16, %v2512_v49  ;;  %v2551_v62 = vsel %vm67_vm2, %v2512_v49, %v2464_v47 }
 0x4e3   :  { %2651 = vrot.lane.b32.xlu1 %v6853_v10, %s5988_s21  ;;  %v2562_v29 = vmul.f32 %v2527_v52, %v6116_v22  ;;  %v3948_v10 = vld [vmem:[%s8035_s11 + $0x20] sm:$0xff]  ;;  %v2559_v18 = vmul.f32 %v2551_v62, %v6114_v21  ;;  %v3958_v62 = vld [vmem:[%s8035_s11 + $0x70] sm:$0xff] }
 0x4e4   :  { %2621 = vrot.lane.b32.xlu0 %v6857_v19, %s5988_s21 }
 0x4e5   :  { %v2480_v55 = vpop.permute.xlu1 %2479 }
 0x4e6   :  { %v2514_v59 = vpop.permute.xlu0 %2513  ;;  %v2543_v30 = vsel %vm67_vm2, %v2464_v47, %v2480_v55  ;;  %v2535_v36 = vsel %vm67_vm2, %v2480_v55, %v2496_v16 }
 0x4e7   :  { %v2528_v28 = vsel %vm67_vm2, %v2498_v48, %v2514_v59  ;;  %3962 = vperm.xlu1 %5949, %v3944_v51   ;;  %v2552_v31 = vsel %vm67_vm2, %v2514_v59, %v2466_v50  ;;  %v2560_v1 = vmul.f32 %v2543_v30, %v6118_v23  ;;  %v2561_v6 = vmul.f32 %v2535_v36, %v6120_v24 }
 0x4e8   :  { %v2566_v32 = vmul.f32 %v2528_v28, %v6116_v22  ;;  %2653 = vrot.lane.b32.xlu0 %v6859_v20, %s5988_s21  ;;  %v2563_v3 = vmul.f32 %v2552_v31, %v6114_v21  ;;  %v3947_v20 = vld [vmem:[%s8035_s11 + $0x18] sm:$0xff] }
 0x4e9   :  { %v2500_v41 = vpop.permute.xlu1 %2499 }
 0x4ea   :  { %v2482_v63 = vpop.permute.xlu0 %2481  ;;  %v5560_v0 = vpack.c.bf16 %v2566_v32, %v2562_v29  ;;  %v5546_v35 = vpack.c.bf16 %v2563_v3, %v2559_v18  ;;  %v3956_v29 = vld [vmem:[%s8035_s11 + $0x60] sm:$0xff]  ;;  %v3955_v32 = vld [vmem:[%s8035_s11 + $0x58] sm:$0xff] }
 0x4eb   :  { %v2536_v4 = vsel %vm67_vm2, %v2482_v63, %v2498_v48  ;;  %v2544_v5 = vsel %vm67_vm2, %v2466_v50, %v2482_v63  ;;  %3972 = vperm.xlu1 %5949, %v3946_v33   ;;  %v4538_v3 = vld [vmem:[%s8036_s13] sm:$0xff] }
 0x4ec   :  { %v2564_v7 = vmul.f32 %v2544_v5, %v6118_v23  ;;  %v2565_v8 = vmul.f32 %v2536_v4, %v6120_v24  ;;  %3967 = vperm.xlu0 %5948, %v3945_v60   ;;  %5561 = vmatprep.subr.bf16.mxu1 %v5560_v0  ;;  %v3957_v0 = vld [vmem:[%s8035_s11 + $0x68] sm:$0xff] }
 0x4ed   :  { %v2468_v19 = vpop.permute.xlu1 %2467 }
 0x4ee   :  { %v5562_v25 = vpack.c.bf16 %v2565_v8, %v2561_v6  ;;  %v2502_v26 = vpop.permute.xlu0 %2501  ;;  %v5544_v34 = vpack.c.bf16 %v2564_v7, %v2560_v1  ;;  %v3959_v6 = vld [vmem:[%s8035_s11 + $0x78] sm:$0xff] }
 0x4ef   :  { %3982 = vperm.xlu1 %5949, %v3948_v10  }
 0x4f0   :  { %5545 = vmatprep.subr.bf16.mxu0 %v5544_v34  ;;  %3977 = vperm.xlu0 %5948, %v3947_v20  }
 0x4f1   :  { %5563 = vmatpush1.bf16.msra.mxu1 %v5562_v25  ;;  %5547 = vmatpush1.bf16.msra.mxu0 %v5546_v35  ;;  %v2516_v38 = vpop.permute.xlu1 %2515  ;;  %v4540_v25 = vld [vmem:[%s8036_s13 + $0x10] sm:$0xff]  ;;  %v4539_v35 = vld [vmem:[%s8036_s13 + $0x8] sm:$0xff] }
 0x4f2   :  { %v2470_v44 = vpop.permute.xlu0 %2469  ;;  %v2529_v46 = vsel %vm67_vm2, %v2500_v41, %v2516_v38  ;;  %v2553_v16 = vsel %vm67_vm2, %v2516_v38, %v2468_v19 }
 0x4f3   :  { %3992 = vperm.xlu1 %5949, %v3950_v37   ;;  %v2570_v58 = vmul.f32 %v2529_v46, %v6116_v22  ;;  %v2567_v30 = vmul.f32 %v2553_v16, %v6114_v21  ;;  %v4544_v16 = vld [vmem:[%s8036_s13 + $0x30] sm:$0xff] }
 0x4f4   :  { %3987 = vperm.xlu0 %5948, %v3949_v39  }
 0x4f5   :  { %v2484_v53 = vpop.permute.xlu1 %2483 }
 0x4f6   :  { %v2518_v56 = vpop.permute.xlu0 %2517  ;;  %v2545_v9 = vsel %vm67_vm2, %v2468_v19, %v2484_v53  ;;  %v2537_v13 = vsel %vm67_vm2, %v2484_v53, %v2500_v41 }
 0x4f7   :  { %v2530_v57 = vsel %vm67_vm2, %v2502_v26, %v2518_v56  ;;  %4002 = vperm.xlu1 %5949, %v3952_v45   ;;  %v2554_v14 = vsel %vm67_vm2, %v2518_v56, %v2470_v44  ;;  %v2568_v49 = vmul.f32 %v2545_v9, %v6118_v23  ;;  %v2569_v55 = vmul.f32 %v2537_v13, %v6120_v24 }
 0x4f8   :  { %v2574_v61 = vmul.f32 %v2530_v57, %v6116_v22  ;;  %3997 = vperm.xlu0 %5948, %v3951_v54   ;;  %v2571_v50 = vmul.f32 %v2554_v14, %v6114_v21 }
 0x4f9   :  { %v2504_v17 = vpop.permute.xlu1 %2503 }
 0x4fa   :  { %v2486_v47 = vpop.permute.xlu0 %2485  ;;  %v5564_v48 = vpack.c.bf16 %v2574_v61, %v2570_v58  ;;  %v5550_v60 = vpack.c.bf16 %v2571_v50, %v2567_v30  ;;  %v4542_v58 = vld [vmem:[%s8036_s13 + $0x20] sm:$0xff]  ;;  %v4541_v61 = vld [vmem:[%s8036_s13 + $0x18] sm:$0xff] }
 0x4fb   :  { %v2538_v51 = vsel %vm67_vm2, %v2486_v47, %v2502_v26  ;;  %v2546_v52 = vsel %vm67_vm2, %v2470_v44, %v2486_v47  ;;  %4012 = vperm.xlu1 %5949, %v3954_v11   ;;  %v4546_v50 = vld [vmem:[%s8036_s13 + $0x40] sm:$0xff] }
 0x4fc   :  { %v2572_v59 = vmul.f32 %v2546_v52, %v6118_v23  ;;  %v2573_v28 = vmul.f32 %v2538_v51, %v6120_v24  ;;  %4007 = vperm.xlu0 %5948, %v3953_v15   ;;  %5565 = vmatprep.subr.bf16.mxu1 %v5564_v48  ;;  %v4543_v48 = vld [vmem:[%s8036_s13 + $0x28] sm:$0xff] }
 0x4fd   :  { %v2472_v31 = vpop.permute.xlu1 %2471 }
 0x4fe   :  { %v5566_v33 = vpack.c.bf16 %v2573_v28, %v2569_v55  ;;  %v2506_v36 = vpop.permute.xlu0 %2505  ;;  %v5548_v41 = vpack.c.bf16 %v2572_v59, %v2568_v49  ;;  %v4545_v55 = vld [vmem:[%s8036_s13 + $0x38] sm:$0xff] }
 0x4ff   :  { %4022 = vperm.xlu1 %5949, %v3956_v29  }
 0x500   :  { %5549 = vmatprep.subr.bf16.mxu0 %v5548_v41  ;;  %4017 = vperm.xlu0 %5948, %v3955_v32  }
 0x501   :  { %5567 = vmatpush1.bf16.msra.mxu1 %v5566_v33  ;;  %5551 = vmatpush1.bf16.msra.mxu0 %v5550_v60  ;;  %v2520_v63 = vpop.permute.xlu1 %2519  ;;  %v4548_v33 = vld [vmem:[%s8036_s13 + $0x50] sm:$0xff]  ;;  %v4547_v60 = vld [vmem:[%s8036_s13 + $0x48] sm:$0xff] }
 0x502   :  { %v2474_v1 = vpop.permute.xlu0 %2473  ;;  %v2531_v4 = vsel %vm67_vm2, %v2504_v17, %v2520_v63  ;;  %v2555_v37 = vsel %vm67_vm2, %v2520_v63, %v2472_v31 }
 0x503   :  { %4032 = vperm.xlu1 %5949, %v3958_v62   ;;  %v2578_v10 = vmul.f32 %v2531_v4, %v6116_v22  ;;  %v2575_v9 = vmul.f32 %v2555_v37, %v6114_v21 }
 0x504   :  { %4027 = vperm.xlu0 %5948, %v3957_v0  }
 0x505   :  { %v2488_v5 = vpop.permute.xlu1 %2487 }
 0x506   :  { %v2522_v7 = vpop.permute.xlu0 %2521  ;;  %v2547_v18 = vsel %vm67_vm2, %v2472_v31, %v2488_v5  ;;  %v2539_v26 = vsel %vm67_vm2, %v2488_v5, %v2504_v17 }
 0x507   :  { %v2532_v8 = vsel %vm67_vm2, %v2506_v36, %v2522_v7  ;;  %4556 = vperm.xlu1 %5949, %v4538_v3   ;;  %v2556_v19 = vsel %vm67_vm2, %v2522_v7, %v2474_v1  ;;  %v2576_v44 = vmul.f32 %v2547_v18, %v6118_v23  ;;  %v2577_v54 = vmul.f32 %v2539_v26, %v6120_v24 }
 0x508   :  { %v2582_v20 = vmul.f32 %v2532_v8, %v6116_v22  ;;  %4037 = vperm.xlu0 %5948, %v3959_v6   ;;  %v2579_v45 = vmul.f32 %v2556_v19, %v6114_v21  ;;  %v4550_v8 = vld [vmem:[%s8036_s13 + $0x60] sm:$0xff]  ;;  %v4549_v19 = vld [vmem:[%s8036_s13 + $0x58] sm:$0xff] }
 0x509   :  { %v2508_v34 = vpop.permute.xlu1 %2507 }
 0x50a   :  { %v2490_v38 = vpop.permute.xlu0 %2489  ;;  %v5568_v39 = vpack.c.bf16 %v2582_v20, %v2578_v10  ;;  %v5554_v15 = vpack.c.bf16 %v2579_v45, %v2575_v9  ;;  %v4553_v45 = vld [vmem:[%s8036_s13 + $0x78] sm:$0xff] }
 0x50b   :  { %v2540_v46 = vsel %vm67_vm2, %v2490_v38, %v2506_v36  ;;  %v2548_v53 = vsel %vm67_vm2, %v2474_v1, %v2490_v38  ;;  %4566 = vperm.xlu1 %5949, %v4540_v25  }
 0x50c   :  { %v2580_v56 = vmul.f32 %v2548_v53, %v6118_v23  ;;  %v2581_v57 = vmul.f32 %v2540_v46, %v6120_v24  ;;  %4561 = vperm.xlu0 %5948, %v4539_v35   ;;  %5569 = vmatprep.subr.bf16.mxu1 %v5568_v39  ;;  %v2719_v35 = vld [vmem:[%s8034_s10] sm:$0xff]  ;;  %v2720_v46 = vld [vmem:[%s8034_s10 + $0x8] sm:$0xff] }
 0x50d   :  { %v2476_v14 = vpop.permute.xlu1 %2475 }
 0x50e   :  { %v5570_v11 = vpack.c.bf16 %v2581_v57, %v2577_v54  ;;  %v2510_v13 = vpop.permute.xlu0 %2509  ;;  %v5552_v17 = vpack.c.bf16 %v2580_v56, %v2576_v44 }
 0x50f   :  { %4576 = vperm.xlu1 %5949, %v4542_v58  }
 0x510   :  { %5553 = vmatprep.subr.bf16.mxu0 %v5552_v17  ;;  %4571 = vperm.xlu0 %5948, %v4541_v61   ;;  %v2721_v17 = vld [vmem:[%s8034_s10 + $0x10] sm:$0xff] }
 0x511   :  { %5571 = vmatpush1.bf16.msra.mxu1 %v5570_v11  ;;  %5555 = vmatpush1.bf16.msra.mxu0 %v5554_v15  ;;  %v2524_v47 = vpop.permute.xlu1 %2523 }
 0x512   :  { %v2478_v49 = vpop.permute.xlu0 %2477  ;;  %v2533_v51 = vsel %vm67_vm2, %v2508_v34, %v2524_v47  ;;  %v2557_v62 = vsel %vm67_vm2, %v2524_v47, %v2476_v14 }
 0x513   :  { %4586 = vperm.xlu1 %5949, %v4544_v16   ;;  %v2586_v29 = vmul.f32 %v2533_v51, %v6116_v22  ;;  %v2583_v10 = vmul.f32 %v2557_v62, %v6114_v21 }
 0x514   :  { %4581 = vperm.xlu0 %5948, %v4543_v48  }
 0x515   :  { %v2492_v52 = vpop.permute.xlu1 %2491 }
 0x516   :  { %v2526_v59 = vpop.permute.xlu0 %2525  ;;  %v2549_v30 = vsel %vm67_vm2, %v2476_v14, %v2492_v52  ;;  %v2541_v36 = vsel %vm67_vm2, %v2492_v52, %v2508_v34 }
 0x517   :  { %v2534_v28 = vsel %vm67_vm2, %v2510_v13, %v2526_v59  ;;  %4596 = vperm.xlu1 %5949, %v4546_v50   ;;  %v2558_v31 = vsel %vm67_vm2, %v2526_v59, %v2478_v49  ;;  %v2585_v5 = vmul.f32 %v2541_v36, %v6120_v24 }
 0x518   :  { %v2590_v32 = vmul.f32 %v2534_v28, %v6116_v22  ;;  %4591 = vperm.xlu0 %5948, %v4545_v55   ;;  %v2584_v22 = vmul.f32 %v2549_v30, %v6118_v23  ;;  %v2587_v1 = vmul.f32 %v2558_v31, %v6114_v21  ;;  %v4551_v21 = vld [vmem:[%s8036_s13 + $0x68] sm:$0xff]  ;;  %v2722_v28 = vld [vmem:[%s8034_s10 + $0x18] sm:$0xff] }
 0x519   :  { %v2592_v41 = vpop.permute.xlu1 %2591 }
 0x51a   :  { %v2494_v63 = vpop.permute.xlu0 %2493  ;;  %v5572_v0 = vpack.c.bf16 %v2590_v32, %v2586_v29  ;;  %v5558_v34 = vpack.c.bf16 %v2587_v1, %v2583_v10 }
 0x51b   :  { %v2542_v3 = vsel %vm67_vm2, %v2494_v63, %v2510_v13  ;;  %v2550_v4 = vsel %vm67_vm2, %v2478_v49, %v2494_v63  ;;  %4606 = vperm.xlu1 %5949, %v4548_v33   ;;  %v2723_v33 = vld [vmem:[%s8034_s10 + $0x20] sm:$0xff]  ;;  %v2724_v63 = vld [vmem:[%s8034_s10 + $0x28] sm:$0xff] }
 0x51c   :  { %v2588_v6 = vmul.f32 %v2550_v4, %v6118_v23  ;;  %v2589_v7 = vmul.f32 %v2542_v3, %v6120_v24  ;;  %4601 = vperm.xlu0 %5948, %v4547_v60   ;;  %5573 = vmatprep.subr.bf16.mxu1 %v5572_v0  ;;  %v4552_v23 = vld [vmem:[%s8036_s13 + $0x70] sm:$0xff] }
 0x51d   :  { %v2608_v18 = vpop.permute.xlu1 %2607 }
 0x51e   :  { %v5574_v20 = vpack.c.bf16 %v2589_v7, %v2585_v5  ;;  %v2594_v25 = vpop.permute.xlu0 %2593  ;;  %v5556_v26 = vpack.c.bf16 %v2588_v6, %v2584_v22  ;;  %v2671_v53 = vsel %vm105_vm3, %v2592_v41, %v2608_v18 }
 0x51f   :  { %4616 = vperm.xlu1 %5949, %v4550_v8   ;;  %v2687_v61 = vmul.f32 %v2671_v53, %v6146_v40  ;;  %v2727_v53 = vld [vmem:[%s8034_s10 + $0x40] sm:$0xff] }
 0x520   :  { %4611 = vperm.xlu0 %5948, %v4549_v19   ;;  %5557 = vmatprep.subr.bf16.mxu0 %v5556_v26 }
 0x521   :  { %5575 = vmatpush1.bf16.msra.mxu1 %v5574_v20  ;;  %5559 = vmatpush1.bf16.msra.mxu0 %v5558_v34  ;;  %v2624_v24 = vpop.permute.xlu1 %2623 }
 0x522   :  { %v2610_v37 = vpop.permute.xlu0 %2609  ;;  %v2663_v39 = vsel %vm105_vm3, %v2608_v18, %v2624_v24  ;;  %v2725_v18 = vld [vmem:[%s8034_s10 + $0x30] sm:$0xff] }
 0x523   :  { %4626 = vperm.xlu1 %5949, %v4552_v23   ;;  %v2672_v38 = vsel %vm105_vm3, %v2594_v25, %v2610_v37  ;;  %v2688_v58 = vmul.f32 %v2663_v39, %v6123_v27 }
 0x524   :  { %4621 = vperm.xlu0 %5948, %v4551_v21   ;;  %5112 = vmatmul.mubr.msk.f32.vlgmr.msra.gmra.mrb[28].mxu0 %vm2752_vm6, %v2719_v35  ;;  %v2691_v56 = vmul.f32 %v2672_v38, %v6146_v40  ;;  %v2726_v38 = vld [vmem:[%s8034_s10 + $0x38] sm:$0xff] }
 0x525   :  { %5128 = vmatmul.mubr.msk.f32.vlgmr.msra.gmra.mrb[36].mxu1 %vm2752_vm6, %v2719_v35  ;;  %v2640_v44 = vpop.permute.xlu1 %2639  ;;  %3241 = vmatprep.mubr.f32.mxu0 %v5986_v2 }
 0x526   :  { %v2626_v54 = vpop.permute.xlu0 %2625  ;;  %3402 = vmatprep.mubr.f32.mxu1 %v5986_v2  ;;  %v2655_v9 = vsel %vm105_vm3, %v2624_v24, %v2640_v44  ;;  %v2679_v11 = vsel %vm105_vm3, %v2640_v44, %v2592_v41  ;;  %v5578_v47 = vpack.c.bf16 %v2691_v56, %v2687_v61 }
 0x527   :  { %v2664_v57 = vsel %vm105_vm3, %v2610_v37, %v2626_v54  ;;  %v2689_v48 = vmul.f32 %v2655_v9, %v6151_v42  ;;  %v2690_v51 = vmul.f32 %v2679_v11, %v6153_v43  ;;  %v2728_v9 = vld [vmem:[%s8034_s10 + $0x48] sm:$0xff] }
 0x528   :  { %v2692_v14 = vmul.f32 %v2664_v57, %v6123_v27  ;;  %4631 = vperm.xlu0 %5948, %v4553_v45   ;;  %5113 = vmatmul.mubr.msk.f32.gmra.mrb[30].mxu0 %vm2752_vm6, %v2720_v46 }
 0x529   :  { %5129 = vmatmul.mubr.msk.f32.gmra.mrb[38].mxu1 %vm2752_vm6, %v2720_v46  ;;  %v2596_v13 = vpop.permute.xlu1 %2595  ;;  %3247 = vmatprep.mubr.f32.mxu0 %v5986_v2 }
 0x52a   :  { %v2642_v15 = vpop.permute.xlu0 %2641  ;;  %3408 = vmatprep.mubr.f32.mxu1 %v5986_v2  ;;  %v5576_v16 = vpack.c.bf16 %v2692_v14, %v2688_v58 }
 0x52b   :  { %v2656_v49 = vsel %vm105_vm3, %v2626_v54, %v2642_v15  ;;  %v2680_v50 = vsel %vm105_vm3, %v2642_v15, %v2594_v25 }
 0x52c   :  { %v2693_v52 = vmul.f32 %v2656_v49, %v6151_v42  ;;  %v2694_v55 = vmul.f32 %v2680_v50, %v6153_v43  ;;  %5114 = vmatmul.mubr.msk.f32.gmra.mrb[32].mxu0 %vm2752_vm6, %v2721_v17  ;;  %5577 = vmatprep.subr.bf16.mxu0 %v5576_v16  ;;  %v2729_v50 = vld [vmem:[%s8034_s10 + $0x50] sm:$0xff] }
 0x52d   :  { %5130 = vmatmul.mubr.msk.f32.gmra.mrb[40].mxu1 %vm2752_vm6, %v2721_v17  ;;  %5579 = vmatpush1.bf16.msra.mxu0 %v5578_v47  ;;  %v2612_v59 = vpop.permute.xlu1 %2611 }
 0x52e   :  { %v5594_v29 = vpack.c.bf16 %v2693_v52, %v2689_v48  ;;  %v2598_v30 = vpop.permute.xlu0 %2597  ;;  %3253 = vmatprep.mubr.f32.mxu0 %v5986_v2  ;;  %3414 = vmatprep.mubr.f32.mxu1 %v5986_v2  ;;  %v5592_v31 = vpack.c.bf16 %v2694_v55, %v2690_v51  ;;  %v2673_v0 = vsel %vm105_vm3, %v2596_v13, %v2612_v59 }
 0x52f   :  { %v2695_v7 = vmul.f32 %v2673_v0, %v6146_v40  ;;  %v2731_v0 = vld [vmem:[%s8034_s10 + $0x60] sm:$0xff] }
 0x530   :  { %5115 = vmatmul.mubr.msk.f32.gmra.mrb[34].mxu0 %vm2752_vm6, %v2722_v28  ;;  %5593 = vmatprep.subr.bf16.mxu1 %v5592_v31 }
 0x531   :  { %5131 = vmatmul.mubr.msk.f32.gmra.mrb[42].mxu1 %vm2752_vm6, %v2722_v28  ;;  %v2628_v32 = vpop.permute.xlu1 %2627  ;;  %3259 = vmatprep.mubr.f32.mxu0 %v5986_v2 }
 0x532   :  { %5595 = vmatpush1.bf16.msra.mxu1 %v5594_v29  ;;  %v2614_v36 = vpop.permute.xlu0 %2613  ;;  %3420 = vmatprep.mubr.f32.mxu1 %v5986_v2  ;;  %v2665_v60 = vsel %vm105_vm3, %v2612_v59, %v2628_v32 }
 0x533   :  { %v2674_v41 = vsel %vm105_vm3, %v2598_v30, %v2614_v36  ;;  %v2696_v4 = vmul.f32 %v2665_v60, %v6123_v27 }
 0x534   :  { %5116 = vmatmul.mubr.msk.f32.gmra.mrb[36].mxu0 %vm2752_vm6, %v2723_v33  ;;  %v2699_v1 = vmul.f32 %v2674_v41, %v6146_v40 }
 0x535   :  { %5132 = vmatmul.mubr.msk.f32.gmra.mrb[44].mxu1 %vm2752_vm6, %v2723_v33  ;;  %v2644_v62 = vpop.permute.xlu1 %2643  ;;  %3265 = vmatprep.mubr.f32.mxu0 %v5986_v2 }
 0x536   :  { %v2630_v22 = vpop.permute.xlu0 %2629  ;;  %3426 = vmatprep.mubr.f32.mxu1 %v5986_v2  ;;  %v2657_v5 = vsel %vm105_vm3, %v2628_v32, %v2644_v62  ;;  %v2681_v8 = vsel %vm105_vm3, %v2644_v62, %v2596_v13  ;;  %v5582_v25 = vpack.c.bf16 %v2699_v1, %v2695_v7 }
 0x537   :  { %v2666_v3 = vsel %vm105_vm3, %v2614_v36, %v2630_v22  ;;  %v2697_v26 = vmul.f32 %v2657_v5, %v6151_v42  ;;  %v2698_v24 = vmul.f32 %v2681_v8, %v6153_v43  ;;  %v2730_v36 = vld [vmem:[%s8034_s10 + $0x58] sm:$0xff]  ;;  %v2732_v5 = vld [vmem:[%s8034_s10 + $0x68] sm:$0xff] }
 0x538   :  { %v2700_v6 = vmul.f32 %v2666_v3, %v6123_v27  ;;  %5117 = vmatmul.mubr.msk.f32.gmra.mrb[38].mxu0 %vm2752_vm6, %v2724_v63 }
 0x539   :  { %5133 = vmatmul.mubr.msk.f32.gmra.mrb[46].mxu1 %vm2752_vm6, %v2724_v63  ;;  %v2600_v10 = vpop.permute.xlu1 %2599  ;;  %3271 = vmatprep.mubr.f32.mxu0 %v5986_v2 }
 0x53a   :  { %v2646_v19 = vpop.permute.xlu0 %2645  ;;  %3432 = vmatprep.mubr.f32.mxu1 %v5986_v2  ;;  %v5580_v20 = vpack.c.bf16 %v2700_v6, %v2696_v4 }
 0x53b   :  { %v2658_v34 = vsel %vm105_vm3, %v2630_v22, %v2646_v19  ;;  %v2682_v23 = vsel %vm105_vm3, %v2646_v19, %v2598_v30 }
 0x53c   :  { %v2701_v21 = vmul.f32 %v2658_v34, %v6151_v42  ;;  %v2702_v35 = vmul.f32 %v2682_v23, %v6153_v43  ;;  %5118 = vmatmul.mubr.msk.f32.gmra.mrb[40].mxu0 %vm2752_vm6, %v2725_v18  ;;  %5581 = vmatprep.subr.bf16.mxu0 %v5580_v20  ;;  %v4185_v34 = vld [vmem:[%s8037_s3 + $0x88] sm:$0xff] }
 0x53d   :  { %5134 = vmatmul.mubr.msk.f32.gmra.mrb[48].mxu1 %vm2752_vm6, %v2725_v18  ;;  %5583 = vmatpush1.bf16.msra.mxu0 %v5582_v25  ;;  %v2616_v37 = vpop.permute.xlu1 %2615 }
 0x53e   :  { %v5598_v39 = vpack.c.bf16 %v2701_v21, %v2697_v26  ;;  %v2602_v44 = vpop.permute.xlu0 %2601  ;;  %3277 = vmatprep.mubr.f32.mxu0 %v5986_v2  ;;  %3438 = vmatprep.mubr.f32.mxu1 %v5986_v2  ;;  %v5596_v45 = vpack.c.bf16 %v2702_v35, %v2698_v24  ;;  %v2675_v14 = vsel %vm105_vm3, %v2600_v10, %v2616_v37  ;;  %v4184_v26 = vld [vmem:[%s8037_s3 + $0x80] sm:$0xff] }
 0x53f   :  { %v2703_v47 = vmul.f32 %v2675_v14, %v6146_v40  ;;  %v4201_v14 = vld [vmem:[%s8037_s3 + $0x108] sm:$0xff] }
 0x540   :  { %5119 = vmatmul.mubr.msk.f32.gmra.mrb[42].mxu0 %vm2752_vm6, %v2726_v38  ;;  %5597 = vmatprep.subr.bf16.mxu1 %v5596_v45 }
 0x541   :  { %5135 = vmatmul.mubr.msk.f32.gmra.mrb[50].mxu1 %vm2752_vm6, %v2726_v38  ;;  %v2632_v46 = vpop.permute.xlu1 %2631  ;;  %3283 = vmatprep.mubr.f32.mxu0 %v5986_v2 }
 0x542   :  { %5599 = vmatpush1.bf16.msra.mxu1 %v5598_v39  ;;  %v2618_v54 = vpop.permute.xlu0 %2617  ;;  %3444 = vmatprep.mubr.f32.mxu1 %v5986_v2  ;;  %v2667_v57 = vsel %vm105_vm3, %v2616_v37, %v2632_v46  ;;  %v5608_v39 = vpack.c.bf16 %v4185_v34, %v4184_v26  ;;  %v4192_v26 = vld [vmem:[%s8037_s3 + $0xc0] sm:$0xff]  ;;  %v4193_v34 = vld [vmem:[%s8037_s3 + $0xc8] sm:$0xff] }
 0x543   :  { %v2676_v56 = vsel %vm105_vm3, %v2602_v44, %v2618_v54  ;;  %v2704_v17 = vmul.f32 %v2667_v57, %v6123_v27  ;;  %v4168_v57 = vld [vmem:[%s8037_s3] sm:$0xff] }
 0x544   :  { %5120 = vmatmul.mubr.msk.f32.gmra.mrb[44].mxu0 %vm2752_vm6, %v2727_v53  ;;  %v2707_v11 = vmul.f32 %v2676_v56, %v6146_v40 }
 0x545   :  { %5136 = vmatmul.mubr.msk.f32.gmra.mrb[52].mxu1 %vm2752_vm6, %v2727_v53  ;;  %v2648_v58 = vpop.permute.xlu1 %2647  ;;  %3289 = vmatprep.mubr.f32.mxu0 %v5986_v2  ;;  %v4216_v53 = vld [vmem:[%s8037_s3 + $0x180] sm:$0xff] }
 0x546   :  { %v2634_v61 = vpop.permute.xlu0 %2633  ;;  %3450 = vmatprep.mubr.f32.mxu1 %v5986_v2  ;;  %v2659_v15 = vsel %vm105_vm3, %v2632_v46, %v2648_v58  ;;  %v2683_v48 = vsel %vm105_vm3, %v2648_v58, %v2600_v10  ;;  %v5586_v55 = vpack.c.bf16 %v2707_v11, %v2703_v47  ;;  %v4169_v58 = vld [vmem:[%s8037_s3 + $0x8] sm:$0xff]  ;;  %v4187_v11 = vld [vmem:[%s8037_s3 + $0x98] sm:$0xff] }
 0x547   :  { %v2668_v13 = vsel %vm105_vm3, %v2618_v54, %v2634_v61  ;;  %v2705_v59 = vmul.f32 %v2659_v15, %v6151_v42  ;;  %v2706_v30 = vmul.f32 %v2683_v48, %v6153_v43  ;;  %v4217_v54 = vld [vmem:[%s8037_s3 + $0x188] sm:$0xff]  ;;  %v4219_v15 = vld [vmem:[%s8037_s3 + $0x198] sm:$0xff] }
 0x548   :  { %v2708_v16 = vmul.f32 %v2668_v13, %v6123_v27  ;;  %5121 = vmatmul.mubr.msk.f32.gmra.mrb[46].mxu0 %vm2752_vm6, %v2728_v9  ;;  %v5640_v56 = vpack.c.bf16 %v4217_v54, %v4216_v53  ;;  %v5144_v13 = vld [vmem:[%s8034_s10 + $0x100] sm:$0xff]  ;;  %v4195_v53 = vld [vmem:[%s8037_s3 + $0xd8] sm:$0xff] }
 0x549   :  { %5137 = vmatmul.mubr.msk.f32.gmra.mrb[54].mxu1 %vm2752_vm6, %v2728_v9  ;;  %v2604_v49 = vpop.permute.xlu1 %2603  ;;  %3295 = vmatprep.mubr.f32.mxu0 %v5986_v2  ;;  %v4200_v9 = vld [vmem:[%s8037_s3 + $0x100] sm:$0xff] }
 0x54a   :  { %v2650_v51 = vpop.permute.xlu0 %2649  ;;  %3456 = vmatprep.mubr.f32.mxu1 %v5986_v2  ;;  %v5584_v52 = vpack.c.bf16 %v2708_v16, %v2704_v17  ;;  %v4218_v17 = vld [vmem:[%s8037_s3 + $0x190] sm:$0xff]  ;;  %v5610_v16 = vpack.c.bf16 %v4169_v58, %v4168_v57  ;;  %v5642_v47 = vpack.c.bf16 %v4201_v14, %v4200_v9  ;;  %v5148_v54 = vld [vmem:[%s8034_s10 + $0x120] sm:$0xff]  ;;  %v4179_v9 = vld [vmem:[%s8037_s3 + $0x58] sm:$0xff] }
 0x54b   :  { %v2660_v28 = vsel %vm105_vm3, %v2634_v61, %v2650_v51  ;;  %v2684_v29 = vsel %vm105_vm3, %v2650_v51, %v2602_v44  ;;  %v4186_v61 = vld [vmem:[%s8037_s3 + $0x90] sm:$0xff] }
 0x54c   :  { %v2709_v31 = vmul.f32 %v2660_v28, %v6151_v42  ;;  %v2710_v32 = vmul.f32 %v2684_v29, %v6153_v43  ;;  %5122 = vmatmul.mubr.msk.f32.gmra.mrb[48].mxu0 %vm2752_vm6, %v2729_v50  ;;  %5585 = vmatprep.subr.bf16.mxu0 %v5584_v52  ;;  %v5612_v48 = vpack.c.bf16 %v4187_v11, %v4186_v61  ;;  %v4202_v51 = vld [vmem:[%s8037_s3 + $0x110] sm:$0xff]  ;;  %v4189_v28 = vld [vmem:[%s8037_s3 + $0xa8] sm:$0xff]  ;;  %v4211_v11 = vld [vmem:[%s8037_s3 + $0x158] sm:$0xff] }
 0x54d   :  { %5138 = vmatmul.mubr.msk.f32.gmra.mrb[56].mxu1 %vm2752_vm6, %v2729_v50  ;;  %5587 = vmatpush1.bf16.msra.mxu0 %v5586_v55  ;;  %v2620_v33 = vpop.permute.xlu1 %2619  ;;  %v4171_v50 = vld [vmem:[%s8037_s3 + $0x18] sm:$0xff]  ;;  %v5644_v52 = vpack.c.bf16 %v4219_v15, %v4218_v17  ;;  %v5145_v29 = vld [vmem:[%s8034_s10 + $0x108] sm:$0xff]  ;;  %v4178_v58 = vld [vmem:[%s8037_s3 + $0x50] sm:$0xff] }
 0x54e   :  { %v5602_v41 = vpack.c.bf16 %v2709_v31, %v2705_v59  ;;  %v2606_v60 = vpop.permute.xlu0 %2605  ;;  %3301 = vmatprep.mubr.f32.mxu0 %v5986_v2  ;;  %3462 = vmatprep.mubr.f32.mxu1 %v5986_v2  ;;  %v5600_v62 = vpack.c.bf16 %v2710_v32, %v2706_v30  ;;  %v2677_v1 = vsel %vm105_vm3, %v2604_v49, %v2620_v33  ;;  %v4203_v55 = vld [vmem:[%s8037_s3 + $0x118] sm:$0xff]  ;;  %v4188_v59 = vld [vmem:[%s8037_s3 + $0xa0] sm:$0xff]  ;;  %v4221_v31 = vld [vmem:[%s8037_s3 + $0x1a8] sm:$0xff] }
 0x54f   :  { %v2711_v7 = vmul.f32 %v2677_v1, %v6146_v40  ;;  %v4220_v30 = vld [vmem:[%s8037_s3 + $0x1a0] sm:$0xff]  ;;  %v4191_v1 = vld [vmem:[%s8037_s3 + $0xb8] sm:$0xff]  ;;  %v4210_v14 = vld [vmem:[%s8037_s3 + $0x150] sm:$0xff] }
 0x550   :  { %5123 = vmatmul.mubr.msk.f32.gmra.mrb[50].mxu0 %vm2752_vm6, %v2730_v36  ;;  %5601 = vmatprep.subr.bf16.mxu1 %v5600_v62  ;;  %v4204_v62 = vld [vmem:[%s8037_s3 + $0x120] sm:$0xff]  ;;  %v4197_v17 = vld [vmem:[%s8037_s3 + $0xe8] sm:$0xff] }
 0x551   :  { %5139 = vmatmul.mubr.msk.f32.gmra.mrb[58].mxu1 %vm2752_vm6, %v2730_v36  ;;  %v2636_v63 = vpop.permute.xlu1 %2635  ;;  %3307 = vmatprep.mubr.f32.mxu0 %v5986_v2  ;;  %v5616_v36 = vpack.c.bf16 %v4189_v28, %v4188_v59  ;;  %v5149_v15 = vld [vmem:[%s8034_s10 + $0x128] sm:$0xff]  ;;  %v5152_v59 = vld [vmem:[%s8034_s10 + $0x140] sm:$0xff] }
 0x552   :  { %5603 = vmatpush1.bf16.msra.mxu1 %v5602_v41  ;;  %v2638_v22 = vpop.permute.xlu0 %2637  ;;  %3468 = vmatprep.mubr.f32.mxu1 %v5986_v2  ;;  %v2669_v3 = vsel %vm105_vm3, %v2620_v33, %v2636_v63  ;;  %v5646_v33 = vpack.c.bf16 %v4203_v55, %v4202_v51  ;;  %v4172_v41 = vld [vmem:[%s8037_s3 + $0x20] sm:$0xff]  ;;  %v5151_v55 = vld [vmem:[%s8034_s10 + $0x138] sm:$0xff]  ;;  %v5153_v28 = vld [vmem:[%s8034_s10 + $0x148] sm:$0xff] }
 0x553   :  { %v2712_v18 = vmul.f32 %v2669_v3, %v6123_v27  ;;  %v5146_v3 = vld [vmem:[%s8034_s10 + $0x110] sm:$0xff] }
 0x554   :  { %5124 = vmatmul.mubr.msk.f32.gmra.mrb[52].mxu0 %vm2752_vm6, %v2731_v0 }
 0x555   :  { %5140 = vmatmul.mubr.msk.f32.gmra.mrb[60].mxu1 %vm2752_vm6, %v2731_v0  ;;  %v2652_v4 = vpop.permute.xlu1 %2651  ;;  %3313 = vmatprep.mubr.f32.mxu0 %v5986_v2  ;;  %v4205_v0 = vld [vmem:[%s8037_s3 + $0x128] sm:$0xff] }
 0x556   :  { %v2622_v6 = vpop.permute.xlu0 %2621  ;;  %3474 = vmatprep.mubr.f32.mxu1 %v5986_v2  ;;  %v2661_v19 = vsel %vm105_vm3, %v2636_v63, %v2652_v4  ;;  %v2685_v23 = vsel %vm105_vm3, %v2652_v4, %v2604_v49  ;;  %v4170_v49 = vld [vmem:[%s8037_s3 + $0x10] sm:$0xff]  ;;  %v5648_v63 = vpack.c.bf16 %v4221_v31, %v4220_v30  ;;  %v5155_v30 = vld [vmem:[%s8034_s10 + $0x158] sm:$0xff]  ;;  %v5156_v31 = vld [vmem:[%s8034_s10 + $0x160] sm:$0xff] }
 0x557   :  { %v2670_v8 = vsel %vm105_vm3, %v2622_v6, %v2638_v22  ;;  %v2678_v10 = vsel %vm105_vm3, %v2606_v60, %v2622_v6  ;;  %v2713_v35 = vmul.f32 %v2661_v19, %v6151_v42  ;;  %v2714_v44 = vmul.f32 %v2685_v23, %v6153_v43  ;;  %v4222_v4 = vld [vmem:[%s8037_s3 + $0x1b0] sm:$0xff]  ;;  %v5147_v23 = vld [vmem:[%s8034_s10 + $0x118] sm:$0xff] }
 0x558   :  { %v2715_v20 = vmul.f32 %v2678_v10, %v6146_v40  ;;  %v2716_v25 = vmul.f32 %v2670_v8, %v6123_v27  ;;  %5125 = vmatmul.mubr.msk.f32.gmra.mrb[54].mxu0 %vm2752_vm6, %v2732_v5  ;;  %v2733_v27 = vld [vmem:[%s8034_s10 + $0x70] sm:$0xff]  ;;  %v5614_v32 = vpack.c.bf16 %v4171_v50, %v4170_v49  ;;  %v5662_v49 = vpack.c.bf16 %v4211_v11, %v4210_v14 }
 0x559   :  { %5141 = vmatmul.mubr.msk.f32.gmra.mrb[62].mxu1 %vm2752_vm6, %v2732_v5  ;;  %3319 = vmatprep.mubr.f32.mxu0 %v5986_v2  ;;  %v4223_v5 = vld [vmem:[%s8037_s3 + $0x1b8] sm:$0xff]  ;;  %v4174_v10 = vld [vmem:[%s8037_s3 + $0x30] sm:$0xff] }
 0x55a   :  { %v5590_v40 = vpack.c.bf16 %v2715_v20, %v2711_v7  ;;  %v2654_v24 = vpop.permute.xlu0 %2653  ;;  %3480 = vmatprep.mubr.f32.mxu1 %v5986_v2  ;;  %v5588_v21 = vpack.c.bf16 %v2716_v25, %v2712_v18  ;;  %v5650_v7 = vpack.c.bf16 %v4205_v0, %v4204_v62  ;;  %v4175_v18 = vld [vmem:[%s8037_s3 + $0x38] sm:$0xff]  ;;  %v4206_v19 = vld [vmem:[%s8037_s3 + $0x130] sm:$0xff]  ;;  %v5652_v20 = vpack.c.bf16 %v4223_v5, %v4222_v4  ;;  %v4212_v62 = vld [vmem:[%s8037_s3 + $0x160] sm:$0xff] }
 0x55b   :  { %v2662_v37 = vsel %vm105_vm3, %v2638_v22, %v2654_v24  ;;  %v2686_v38 = vsel %vm105_vm3, %v2654_v24, %v2606_v60  ;;  %v4173_v60 = vld [vmem:[%s8037_s3 + $0x28] sm:$0xff]  ;;  %v4190_v22 = vld [vmem:[%s8037_s3 + $0xb0] sm:$0xff]  ;;  %v4207_v25 = vld [vmem:[%s8037_s3 + $0x138] sm:$0xff]  ;;  %v5622_v24 = vpack.c.bf16 %v4175_v18, %v4174_v10 }
 0x55c   :  { %v2717_v45 = vmul.f32 %v2662_v37, %v6151_v42  ;;  %v2718_v46 = vmul.f32 %v2686_v38, %v6153_v43  ;;  %5126 = vmatmul.mubr.msk.f32.gmra.mrb[56].mxu0 %vm2752_vm6, %v2733_v27  ;;  %5589 = vmatprep.subr.bf16.mxu0 %v5588_v21  ;;  %v5618_v6 = vpack.c.bf16 %v4173_v60, %v4172_v41  ;;  %v4176_v37 = vld [vmem:[%s8037_s3 + $0x40] sm:$0xff]  ;;  %v4177_v38 = vld [vmem:[%s8037_s3 + $0x48] sm:$0xff]  ;;  %v4231_v5 = vld [vmem:[%s8037_s3 + $0x1f8] sm:$0xff] }
 0x55d   :  { %5142 = vmatmul.mubr.msk.f32.gmra.mrb[64].mxu1 %vm2752_vm6, %v2733_v27  ;;  %5591 = vmatpush1.bf16.msra.mxu0 %v5590_v40  ;;  %v5620_v8 = vpack.c.bf16 %v4191_v1, %v4190_v22  ;;  %v4224_v27 = vld [vmem:[%s8037_s3 + $0x1c0] sm:$0xff]  ;;  %v4225_v40 = vld [vmem:[%s8037_s3 + $0x1c8] sm:$0xff]  ;;  %v5654_v21 = vpack.c.bf16 %v4207_v25, %v4206_v19  ;;  %v4198_v22 = vld [vmem:[%s8037_s3 + $0xf0] sm:$0xff] }
 0x55e   :  { %v5606_v42 = vpack.c.bf16 %v2717_v45, %v2713_v35  ;;  %3325 = vmatprep.mubr.f32.mxu0 %v5986_v2  ;;  %3486 = vmatprep.mubr.f32.mxu1 %v5986_v2  ;;  %v5604_v43 = vpack.c.bf16 %v2718_v46, %v2714_v44  ;;  %v5624_v35 = vpack.c.bf16 %v4193_v34, %v4192_v26  ;;  %v4209_v45 = vld [vmem:[%s8037_s3 + $0x148] sm:$0xff]  ;;  %v4194_v46 = vld [vmem:[%s8037_s3 + $0xd0] sm:$0xff]  ;;  %v4180_v41 = vld [vmem:[%s8037_s3 + $0x60] sm:$0xff] }
 0x55f   :  { %5609 = vmatprep.subr.bf16.mxu0 %v5608_v39  ;;  %v4208_v39 = vld [vmem:[%s8037_s3 + $0x140] sm:$0xff]  ;;  %v5656_v44 = vpack.c.bf16 %v4225_v40, %v4224_v27  ;;  %v5628_v57 = vpack.c.bf16 %v4195_v53, %v4194_v46  ;;  %v4181_v60 = vld [vmem:[%s8037_s3 + $0x68] sm:$0xff]  ;;  %v4199_v1 = vld [vmem:[%s8037_s3 + $0xf8] sm:$0xff] }
 0x560   :  { %5127 = vmatmul.mubr.msk.f32.gmra.mrb[58].mxu0 %vm2752_vm6, %v2734_v12  ;;  %5605 = vmatprep.subr.bf16.mxu1 %v5604_v43  ;;  %v5626_v43 = vpack.c.bf16 %v4177_v38, %v4176_v37  ;;  %v5636_v4 = vpack.c.bf16 %v4199_v1, %v4198_v22  ;;  %v4214_v18 = vld [vmem:[%s8037_s3 + $0x170] sm:$0xff]  ;;  %v4215_v19 = vld [vmem:[%s8037_s3 + $0x178] sm:$0xff] }
 0x561   :  { %5143 = vmatmul.mubr.msk.f32.gmra.mrb[66].mxu1 %vm2752_vm6, %v2734_v12  ;;  %3622 = vmatprep.mubr.f32.mxu0 %v5986_v2  ;;  %v4226_v12 = vld [vmem:[%s8037_s3 + $0x1d0] sm:$0xff] }
 0x562   :  { %5607 = vmatpush1.bf16.msra.mxu1 %v5606_v42  ;;  %3783 = vmatprep.mubr.f32.mxu1 %v5986_v2  ;;  %v4227_v42 = vld [vmem:[%s8037_s3 + $0x1d8] sm:$0xff] }
 0x563   :  { %5641 = vmatprep.subr.bf16.mxu1 %v5640_v56  ;;  %v5658_v56 = vpack.c.bf16 %v4209_v45, %v4208_v39  ;;  %v5660_v61 = vpack.c.bf16 %v4227_v42, %v4226_v12 }
 0x564   :  { %5160 = vmatmul.mubr.msk.f32.vlgmr.msra.gmra.mrb[28].mxu0 %vm2752_vm6, %v5144_v13 }
 0x565   :  { %5176 = vmatmul.mubr.msk.f32.vlgmr.msra.gmra.mrb[36].mxu1 %vm2752_vm6, %v5144_v13  ;;  %3628 = vmatprep.mubr.f32.mxu0 %v5986_v2  ;;  %v4196_v13 = vld [vmem:[%s8037_s3 + $0xe0] sm:$0xff] }
 0x566   :  { %3789 = vmatprep.mubr.f32.mxu1 %v5986_v2  ;;  %5611 = vmatpush3.bf16.msra.mxu0 %v5610_v16  ;;  %v4228_v16 = vld [vmem:[%s8037_s3 + $0x1e0] sm:$0xff]  ;;  %v5632_v50 = vpack.c.bf16 %v4197_v17, %v4196_v13  ;;  %v3963_v25 = vpop.permute.xlu1 %3962 }
 0x567   :  { %5643 = vmatpush3.bf16.msra.mxu1 %v5642_v47  ;;  %5613 = vmatprep.subr.bf16.mxu0 %v5612_v48  ;;  %v4229_v47 = vld [vmem:[%s8037_s3 + $0x1e8] sm:$0xff]  ;;  %v5630_v48 = vpack.c.bf16 %v4179_v9, %v4178_v58 }
 0x568   :  { %5161 = vmatmul.mubr.msk.f32.gmra.mrb[30].mxu0 %vm2752_vm6, %v5145_v29  ;;  %5645 = vmatprep.subr.bf16.mxu1 %v5644_v52  ;;  %v5664_v51 = vpack.c.bf16 %v4229_v47, %v4228_v16  ;;  %v5150_v52 = vld [vmem:[%s8034_s10 + $0x130] sm:$0xff] }
 0x569   :  { %5177 = vmatmul.mubr.msk.f32.gmra.mrb[38].mxu1 %vm2752_vm6, %v5145_v29  ;;  %3634 = vmatprep.mubr.f32.mxu0 %v5986_v2  ;;  %v5154_v29 = vld [vmem:[%s8034_s10 + $0x150] sm:$0xff] }
 0x56a   :  { %3795 = vmatprep.mubr.f32.mxu1 %v5986_v2  ;;  %5615 = vmatpush3.bf16.msra.mxu0 %v5614_v32  ;;  %v5157_v32 = vld [vmem:[%s8034_s10 + $0x168] sm:$0xff]  ;;  %v3973_v58 = vpop.permute.xlu1 %3972 }
 0x56b   :  { %5647 = vmatpush3.bf16.msra.mxu1 %v5646_v33  ;;  %5617 = vmatprep.subr.bf16.mxu0 %v5616_v36  ;;  %v5158_v33 = vld [vmem:[%s8034_s10 + $0x170] sm:$0xff]  ;;  %v5159_v36 = vld [vmem:[%s8034_s10 + $0x178] sm:$0xff]  ;;  %v3968_v37 = vpop.permute.xlu0 %3967 }
 0x56c   :  { %5162 = vmatmul.mubr.msk.f32.gmra.mrb[32].mxu0 %vm2752_vm6, %v5146_v3  ;;  %5649 = vmatprep.subr.bf16.mxu1 %v5648_v63  ;;  %v5634_v63 = vpack.c.bf16 %v4181_v60, %v4180_v41 }
 0x56d   :  { %5178 = vmatmul.mubr.msk.f32.gmra.mrb[40].mxu1 %vm2752_vm6, %v5146_v3  ;;  %3640 = vmatprep.mubr.f32.mxu0 %v5986_v2  ;;  %v4230_v3 = vld [vmem:[%s8037_s3 + $0x1f0] sm:$0xff] }
 0x56e   :  { %3801 = vmatprep.mubr.f32.mxu1 %v5986_v2  ;;  %5619 = vmatpush3.bf16.msra.mxu0 %v5618_v6  ;;  %v4182_v6 = vld [vmem:[%s8037_s3 + $0x70] sm:$0xff] }
 0x56f   :  { %5651 = vmatpush3.bf16.msra.mxu1 %v5650_v7  ;;  %5621 = vmatprep.subr.bf16.mxu0 %v5620_v8  ;;  %v4183_v7 = vld [vmem:[%s8037_s3 + $0x78] sm:$0xff]  ;;  %v5668_v8 = vpack.c.bf16 %v4231_v5, %v4230_v3 }
 0x570   :  { %5163 = vmatmul.mubr.msk.f32.gmra.mrb[34].mxu0 %vm2752_vm6, %v5147_v23  ;;  %5653 = vmatprep.subr.bf16.mxu1 %v5652_v20  ;;  %v5638_v10 = vpack.c.bf16 %v4183_v7, %v4182_v6  ;;  %v5670_v20 = vpack.c.bf16 %v4215_v19, %v4214_v18 }
 0x571   :  { %5179 = vmatmul.mubr.msk.f32.gmra.mrb[42].mxu1 %vm2752_vm6, %v5147_v23  ;;  %3646 = vmatprep.mubr.f32.mxu0 %v5986_v2 }
 0x572   :  { %3807 = vmatprep.mubr.f32.mxu1 %v5986_v2  ;;  %5623 = vmatpush3.bf16.msra.mxu0 %v5622_v24 }
 0x573   :  { %5655 = vmatpush3.bf16.msra.mxu1 %v5654_v21  ;;  %5625 = vmatprep.subr.bf16.mxu0 %v5624_v35 }
 0x574   :  { %5164 = vmatmul.mubr.msk.f32.gmra.mrb[36].mxu0 %vm2752_vm6, %v5148_v54  ;;  %5657 = vmatprep.subr.bf16.mxu1 %v5656_v44 }
 0x575   :  { %5180 = vmatmul.mubr.msk.f32.gmra.mrb[44].mxu1 %vm2752_vm6, %v5148_v54  ;;  %3652 = vmatprep.mubr.f32.mxu0 %v5986_v2 }
 0x576   :  { %3813 = vmatprep.mubr.f32.mxu1 %v5986_v2  ;;  %5627 = vmatpush3.bf16.msra.mxu0 %v5626_v43 }
 0x577   :  { %5659 = vmatpush3.bf16.msra.mxu1 %v5658_v56  ;;  %5629 = vmatprep.subr.bf16.mxu0 %v5628_v57 }
 0x578   :  { %5165 = vmatmul.mubr.msk.f32.gmra.mrb[38].mxu0 %vm2752_vm6, %v5149_v15  ;;  %5661 = vmatprep.subr.bf16.mxu1 %v5660_v61 }
 0x579   :  { %5181 = vmatmul.mubr.msk.f32.gmra.mrb[46].mxu1 %vm2752_vm6, %v5149_v15  ;;  %3658 = vmatprep.mubr.f32.mxu0 %v5986_v2 }
 0x57a   :  { %3819 = vmatprep.mubr.f32.mxu1 %v5986_v2  ;;  %5631 = vmatpush3.bf16.msra.mxu0 %v5630_v48 }
 0x57b   :  { %5663 = vmatpush3.bf16.msra.mxu1 %v5662_v49  ;;  %5633 = vmatprep.subr.bf16.mxu0 %v5632_v50 }
 0x57c   :  { %5166 = vmatmul.mubr.msk.f32.gmra.mrb[40].mxu0 %vm2752_vm6, %v5150_v52  ;;  %5665 = vmatprep.subr.bf16.mxu1 %v5664_v51  ;;  %v3978_v51 = vpop.permute.xlu0 %3977 }
 0x57d   :  { %5182 = vmatmul.mubr.msk.f32.gmra.mrb[48].mxu1 %vm2752_vm6, %v5150_v52  ;;  %3664 = vmatprep.mubr.f32.mxu0 %v5986_v2 }
 0x57e   :  { %3825 = vmatprep.mubr.f32.mxu1 %v5986_v2  ;;  %5635 = vmatpush3.bf16.msra.mxu0 %v5634_v63 }
 0x57f   :  { %5637 = vmatprep.subr.bf16.mxu0 %v5636_v4 }
 0x580   :  { %5167 = vmatmul.mubr.msk.f32.gmra.mrb[42].mxu0 %vm2752_vm6, %v5151_v55  ;;  %v3988_v18 = vpop.permute.xlu0 %3987 }
 0x581   :  { %5183 = vmatmul.mubr.msk.f32.gmra.mrb[50].mxu1 %vm2752_vm6, %v5151_v55  ;;  %3670 = vmatprep.mubr.f32.mxu0 %v5986_v2 }
 0x582   :  { %3831 = vmatprep.mubr.f32.mxu1 %v5986_v2  ;;  %5639 = vmatpush3.bf16.msra.mxu0 %v5638_v10 }
 0x584   :  { %5168 = vmatmul.mubr.msk.f32.gmra.mrb[44].mxu0 %vm2752_vm6, %v5152_v59 }
 0x585   :  { %5184 = vmatmul.mubr.msk.f32.gmra.mrb[52].mxu1 %vm2752_vm6, %v5152_v59  ;;  %3676 = vmatprep.mubr.f32.mxu0 %v5986_v2 }
 0x586   :  { %3837 = vmatprep.mubr.f32.mxu1 %v5986_v2 }
 0x588   :  { %5169 = vmatmul.mubr.msk.f32.gmra.mrb[46].mxu0 %vm2752_vm6, %v5153_v28 }
 0x589   :  { %5185 = vmatmul.mubr.msk.f32.gmra.mrb[54].mxu1 %vm2752_vm6, %v5153_v28  ;;  %3682 = vmatprep.mubr.f32.mxu0 %v5986_v2 }
 0x58a   :  { %3843 = vmatprep.mubr.f32.mxu1 %v5986_v2 }
 0x58c   :  { %5170 = vmatmul.mubr.msk.f32.gmra.mrb[48].mxu0 %vm2752_vm6, %v5154_v29 }
 0x58d   :  { %5186 = vmatmul.mubr.msk.f32.gmra.mrb[56].mxu1 %vm2752_vm6, %v5154_v29  ;;  %3688 = vmatprep.mubr.f32.mxu0 %v5986_v2 }
 0x58e   :  { %3849 = vmatprep.mubr.f32.mxu1 %v5986_v2 }
 0x590   :  { %5171 = vmatmul.mubr.msk.f32.gmra.mrb[50].mxu0 %vm2752_vm6, %v5155_v30 }
 0x591   :  { %5187 = vmatmul.mubr.msk.f32.gmra.mrb[58].mxu1 %vm2752_vm6, %v5155_v30  ;;  %3694 = vmatprep.mubr.f32.mxu0 %v5986_v2 }
 0x592   :  { %3855 = vmatprep.mubr.f32.mxu1 %v5986_v2 }
 0x594   :  { %5172 = vmatmul.mubr.msk.f32.gmra.mrb[52].mxu0 %vm2752_vm6, %v5156_v31 }
 0x595   :  { %5188 = vmatmul.mubr.msk.f32.gmra.mrb[60].mxu1 %vm2752_vm6, %v5156_v31  ;;  %3700 = vmatprep.mubr.f32.mxu0 %v5986_v2 }
 0x596   :  { %3861 = vmatprep.mubr.f32.mxu1 %v5986_v2 }
 0x598   :  { %5173 = vmatmul.mubr.msk.f32.gmra.mrb[54].mxu0 %vm2752_vm6, %v5157_v32 }
 0x599   :  { %5189 = vmatmul.mubr.msk.f32.gmra.mrb[62].mxu1 %vm2752_vm6, %v5157_v32  ;;  %3706 = vmatprep.mubr.f32.mxu0 %v5986_v2 }
 0x59a   :  { %3867 = vmatprep.mubr.f32.mxu1 %v5986_v2 }
 0x59c   :  { %5174 = vmatmul.mubr.msk.f32.gmra.mrb[56].mxu0 %vm2752_vm6, %v5158_v33 }
 0x59d   :  { %5190 = vmatmul.mubr.msk.f32.gmra.mrb[64].mxu1 %vm2752_vm6, %v5158_v33  ;;  %3712 = vmatprep.mubr.f32.mxu0 %v5986_v2 }
 0x59e   :  { %3873 = vmatprep.mubr.f32.mxu1 %v5986_v2  ;;  %v4213_v2 = vld [vmem:[%s8037_s3 + $0x168] sm:$0xff] }
 0x59f   :  { %v5666_v0 = vpack.c.bf16 %v4213_v2, %v4212_v62  ;;  %v3983_v62 = vpop.permute.xlu1 %3982 }
 0x5a0   :  { %5175 = vmatmul.mubr.msk.f32.gmra.mrb[58].mxu0 %vm2752_vm6, %v5159_v36 }
 0x5a1   :  { %5191 = vmatmul.mubr.msk.f32.gmra.mrb[66].mxu1 %vm2752_vm6, %v5159_v36 }
 0x5a2   :  { %5667 = vmatpush3.bf16.msra.mxu1 %v5666_v0 }
 0x5a3   :  { %5669 = vmatprep.subr.bf16.mxu1 %v5668_v8 }
 0x5a6   :  { %5671 = vmatpush3.bf16.msra.mxu1 %v5670_v20 }
 0x637   :  { %v3624_v26 = vpop.f32.mrb[28].mxu0 }
 0x638   :  { %v4040_v34 = vadd.f32 %v3963_v25, %v3624_v26  ;;  %v3785_v23 = vpop.f32.mrb[36].mxu1  ;;  %v3626_v27 = vpop.f32.mrb[29].mxu0 }
 0x639   :  { %v4042_v40 = vadd.f32 %v3963_v25, %v3785_v23  ;;  %v4041_v24 = vadd.f32 %v3963_v25, %v3626_v27  ;;  %v3787_v21 = vpop.f32.mrb[37].mxu1 }
 0x63a   :  { %v4043_v35 = vadd.f32 %v3963_v25, %v3787_v21  ;;  %v4104_v44 = vmax.f32 %v4040_v34, 0.0 }
 0x63b   :  { %v4105_v38 = vmax.f32 %v4041_v24, 0.0  ;;  %v3630_v39 = vpop.f32.mrb[30].mxu0  ;;  %v4106_v12 = vmax.f32 %v4042_v40, 0.0 }
 0x63c   :  { %v4107_v45 = vmax.f32 %v4043_v35, 0.0  ;;  %v4044_v46 = vadd.f32 %v3968_v37, %v3630_v39  ;;  %v3791_v53 = vpop.f32.mrb[38].mxu1  ;;  %v3632_v54 = vpop.f32.mrb[31].mxu0 }
 0x63d   :  { %v4046_v42 = vadd.f32 %v3968_v37, %v3791_v53  ;;  %v4045_v43 = vadd.f32 %v3968_v37, %v3632_v54  ;;  %v3793_v56 = vpop.f32.mrb[39].mxu1  ;;  %4296 = vmatprep.mubr.f32.mxu0 %v4105_v38  ;;  %v3993_v38 = vpop.permute.xlu1 %3992 }
 0x63e   :  { %v4047_v57 = vadd.f32 %v3968_v37, %v3793_v56  ;;  %4441 = vmatprep.mubr.f32.mxu1 %v4107_v45  ;;  %4297 = vmatmul.mubr.f32.vlgmr.msra.gmra.mrb[60].mxu0 %v4104_v44  ;;  %v4108_v61 = vmax.f32 %v4044_v46, 0.0 }
 0x63f   :  { %v4109_v9 = vmax.f32 %v4045_v43, 0.0  ;;  %4442 = vmatmul.mubr.f32.vlgmr.msra.gmra.mrb[68].mxu1 %v4106_v12  ;;  %v3636_v14 = vpop.f32.mrb[32].mxu0  ;;  %v4110_v16 = vmax.f32 %v4046_v42, 0.0 }
 0x640   :  { %v4111_v11 = vmax.f32 %v4047_v57, 0.0  ;;  %v4048_v13 = vadd.f32 %v3973_v58, %v3636_v14  ;;  %v3797_v17 = vpop.f32.mrb[40].mxu1  ;;  %v3638_v15 = vpop.f32.mrb[33].mxu0 }
 0x641   :  { %v4050_v47 = vadd.f32 %v3973_v58, %v3797_v17  ;;  %v4049_v48 = vadd.f32 %v3973_v58, %v3638_v15  ;;  %v3799_v49 = vpop.f32.mrb[41].mxu1  ;;  %4301 = vmatprep.mubr.f32.mxu0 %v4109_v9  ;;  %v3998_v9 = vpop.permute.xlu0 %3997 }
 0x642   :  { %v4051_v50 = vadd.f32 %v3973_v58, %v3799_v49  ;;  %4446 = vmatprep.mubr.f32.mxu1 %v4111_v11  ;;  %4302 = vmatmul.mubr.f32.gmra.mrb[62].mxu0 %v4108_v61  ;;  %v4112_v59 = vmax.f32 %v4048_v13, 0.0 }
 0x643   :  { %v4113_v52 = vmax.f32 %v4049_v48, 0.0  ;;  %4447 = vmatmul.mubr.f32.gmra.mrb[70].mxu1 %v4110_v16  ;;  %v3642_v55 = vpop.f32.mrb[34].mxu0  ;;  %v4114_v32 = vmax.f32 %v4050_v47, 0.0 }
 0x644   :  { %v4115_v28 = vmax.f32 %v4051_v50, 0.0  ;;  %v4052_v29 = vadd.f32 %v3978_v51, %v3642_v55  ;;  %v3803_v30 = vpop.f32.mrb[42].mxu1  ;;  %v3644_v31 = vpop.f32.mrb[35].mxu0 }
 0x645   :  { %v4054_v33 = vadd.f32 %v3978_v51, %v3803_v30  ;;  %v4053_v36 = vadd.f32 %v3978_v51, %v3644_v31  ;;  %v3805_v41 = vpop.f32.mrb[43].mxu1  ;;  %4306 = vmatprep.mubr.f32.mxu0 %v4113_v52  ;;  %v4003_v52 = vpop.permute.xlu1 %4002 }
 0x646   :  { %v4055_v60 = vadd.f32 %v3978_v51, %v3805_v41  ;;  %4451 = vmatprep.mubr.f32.mxu1 %v4115_v28  ;;  %4307 = vmatmul.mubr.f32.gmra.mrb[64].mxu0 %v4112_v59  ;;  %v4116_v0 = vmax.f32 %v4052_v29, 0.0 }
 0x647   :  { %v4117_v63 = vmax.f32 %v4053_v36, 0.0  ;;  %4452 = vmatmul.mubr.f32.gmra.mrb[72].mxu1 %v4114_v32  ;;  %v3648_v2 = vpop.f32.mrb[36].mxu0  ;;  %v4118_v5 = vmax.f32 %v4054_v33, 0.0 }
 0x648   :  { %v4119_v22 = vmax.f32 %v4055_v60, 0.0  ;;  %v4056_v1 = vadd.f32 %v3983_v62, %v3648_v2  ;;  %v3809_v3 = vpop.f32.mrb[44].mxu1  ;;  %v3650_v4 = vpop.f32.mrb[37].mxu0 }
 0x649   :  { %v4058_v6 = vadd.f32 %v3983_v62, %v3809_v3  ;;  %v4057_v7 = vadd.f32 %v3983_v62, %v3650_v4  ;;  %v3811_v8 = vpop.f32.mrb[45].mxu1  ;;  %4311 = vmatprep.mubr.f32.mxu0 %v4117_v63  ;;  %v4008_v63 = vpop.permute.xlu0 %4007 }
 0x64a   :  { %v4059_v10 = vadd.f32 %v3983_v62, %v3811_v8  ;;  %4456 = vmatprep.mubr.f32.mxu1 %v4119_v22  ;;  %4312 = vmatmul.mubr.f32.gmra.mrb[66].mxu0 %v4116_v0  ;;  %v4120_v25 = vmax.f32 %v4056_v1, 0.0 }
 0x64b   :  { %v4121_v19 = vmax.f32 %v4057_v7, 0.0  ;;  %4457 = vmatmul.mubr.f32.gmra.mrb[74].mxu1 %v4118_v5  ;;  %v3654_v20 = vpop.f32.mrb[38].mxu0  ;;  %v4122_v40 = vmax.f32 %v4058_v6, 0.0 }
 0x64c   :  { %v4123_v26 = vmax.f32 %v4059_v10, 0.0  ;;  %v4060_v34 = vadd.f32 %v3988_v18, %v3654_v20  ;;  %v3815_v23 = vpop.f32.mrb[46].mxu1  ;;  %v3656_v27 = vpop.f32.mrb[39].mxu0 }
 0x64d   :  { %v4062_v24 = vadd.f32 %v3988_v18, %v3815_v23  ;;  %v4061_v21 = vadd.f32 %v3988_v18, %v3656_v27  ;;  %v3817_v35 = vpop.f32.mrb[47].mxu1  ;;  %4316 = vmatprep.mubr.f32.mxu0 %v4121_v19  ;;  %v4013_v19 = vpop.permute.xlu1 %4012 }
 0x64e   :  { %v4063_v37 = vadd.f32 %v3988_v18, %v3817_v35  ;;  %4461 = vmatprep.mubr.f32.mxu1 %v4123_v26  ;;  %4317 = vmatmul.mubr.f32.gmra.mrb[68].mxu0 %v4120_v25  ;;  %v4124_v45 = vmax.f32 %v4060_v34, 0.0 }
 0x64f   :  { %v4125_v39 = vmax.f32 %v4061_v21, 0.0  ;;  %4462 = vmatmul.mubr.f32.gmra.mrb[76].mxu1 %v4122_v40  ;;  %v3660_v44 = vpop.f32.mrb[40].mxu0  ;;  %v4126_v42 = vmax.f32 %v4062_v24, 0.0 }
 0x650   :  { %v4127_v46 = vmax.f32 %v4063_v37, 0.0  ;;  %v4064_v53 = vadd.f32 %v3993_v38, %v3660_v44  ;;  %v3821_v54 = vpop.f32.mrb[48].mxu1  ;;  %v3662_v12 = vpop.f32.mrb[41].mxu0 }
 0x651   :  { %v4066_v43 = vadd.f32 %v3993_v38, %v3821_v54  ;;  %v4065_v56 = vadd.f32 %v3993_v38, %v3662_v12  ;;  %v3823_v57 = vpop.f32.mrb[49].mxu1  ;;  %4321 = vmatprep.mubr.f32.mxu0 %v4125_v39  ;;  %v4018_v39 = vpop.permute.xlu0 %4017 }
 0x652   :  { %v4067_v58 = vadd.f32 %v3993_v38, %v3823_v57  ;;  %4466 = vmatprep.mubr.f32.mxu1 %v4127_v46  ;;  %4322 = vmatmul.mubr.f32.gmra.mrb[70].mxu0 %v4124_v45  ;;  %v4128_v11 = vmax.f32 %v4064_v53, 0.0 }
 0x653   :  { %v4129_v14 = vmax.f32 %v4065_v56, 0.0  ;;  %4467 = vmatmul.mubr.f32.gmra.mrb[78].mxu1 %v4126_v42  ;;  %v3666_v61 = vpop.f32.mrb[42].mxu0  ;;  %v4130_v47 = vmax.f32 %v4066_v43, 0.0 }
 0x654   :  { %v4131_v13 = vmax.f32 %v4067_v58, 0.0  ;;  %v4068_v17 = vadd.f32 %v3998_v9, %v3666_v61  ;;  %v3827_v15 = vpop.f32.mrb[50].mxu1  ;;  %v3668_v16 = vpop.f32.mrb[43].mxu0 }
 0x655   :  { %v4070_v48 = vadd.f32 %v3998_v9, %v3827_v15  ;;  %v4069_v49 = vadd.f32 %v3998_v9, %v3668_v16  ;;  %v3829_v50 = vpop.f32.mrb[51].mxu1  ;;  %4326 = vmatprep.mubr.f32.mxu0 %v4129_v14  ;;  %v4023_v14 = vpop.permute.xlu1 %4022 }
 0x656   :  { %v4071_v51 = vadd.f32 %v3998_v9, %v3829_v50  ;;  %4471 = vmatprep.mubr.f32.mxu1 %v4131_v13  ;;  %4327 = vmatmul.mubr.f32.gmra.mrb[72].mxu0 %v4128_v11  ;;  %v4132_v28 = vmax.f32 %v4068_v17, 0.0 }
 0x657   :  { %v4133_v55 = vmax.f32 %v4069_v49, 0.0  ;;  %4472 = vmatmul.mubr.f32.gmra.mrb[80].mxu1 %v4130_v47  ;;  %v3672_v59 = vpop.f32.mrb[44].mxu0  ;;  %v4134_v33 = vmax.f32 %v4070_v48, 0.0 }
 0x658   :  { %v4135_v29 = vmax.f32 %v4071_v51, 0.0  ;;  %v4072_v30 = vadd.f32 %v4003_v52, %v3672_v59  ;;  %v3833_v31 = vpop.f32.mrb[52].mxu1  ;;  %v3674_v32 = vpop.f32.mrb[45].mxu0 }
 0x659   :  { %v4074_v36 = vadd.f32 %v4003_v52, %v3833_v31  ;;  %v4073_v41 = vadd.f32 %v4003_v52, %v3674_v32  ;;  %v3835_v60 = vpop.f32.mrb[53].mxu1  ;;  %4331 = vmatprep.mubr.f32.mxu0 %v4133_v55  ;;  %v4028_v55 = vpop.permute.xlu0 %4027 }
 0x65a   :  { %v4075_v62 = vadd.f32 %v4003_v52, %v3835_v60  ;;  %4476 = vmatprep.mubr.f32.mxu1 %v4135_v29  ;;  %4332 = vmatmul.mubr.f32.gmra.mrb[74].mxu0 %v4132_v28  ;;  %v4136_v22 = vmax.f32 %v4072_v30, 0.0 }
 0x65b   :  { %v4137_v2 = vmax.f32 %v4073_v41, 0.0  ;;  %4477 = vmatmul.mubr.f32.gmra.mrb[82].mxu1 %v4134_v33  ;;  %v3678_v0 = vpop.f32.mrb[46].mxu0  ;;  %v4138_v6 = vmax.f32 %v4074_v36, 0.0 }
 0x65c   :  { %v4139_v1 = vmax.f32 %v4075_v62, 0.0  ;;  %v4076_v3 = vadd.f32 %v4008_v63, %v3678_v0  ;;  %v3839_v4 = vpop.f32.mrb[54].mxu1  ;;  %v3680_v5 = vpop.f32.mrb[47].mxu0 }
 0x65d   :  { %v4078_v7 = vadd.f32 %v4008_v63, %v3839_v4  ;;  %v4077_v8 = vadd.f32 %v4008_v63, %v3680_v5  ;;  %v3841_v10 = vpop.f32.mrb[55].mxu1  ;;  %4336 = vmatprep.mubr.f32.mxu0 %v4137_v2  ;;  %v4033_v2 = vpop.permute.xlu1 %4032 }
 0x65e   :  { %v4079_v18 = vadd.f32 %v4008_v63, %v3841_v10  ;;  %4481 = vmatprep.mubr.f32.mxu1 %v4139_v1  ;;  %4337 = vmatmul.mubr.f32.gmra.mrb[76].mxu0 %v4136_v22  ;;  %v4140_v26 = vmax.f32 %v4076_v3, 0.0 }
 0x65f   :  { %v4141_v20 = vmax.f32 %v4077_v8, 0.0  ;;  %4482 = vmatmul.mubr.f32.gmra.mrb[84].mxu1 %v4138_v6  ;;  %v3684_v25 = vpop.f32.mrb[48].mxu0  ;;  %v4142_v24 = vmax.f32 %v4078_v7, 0.0 }
 0x660   :  { %v4143_v34 = vmax.f32 %v4079_v18, 0.0  ;;  %v4080_v23 = vadd.f32 %v4013_v19, %v3684_v25  ;;  %v3845_v27 = vpop.f32.mrb[56].mxu1  ;;  %v3686_v40 = vpop.f32.mrb[49].mxu0 }
 0x661   :  { %v4082_v21 = vadd.f32 %v4013_v19, %v3845_v27  ;;  %v4081_v35 = vadd.f32 %v4013_v19, %v3686_v40  ;;  %v3847_v37 = vpop.f32.mrb[57].mxu1  ;;  %4341 = vmatprep.mubr.f32.mxu0 %v4141_v20  ;;  %v4038_v20 = vpop.permute.xlu0 %4037 }
 0x662   :  { %v4083_v38 = vadd.f32 %v4013_v19, %v3847_v37  ;;  %4486 = vmatprep.mubr.f32.mxu1 %v4143_v34  ;;  %4342 = vmatmul.mubr.f32.gmra.mrb[78].mxu0 %v4140_v26  ;;  %v4144_v46 = vmax.f32 %v4080_v23, 0.0 }
 0x663   :  { %v4145_v44 = vmax.f32 %v4081_v35, 0.0  ;;  %4487 = vmatmul.mubr.f32.gmra.mrb[86].mxu1 %v4142_v24  ;;  %v3690_v45 = vpop.f32.mrb[50].mxu0  ;;  %v4146_v43 = vmax.f32 %v4082_v21, 0.0 }
 0x664   :  { %v4147_v53 = vmax.f32 %v4083_v38, 0.0  ;;  %v4084_v54 = vadd.f32 %v4018_v39, %v3690_v45  ;;  %v3851_v12 = vpop.f32.mrb[58].mxu1  ;;  %v3692_v42 = vpop.f32.mrb[51].mxu0 }
 0x665   :  { %v4086_v56 = vadd.f32 %v4018_v39, %v3851_v12  ;;  %v4085_v57 = vadd.f32 %v4018_v39, %v3692_v42  ;;  %v3853_v58 = vpop.f32.mrb[59].mxu1  ;;  %4346 = vmatprep.mubr.f32.mxu0 %v4145_v44 }
 0x666   :  { %v4087_v9 = vadd.f32 %v4018_v39, %v3853_v58  ;;  %4491 = vmatprep.mubr.f32.mxu1 %v4147_v53  ;;  %4347 = vmatmul.mubr.f32.gmra.mrb[80].mxu0 %v4144_v46  ;;  %v4148_v13 = vmax.f32 %v4084_v54, 0.0  ;;  %v4522_v54 = vld [vmem:[%s8038_s12] sm:$0xff] }
 0x667   :  { %v4149_v61 = vmax.f32 %v4085_v57, 0.0  ;;  %4492 = vmatmul.mubr.f32.gmra.mrb[88].mxu1 %v4146_v43  ;;  %v3696_v11 = vpop.f32.mrb[52].mxu0  ;;  %v4150_v48 = vmax.f32 %v4086_v56, 0.0 }
 0x668   :  { %v4151_v17 = vmax.f32 %v4087_v9, 0.0  ;;  %v4088_v15 = vadd.f32 %v4023_v14, %v3696_v11  ;;  %v3857_v16 = vpop.f32.mrb[60].mxu1  ;;  %v3698_v47 = vpop.f32.mrb[53].mxu0 }
 0x669   :  { %v4090_v49 = vadd.f32 %v4023_v14, %v3857_v16  ;;  %v4089_v50 = vadd.f32 %v4023_v14, %v3698_v47  ;;  %v3859_v51 = vpop.f32.mrb[61].mxu1  ;;  %4351 = vmatprep.mubr.f32.mxu0 %v4149_v61 }
 0x66a   :  { %v4091_v52 = vadd.f32 %v4023_v14, %v3859_v51  ;;  %4496 = vmatprep.mubr.f32.mxu1 %v4151_v17  ;;  %4352 = vmatmul.mubr.f32.gmra.mrb[82].mxu0 %v4148_v13  ;;  %v4152_v29 = vmax.f32 %v4088_v15, 0.0 }
 0x66b   :  { %v4153_v59 = vmax.f32 %v4089_v50, 0.0  ;;  %4497 = vmatmul.mubr.f32.gmra.mrb[90].mxu1 %v4150_v48  ;;  %v3702_v28 = vpop.f32.mrb[54].mxu0  ;;  %v4154_v36 = vmax.f32 %v4090_v49, 0.0 }
 0x66c   :  { %v4155_v30 = vmax.f32 %v4091_v52, 0.0  ;;  %v4092_v31 = vadd.f32 %v4028_v55, %v3702_v28  ;;  %v3863_v32 = vpop.f32.mrb[62].mxu1  ;;  %v3704_v33 = vpop.f32.mrb[55].mxu0 }
 0x66d   :  { %v4094_v41 = vadd.f32 %v4028_v55, %v3863_v32  ;;  %v4093_v60 = vadd.f32 %v4028_v55, %v3704_v33  ;;  %v3865_v62 = vpop.f32.mrb[63].mxu1  ;;  %4356 = vmatprep.mubr.f32.mxu0 %v4153_v59 }
 0x66e   :  { %v4095_v63 = vadd.f32 %v4028_v55, %v3865_v62  ;;  %4501 = vmatprep.mubr.f32.mxu1 %v4155_v30  ;;  %4357 = vmatmul.mubr.f32.gmra.mrb[84].mxu0 %v4152_v29  ;;  %v4156_v1 = vmax.f32 %v4092_v31, 0.0 }
 0x66f   :  { %v4157_v0 = vmax.f32 %v4093_v60, 0.0  ;;  %4502 = vmatmul.mubr.f32.gmra.mrb[92].mxu1 %v4154_v36  ;;  %v3708_v22 = vpop.f32.mrb[56].mxu0  ;;  %v4158_v7 = vmax.f32 %v4094_v41, 0.0 }
 0x670   :  { %v4159_v3 = vmax.f32 %v4095_v63, 0.0  ;;  %v4096_v4 = vadd.f32 %v4033_v2, %v3708_v22  ;;  %v3869_v5 = vpop.f32.mrb[64].mxu1  ;;  %v3710_v6 = vpop.f32.mrb[57].mxu0 }
 0x671   :  { %v4098_v8 = vadd.f32 %v4033_v2, %v3869_v5  ;;  %v4097_v10 = vadd.f32 %v4033_v2, %v3710_v6  ;;  %v3871_v18 = vpop.f32.mrb[65].mxu1  ;;  %4361 = vmatprep.mubr.f32.mxu0 %v4157_v0 }
 0x672   :  { %v4099_v19 = vadd.f32 %v4033_v2, %v3871_v18  ;;  %4506 = vmatprep.mubr.f32.mxu1 %v4159_v3  ;;  %4362 = vmatmul.mubr.f32.gmra.mrb[86].mxu0 %v4156_v1  ;;  %v4160_v34 = vmax.f32 %v4096_v4, 0.0 }
 0x673   :  { %v4161_v25 = vmax.f32 %v4097_v10, 0.0  ;;  %4507 = vmatmul.mubr.f32.gmra.mrb[94].mxu1 %v4158_v7  ;;  %v3714_v26 = vpop.f32.mrb[58].mxu0  ;;  %v4162_v21 = vmax.f32 %v4098_v8, 0.0 }
 0x674   :  { %v4163_v23 = vmax.f32 %v4099_v19, 0.0  ;;  %v4100_v27 = vadd.f32 %v4038_v20, %v3714_v26  ;;  %v3875_v40 = vpop.f32.mrb[66].mxu1  ;;  %v3716_v24 = vpop.f32.mrb[59].mxu0 }
 0x675   :  { %v4102_v35 = vadd.f32 %v4038_v20, %v3875_v40  ;;  %v4101_v37 = vadd.f32 %v4038_v20, %v3716_v24  ;;  %v3877_v38 = vpop.f32.mrb[67].mxu1  ;;  %4366 = vmatprep.mubr.f32.mxu0 %v4161_v25 }
 0x676   :  { %v4103_v39 = vadd.f32 %v4038_v20, %v3877_v38  ;;  %4511 = vmatprep.mubr.f32.mxu1 %v4163_v23  ;;  %4367 = vmatmul.mubr.f32.gmra.mrb[88].mxu0 %v4160_v34  ;;  %v4164_v45 = vmax.f32 %v4100_v27, 0.0 }
 0x677   :  { %v4165_v44 = vmax.f32 %v4101_v37, 0.0  ;;  %4512 = vmatmul.mubr.f32.gmra.mrb[96].mxu1 %v4162_v21  ;;  %v4166_v53 = vmax.f32 %v4102_v35, 0.0 }
 0x678   :  { %v4167_v46 = vmax.f32 %v4103_v39, 0.0 }
 0x679   :  { %4371 = vmatprep.mubr.f32.mxu0 %v4165_v44 }
 0x67a   :  { %4516 = vmatprep.mubr.f32.mxu1 %v4167_v46  ;;  %4372 = vmatmul.mubr.f32.gmra.mrb[90].mxu0 %v4164_v45 }
 0x67b   :  { %4517 = vmatmul.mubr.f32.gmra.mrb[98].mxu1 %v4166_v53  ;;  %5416 = vmatprep.mubr.f32.mxu0 %v4522_v54 }
 0x711   :  { %v5224_v12 = vpop.f32.mrb[60].mxu0 }
 0x712   :  { %v5304_v42 = vpop.f32.mrb[68].mxu1  ;;  %v5225_v43 = vpop.f32.mrb[61].mxu0 }
 0x713   :  { %v5226_v56 = vadd.f32 %v5225_v43, %v5224_v12  ;;  %v5305_v57 = vpop.f32.mrb[69].mxu1 }
 0x714   :  { %v5306_v58 = vadd.f32 %v5305_v57, %v5304_v42 }
 0x715   :  { %v5227_v9 = vpop.f32.mrb[62].mxu0 }
 0x716   :  { %v4444_v14 = vadd.f32 %v5306_v58, %v5226_v56  ;;  %v5307_v61 = vpop.f32.mrb[70].mxu1  ;;  %v5228_v11 = vpop.f32.mrb[63].mxu0 }
 0x717   :  { %v5229_v13 = vadd.f32 %v5228_v11, %v5227_v9  ;;  %v5308_v17 = vpop.f32.mrb[71].mxu1 }
 0x718   :  { %v5309_v15 = vadd.f32 %v5308_v17, %v5307_v61 }
 0x719   :  { %v5230_v16 = vpop.f32.mrb[64].mxu0 }
 0x71a   :  { %v4449_v47 = vadd.f32 %v5309_v15, %v5229_v13  ;;  %v5310_v48 = vpop.f32.mrb[72].mxu1  ;;  %v5231_v49 = vpop.f32.mrb[65].mxu0 }
 0x71b   :  { %v5232_v50 = vadd.f32 %v5231_v49, %v5230_v16  ;;  %v5311_v51 = vpop.f32.mrb[73].mxu1 }
 0x71c   :  { %v5312_v52 = vadd.f32 %v5311_v51, %v5310_v48  ;;  %v5672_v55 = vpack.c.bf16 %v4449_v47, %v4444_v14 }
 0x71d   :  { %v5233_v59 = vpop.f32.mrb[66].mxu0 }
 0x71e   :  { %v4454_v28 = vadd.f32 %v5312_v52, %v5232_v50  ;;  %v5313_v29 = vpop.f32.mrb[74].mxu1  ;;  %5673 = vmatprep.subr.bf16.mxu0 %v5672_v55  ;;  %v5234_v30 = vpop.f32.mrb[67].mxu0 }
 0x71f   :  { %v5235_v31 = vadd.f32 %v5234_v30, %v5233_v59  ;;  %v5314_v32 = vpop.f32.mrb[75].mxu1  ;;  %5675 = vmatpush3.bf16.msra.mxu0 %v5672_v55 }
 0x720   :  { %v5315_v33 = vadd.f32 %v5314_v32, %v5313_v29 }
 0x721   :  { %v5236_v36 = vpop.f32.mrb[68].mxu0 }
 0x722   :  { %v4459_v41 = vadd.f32 %v5315_v33, %v5235_v31  ;;  %v5316_v60 = vpop.f32.mrb[76].mxu1  ;;  %v5237_v62 = vpop.f32.mrb[69].mxu0 }
 0x723   :  { %v5238_v63 = vadd.f32 %v5237_v62, %v5236_v36  ;;  %v5317_v2 = vpop.f32.mrb[77].mxu1 }
 0x724   :  { %v5318_v0 = vadd.f32 %v5317_v2, %v5316_v60  ;;  %v5676_v22 = vpack.c.bf16 %v4459_v41, %v4454_v28 }
 0x725   :  { %v5239_v1 = vpop.f32.mrb[70].mxu0 }
 0x726   :  { %v4464_v3 = vadd.f32 %v5318_v0, %v5238_v63  ;;  %v5319_v4 = vpop.f32.mrb[78].mxu1  ;;  %5677 = vmatprep.subr.bf16.mxu0 %v5676_v22  ;;  %v5240_v5 = vpop.f32.mrb[71].mxu0 }
 0x727   :  { %v5241_v6 = vadd.f32 %v5240_v5, %v5239_v1  ;;  %v5320_v7 = vpop.f32.mrb[79].mxu1  ;;  %5679 = vmatpush3.bf16.msra.mxu0 %v5676_v22 }
 0x728   :  { %v5321_v8 = vadd.f32 %v5320_v7, %v5319_v4 }
 0x729   :  { %v5242_v10 = vpop.f32.mrb[72].mxu0 }
 0x72a   :  { %v4469_v18 = vadd.f32 %v5321_v8, %v5241_v6  ;;  %v5322_v19 = vpop.f32.mrb[80].mxu1  ;;  %v5243_v20 = vpop.f32.mrb[73].mxu0 }
 0x72b   :  { %v5244_v25 = vadd.f32 %v5243_v20, %v5242_v10  ;;  %v5323_v26 = vpop.f32.mrb[81].mxu1 }
 0x72c   :  { %v5324_v34 = vadd.f32 %v5323_v26, %v5322_v19  ;;  %v5680_v23 = vpack.c.bf16 %v4469_v18, %v4464_v3 }
 0x72d   :  { %v5245_v27 = vpop.f32.mrb[74].mxu0 }
 0x72e   :  { %v4474_v40 = vadd.f32 %v5324_v34, %v5244_v25  ;;  %v5325_v24 = vpop.f32.mrb[82].mxu1  ;;  %5681 = vmatprep.subr.bf16.mxu0 %v5680_v23  ;;  %v5246_v21 = vpop.f32.mrb[75].mxu0 }
 0x72f   :  { %v5247_v35 = vadd.f32 %v5246_v21, %v5245_v27  ;;  %v5326_v37 = vpop.f32.mrb[83].mxu1  ;;  %5683 = vmatpush3.bf16.msra.mxu0 %v5680_v23 }
 0x730   :  { %v5327_v38 = vadd.f32 %v5326_v37, %v5325_v24  ;;  %v4523_v37 = vld [vmem:[%s8038_s12 + $0x8] sm:$0xff] }
 0x731   :  { %v5248_v39 = vpop.f32.mrb[76].mxu0 }
 0x732   :  { %v4479_v44 = vadd.f32 %v5327_v38, %v5247_v35  ;;  %v5328_v45 = vpop.f32.mrb[84].mxu1  ;;  %v5249_v46 = vpop.f32.mrb[77].mxu0  ;;  %v4524_v38 = vld [vmem:[%s8038_s12 + $0x10] sm:$0xff] }
 0x733   :  { %v5250_v53 = vadd.f32 %v5249_v46, %v5248_v39  ;;  %v5329_v54 = vpop.f32.mrb[85].mxu1  ;;  %v4525_v39 = vld [vmem:[%s8038_s12 + $0x18] sm:$0xff]  ;;  %v4528_v46 = vld [vmem:[%s8038_s12 + $0x30] sm:$0xff] }
 0x734   :  { %v5330_v12 = vadd.f32 %v5329_v54, %v5328_v45  ;;  %v5684_v42 = vpack.c.bf16 %v4479_v44, %v4474_v40  ;;  %v4526_v44 = vld [vmem:[%s8038_s12 + $0x20] sm:$0xff]  ;;  %v4527_v45 = vld [vmem:[%s8038_s12 + $0x28] sm:$0xff] }
 0x735   :  { %v5251_v43 = vpop.f32.mrb[78].mxu0  ;;  %v4530_v54 = vld [vmem:[%s8038_s12 + $0x40] sm:$0xff] }
 0x736   :  { %v4484_v56 = vadd.f32 %v5330_v12, %v5250_v53  ;;  %v5331_v57 = vpop.f32.mrb[86].mxu1  ;;  %5685 = vmatprep.subr.bf16.mxu0 %v5684_v42  ;;  %v5252_v58 = vpop.f32.mrb[79].mxu0  ;;  %v4529_v53 = vld [vmem:[%s8038_s12 + $0x38] sm:$0xff]  ;;  %v4531_v12 = vld [vmem:[%s8038_s12 + $0x48] sm:$0xff] }
 0x737   :  { %v5253_v9 = vadd.f32 %v5252_v58, %v5251_v43  ;;  %v5332_v14 = vpop.f32.mrb[87].mxu1  ;;  %5687 = vmatpush3.bf16.msra.mxu0 %v5684_v42  ;;  %v4532_v42 = vld [vmem:[%s8038_s12 + $0x50] sm:$0xff]  ;;  %v4533_v43 = vld [vmem:[%s8038_s12 + $0x58] sm:$0xff] }
 0x738   :  { %v5333_v61 = vadd.f32 %v5332_v14, %v5331_v57  ;;  %v4535_v57 = vld [vmem:[%s8038_s12 + $0x68] sm:$0xff]  ;;  %v4536_v58 = vld [vmem:[%s8038_s12 + $0x70] sm:$0xff]  ;;  %v4562_v14 = vpop.permute.xlu0 %4561 }
 0x739   :  { %v5254_v11 = vpop.f32.mrb[80].mxu0 }
 0x73a   :  { %v4489_v13 = vadd.f32 %v5333_v61, %v5253_v9  ;;  %v5334_v17 = vpop.f32.mrb[88].mxu1  ;;  %v5255_v15 = vpop.f32.mrb[81].mxu0  ;;  %v4537_v9 = vld [vmem:[%s8038_s12 + $0x78] sm:$0xff] }
 0x73b   :  { %v5256_v16 = vadd.f32 %v5255_v15, %v5254_v11  ;;  %v5335_v47 = vpop.f32.mrb[89].mxu1  ;;  %v4557_v61 = vpop.permute.xlu1 %4556 }
 0x73c   :  { %v5336_v48 = vadd.f32 %v5335_v47, %v5334_v17  ;;  %v5688_v49 = vpack.c.bf16 %v4489_v13, %v4484_v56  ;;  %v4534_v56 = vld [vmem:[%s8038_s12 + $0x60] sm:$0xff]  ;;  %v4572_v11 = vpop.permute.xlu0 %4571 }
 0x73d   :  { %v5257_v50 = vpop.f32.mrb[82].mxu0 }
 0x73e   :  { %v4494_v51 = vadd.f32 %v5336_v48, %v5256_v16  ;;  %v5337_v52 = vpop.f32.mrb[90].mxu1  ;;  %5689 = vmatprep.subr.bf16.mxu0 %v5688_v49  ;;  %v5258_v55 = vpop.f32.mrb[83].mxu0 }
 0x73f   :  { %v5259_v59 = vadd.f32 %v5258_v55, %v5257_v50  ;;  %v5338_v28 = vpop.f32.mrb[91].mxu1  ;;  %5691 = vmatpush3.bf16.msra.mxu0 %v5688_v49  ;;  %v4567_v13 = vpop.permute.xlu1 %4566 }
 0x740   :  { %v5339_v29 = vadd.f32 %v5338_v28, %v5337_v52  ;;  %v4582_v17 = vpop.permute.xlu0 %4581 }
 0x741   :  { %v5260_v30 = vpop.f32.mrb[84].mxu0 }
 0x742   :  { %v4499_v31 = vadd.f32 %v5339_v29, %v5259_v59  ;;  %v5340_v32 = vpop.f32.mrb[92].mxu1  ;;  %v5261_v33 = vpop.f32.mrb[85].mxu0 }
 0x743   :  { %v5262_v36 = vadd.f32 %v5261_v33, %v5260_v30  ;;  %v5341_v41 = vpop.f32.mrb[93].mxu1  ;;  %v4577_v15 = vpop.permute.xlu1 %4576 }
 0x744   :  { %v5342_v60 = vadd.f32 %v5341_v41, %v5340_v32  ;;  %v5692_v62 = vpack.c.bf16 %v4499_v31, %v4494_v51  ;;  %v4592_v48 = vpop.permute.xlu0 %4591 }
 0x745   :  { %v5263_v63 = vpop.f32.mrb[86].mxu0 }
 0x746   :  { %v4504_v2 = vadd.f32 %v5342_v60, %v5262_v36  ;;  %v5343_v0 = vpop.f32.mrb[94].mxu1  ;;  %5693 = vmatprep.subr.bf16.mxu0 %v5692_v62  ;;  %v5264_v22 = vpop.f32.mrb[87].mxu0 }
 0x747   :  { %v5265_v1 = vadd.f32 %v5264_v22, %v5263_v63  ;;  %v5344_v3 = vpop.f32.mrb[95].mxu1  ;;  %5695 = vmatpush3.bf16.msra.mxu0 %v5692_v62  ;;  %v4587_v50 = vpop.permute.xlu1 %4586 }
 0x748   :  { %v5345_v4 = vadd.f32 %v5344_v3, %v5343_v0  ;;  %v4602_v30 = vpop.permute.xlu0 %4601 }
 0x749   :  { %v5266_v5 = vpop.f32.mrb[88].mxu0 }
 0x74a   :  { %v4509_v6 = vadd.f32 %v5345_v4, %v5265_v1  ;;  %v5346_v7 = vpop.f32.mrb[96].mxu1  ;;  %v5267_v8 = vpop.f32.mrb[89].mxu0 }
 0x74b   :  { %v5268_v10 = vadd.f32 %v5267_v8, %v5266_v5  ;;  %v5347_v18 = vpop.f32.mrb[97].mxu1  ;;  %v4597_v32 = vpop.permute.xlu1 %4596 }
 0x74c   :  { %v5348_v19 = vadd.f32 %v5347_v18, %v5346_v7  ;;  %v5696_v20 = vpack.c.bf16 %v4509_v6, %v4504_v2  ;;  %v4612_v7 = vpop.permute.xlu0 %4611 }
 0x74d   :  { %v5269_v25 = vpop.f32.mrb[90].mxu0 }
 0x74e   :  { %v4514_v26 = vadd.f32 %v5348_v19, %v5268_v10  ;;  %v5349_v34 = vpop.f32.mrb[98].mxu1  ;;  %5697 = vmatprep.subr.bf16.mxu0 %v5696_v20  ;;  %v5270_v23 = vpop.f32.mrb[91].mxu0 }
 0x74f   :  { %v5271_v27 = vadd.f32 %v5270_v23, %v5269_v25  ;;  %v5350_v40 = vpop.f32.mrb[99].mxu1  ;;  %5699 = vmatpush3.bf16.msra.mxu0 %v5696_v20  ;;  %v4607_v20 = vpop.permute.xlu1 %4606 }
 0x750   :  { %v5351_v24 = vadd.f32 %v5350_v40, %v5349_v34 }
 0x752   :  { %v4519_v21 = vadd.f32 %v5351_v24, %v5271_v27 }
 0x754   :  { %v5700_v35 = vpack.c.bf16 %v4519_v21, %v4514_v26 }
 0x756   :  { %5701 = vmatprep.subr.bf16.mxu0 %v5700_v35 }
 0x757   :  { %5703 = vmatpush3.bf16.msra.mxu0 %v5700_v35 }
 0x75a   :  { %5417 = vmatmul.mubr.f32.vlgmr.msra.gmra.mrb[92].mxu0 %v4523_v37 }
 0x75b   :  { %5419 = vmatprep.mubr.f32.mxu0 %v4524_v38 }
 0x75e   :  { %5420 = vmatmul.mubr.f32.gmra.mrb[94].mxu0 %v4525_v39  ;;  %v4622_v39 = vpop.permute.xlu0 %4621 }
 0x75f   :  { %5422 = vmatprep.mubr.f32.mxu0 %v4526_v44 }
 0x762   :  { %5423 = vmatmul.mubr.f32.gmra.mrb[96].mxu0 %v4527_v45  ;;  %v4617_v45 = vpop.permute.xlu1 %4616 }
 0x763   :  { %5425 = vmatprep.mubr.f32.mxu0 %v4528_v46 }
 0x766   :  { %5426 = vmatmul.mubr.f32.gmra.mrb[98].mxu0 %v4529_v53 }
 0x767   :  { %5428 = vmatprep.mubr.f32.mxu0 %v4530_v54 }
 0x76a   :  { %5429 = vmatmul.mubr.f32.gmra.mrb[100].mxu0 %v4531_v12 }
 0x76b   :  { %5431 = vmatprep.mubr.f32.mxu0 %v4532_v42 }
 0x76e   :  { %5432 = vmatmul.mubr.f32.gmra.mrb[102].mxu0 %v4533_v43 }
 0x76f   :  { %5434 = vmatprep.mubr.f32.mxu0 %v4534_v56 }
 0x772   :  { %5435 = vmatmul.mubr.f32.gmra.mrb[104].mxu0 %v4535_v57 }
 0x773   :  { %5437 = vmatprep.mubr.f32.mxu0 %v4536_v58 }
 0x776   :  { %5438 = vmatmul.mubr.f32.gmra.mrb[106].mxu0 %v4537_v9  ;;  %v4632_v9 = vpop.permute.xlu0 %4631 }
 0x82d   :  { %v5418_v16 = vpop.f32.mrb[92].mxu0 }
 0x82e   :  { %v4700_v47 = vpop.f32.mrb[93].mxu0  ;;  %v7837_v52 = vadd.f32 %v5418_v16, %v4562_v14 }
 0x82f   :  { %v7839_v55 = vadd.f32 %v4700_v47, %v4557_v61 }
 0x830   :  { %v4781_v33 = vsel %vm4779_vm7, %v7837_v52, -inf }
 0x831   :  { %v5421_v49 = vpop.f32.mrb[94].mxu0  ;;  %v4780_v60 = vsel %vm4779_vm7, %v7839_v55, -inf }
 0x832   :  { %v4710_v51 = vpop.f32.mrb[95].mxu0  ;;  %v7847_v36 = vadd.f32 %v5421_v49, %v4572_v11 }
 0x833   :  { %v7853_v62 = vadd.f32 %v4710_v51, %v4567_v13  ;;  %v4627_v13 = vpop.permute.xlu1 %4626 }
 0x834   :  { %v4783_v5 = vsel %vm4779_vm7, %v7847_v36, -inf }
 0x835   :  { %v5424_v59 = vpop.f32.mrb[96].mxu0  ;;  %v4782_v8 = vsel %vm4779_vm7, %v7853_v62, -inf }
 0x836   :  { %v7841_v28 = vadd.f32 %v5424_v59, %v4582_v17  ;;  %v4720_v29 = vpop.f32.mrb[97].mxu0 }
 0x837   :  { %v7843_v31 = vadd.f32 %v4720_v29, %v4577_v15 }
 0x838   :  { %v4786_v41 = vsel %vm4779_vm7, %v7841_v28, -inf }
 0x839   :  { %v4787_v63 = vmax.f32 %v4781_v33, %v4786_v41  ;;  %v4784_v2 = vsel %vm4779_vm7, %v7843_v31, -inf  ;;  %v5427_v0 = vpop.f32.mrb[98].mxu0 }
 0x83a   :  { %v4785_v22 = vmax.f32 %v4780_v60, %v4784_v2  ;;  %v7857_v1 = vadd.f32 %v5427_v0, %v4592_v48  ;;  %v4730_v3 = vpop.f32.mrb[99].mxu0 }
 0x83b   :  { %v4731_v4 = vadd.f32 %v4730_v3, %v4587_v50 }
 0x83c   :  { %v4790_v6 = vsel %vm4779_vm7, %v7857_v1, -inf }
 0x83d   :  { %v4791_v10 = vmax.f32 %v4783_v5, %v4790_v6  ;;  %v4788_v18 = vsel %vm4779_vm7, %v4731_v4, -inf  ;;  %v5430_v19 = vpop.f32.mrb[100].mxu0 }
 0x83e   :  { %v4789_v25 = vmax.f32 %v4782_v8, %v4788_v18  ;;  %v4746_v26 = vadd.f32 %v5430_v19, %v4602_v30  ;;  %v4740_v34 = vpop.f32.mrb[101].mxu0 }
 0x83f   :  { %v4741_v23 = vadd.f32 %v4740_v34, %v4597_v32 }
 0x840   :  { %v4794_v27 = vsel %vm4779_vm7, %v4746_v26, -inf }
 0x841   :  { %v4795_v40 = vmax.f32 %v4787_v63, %v4794_v27  ;;  %v4792_v24 = vsel %vm4779_vm7, %v4741_v23, -inf  ;;  %v5433_v21 = vpop.f32.mrb[102].mxu0 }
 0x842   :  { %v4793_v35 = vmax.f32 %v4785_v22, %v4792_v24  ;;  %v4756_v37 = vadd.f32 %v5433_v21, %v4612_v7  ;;  %v4750_v38 = vpop.f32.mrb[103].mxu0 }
 0x843   :  { %v4751_v44 = vadd.f32 %v4750_v38, %v4607_v20 }
 0x844   :  { %v4798_v46 = vsel %vm4779_vm7, %v4756_v37, -inf }
 0x845   :  { %v4799_v53 = vmax.f32 %v4791_v10, %v4798_v46  ;;  %v4796_v54 = vsel %vm4779_vm7, %v4751_v44, -inf  ;;  %v5436_v12 = vpop.f32.mrb[104].mxu0 }
 0x846   :  { %v4797_v42 = vmax.f32 %v4789_v25, %v4796_v54  ;;  %v4766_v43 = vadd.f32 %v5436_v12, %v4622_v39  ;;  %v4760_v56 = vpop.f32.mrb[105].mxu0 }
 0x847   :  { %v4761_v57 = vadd.f32 %v4760_v56, %v4617_v45 }
 0x848   :  { %v4802_v58 = vsel %vm4779_vm7, %v4766_v43, -inf }
 0x849   :  { %v4803_v14 = vmax.f32 %v4795_v40, %v4802_v58  ;;  %v4800_v61 = vsel %vm4779_vm7, %v4761_v57, -inf  ;;  %v5439_v11 = vpop.f32.mrb[106].mxu0 }
 0x84a   :  { %v4801_v17 = vmax.f32 %v4793_v35, %v4800_v61  ;;  %v4776_v15 = vadd.f32 %v5439_v11, %v4632_v9  ;;  %v4770_v16 = vpop.f32.mrb[107].mxu0 }
 0x84b   :  { %v4771_v47 = vadd.f32 %v4770_v16, %v4627_v13 }
 0x84c   :  { %v4808_v48 = vmax.f32 %v4801_v17, %v4803_v14  ;;  %v4806_v49 = vsel %vm4779_vm7, %v4776_v15, -inf }
 0x84d   :  { %v4807_v50 = vmax.f32 %v4799_v53, %v4806_v49  ;;  %v4804_v51 = vsel %vm4779_vm7, %v4771_v47, -inf }
 0x84e   :  { %v4805_v59 = vmax.f32 %v4797_v42, %v4804_v51 }
 0x850   :  { %v4809_v29 = vmax.f32 %v4805_v59, %v4807_v50 }
 0x852   :  { %v4810_v30 = vmax.f32 %v4808_v48, %v4809_v29 }
 0x854   :  { %v4811_v32 = vrot.slane %v4810_v30, 4 }
 0x856   :  { %v4812_v33 = vmax.f32 %v4810_v30, %v4811_v32 }
 0x858   :  { %v4813_v41 = vrot.slane %v4812_v33, 2 }
 0x85a   :  { %v4814_v60 = vmax.f32 %v4812_v33, %v4813_v41 }
 0x85c   :  { %v4815_v63 = vrot.slane %v4814_v60, 1 }
 0x85e   :  { %v4816_v2 = vmax.f32 %v4814_v60, %v4815_v63 }
 0x860   :  { %v7875_v0 = vsub.f32 %v7839_v55, %v4816_v2  ;;  %v7878_v22 = vsub.f32 %v7837_v52, %v4816_v2  ;;  %v7881_v3 = vsub.f32 %v7853_v62, %v4816_v2  ;;  %v7884_v5 = vsub.f32 %v7847_v36, %v4816_v2 }
 0x861   :  { %v7887_v6 = vsub.f32 %v7843_v31, %v4816_v2  ;;  %v7890_v7 = vsub.f32 %v7841_v28, %v4816_v2  ;;  %v7892_v8 = vsub.f32 %v4731_v4, %v4816_v2  ;;  %v7895_v55 = vsub.f32 %v7857_v1, %v4816_v2 }
 0x862   :  { %v7897_v10 = vsub.f32 %v4741_v23, %v4816_v2  ;;  %v7899_v52 = vsub.f32 %v4746_v26, %v4816_v2  ;;  %v7901_v62 = vsub.f32 %v4751_v44, %v4816_v2  ;;  %v7903_v18 = vsub.f32 %v4756_v37, %v4816_v2 }
 0x863   :  { %v7905_v36 = vsub.f32 %v4761_v57, %v4816_v2  ;;  %v7907_v31 = vsub.f32 %v4766_v43, %v4816_v2  ;;  %v7909_v19 = vsub.f32 %v4771_v47, %v4816_v2  ;;  %v7911_v28 = vsub.f32 %v4776_v15, %v4816_v2 }
 0x864   :  { %v4833_v4 = vmul.f32 1.442695, %v7875_v0  ;;  %v4835_v1 = vmul.f32 1.442695, %v7878_v22  ;;  %v4837_v20 = vmul.f32 1.442695, %v7881_v3 }
 0x865   :  { %v4839_v25 = vmul.f32 1.442695, %v7884_v5  ;;  %v4841_v26 = vmul.f32 1.442695, %v7887_v6  ;;  %v4843_v34 = vmul.f32 1.442695, %v7890_v7 }
 0x866   :  { %5952 = vpow2.f32 %v4833_v4  ;;  %v4845_v23 = vmul.f32 1.442695, %v7892_v8  ;;  %v4847_v27 = vmul.f32 1.442695, %v7895_v55  ;;  %v4849_v40 = vmul.f32 1.442695, %v7897_v10 }
 0x867   :  { %5954 = vpow2.f32 %v4835_v1  ;;  %v4851_v35 = vmul.f32 1.442695, %v7899_v52  ;;  %v4853_v45 = vmul.f32 1.442695, %v7901_v62  ;;  %v4855_v12 = vmul.f32 1.442695, %v7903_v18 }
 0x868   :  { %5956 = vpow2.f32 %v4837_v20  ;;  %v4857_v57 = vmul.f32 1.442695, %v7905_v36  ;;  %v4859_v61 = vmul.f32 1.442695, %v7907_v31  ;;  %v4861_v15 = vmul.f32 1.442695, %v7909_v19 }
 0x869   :  { %5958 = vpow2.f32 %v4839_v25  ;;  %v4863_v49 = vmul.f32 1.442695, %v7911_v28 }
 0x86a   :  { %5960 = vpow2.f32 %v4841_v26 }
 0x86b   :  { %5962 = vpow2.f32 %v4843_v34 }
 0x86c   :  { %5964 = vpow2.f32 %v4845_v23 }
 0x86d   :  { %5966 = vpow2.f32 %v4847_v27 }
 0x86e   :  { %5968 = vpow2.f32 %v4849_v40 }
 0x86f   :  { %5970 = vpow2.f32 %v4851_v35 }
 0x870   :  { %v5953_v24 = vpop.eup %5952  ;;  %5972 = vpow2.f32 %v4853_v45 }
 0x871   :  { %v5955_v21 = vpop.eup %5954  ;;  %v4865_v37 = vsel %vm4779_vm7, %v5953_v24, 0.0  ;;  %5974 = vpow2.f32 %v4855_v12 }
 0x872   :  { %v5957_v38 = vpop.eup %5956  ;;  %v4866_v39 = vsel %vm4779_vm7, %v5955_v21, 0.0  ;;  %5976 = vpow2.f32 %v4857_v57 }
 0x873   :  { %v5959_v44 = vpop.eup %5958  ;;  %v4867_v46 = vadd.f32 %v4866_v39, %v4865_v37  ;;  %v4868_v53 = vsel %vm4779_vm7, %v5957_v38, 0.0  ;;  %5978 = vpow2.f32 %v4859_v61 }
 0x874   :  { %v5961_v54 = vpop.eup %5960  ;;  %v4870_v43 = vsel %vm4779_vm7, %v5959_v44, 0.0  ;;  %5980 = vpow2.f32 %v4861_v15 }
 0x875   :  { %v4869_v42 = vadd.f32 %v4868_v53, %v4867_v46  ;;  %v5963_v56 = vpop.eup %5962  ;;  %v4872_v9 = vsel %vm4779_vm7, %v5961_v54, 0.0  ;;  %5982 = vpow2.f32 %v4863_v49 }
 0x876   :  { %v5965_v14 = vpop.eup %5964  ;;  %v4874_v13 = vsel %vm4779_vm7, %v5963_v56, 0.0 }
 0x877   :  { %v4871_v58 = vadd.f32 %v4870_v43, %v4869_v42  ;;  %v5967_v17 = vpop.eup %5966  ;;  %v4876_v47 = vsel %vm4779_vm7, %v5965_v14, 0.0 }
 0x878   :  { %v5969_v48 = vpop.eup %5968  ;;  %v4878_v51 = vsel %vm4779_vm7, %v5967_v17, 0.0 }
 0x879   :  { %v4873_v11 = vadd.f32 %v4872_v9, %v4871_v58  ;;  %v5971_v59 = vpop.eup %5970  ;;  %v4880_v30 = vsel %vm4779_vm7, %v5969_v48, 0.0 }
 0x87a   :  { %v5973_v32 = vpop.eup %5972  ;;  %v4882_v41 = vsel %vm4779_vm7, %v5971_v59, 0.0 }
 0x87b   :  { %v4875_v16 = vadd.f32 %v4874_v13, %v4873_v11  ;;  %v5975_v60 = vpop.eup %5974  ;;  %v4884_v2 = vsel %vm4779_vm7, %v5973_v32, 0.0 }
 0x87c   :  { %v5977_v4 = vpop.eup %5976  ;;  %v4886_v20 = vsel %vm4779_vm7, %v5975_v60, 0.0 }
 0x87d   :  { %v4877_v50 = vadd.f32 %v4876_v47, %v4875_v16  ;;  %v5979_v25 = vpop.eup %5978  ;;  %v4888_v34 = vsel %vm4779_vm7, %v5977_v4, 0.0 }
 0x87e   :  { %v5981_v23 = vpop.eup %5980  ;;  %v4890_v40 = vsel %vm4779_vm7, %v5979_v25, 0.0 }
 0x87f   :  { %v4879_v29 = vadd.f32 %v4878_v51, %v4877_v50  ;;  %v5983_v24 = vpop.eup %5982  ;;  %v4892_v35 = vsel %vm4779_vm7, %v5981_v23, 0.0 }
 0x880   :  { %v4894_v38 = vsel %vm4779_vm7, %v5983_v24, 0.0 }
 0x881   :  { %v4881_v33 = vadd.f32 %v4880_v30, %v4879_v29 }
 0x883   :  { %v4883_v63 = vadd.f32 %v4882_v41, %v4881_v33 }
 0x885   :  { %v4885_v1 = vadd.f32 %v4884_v2, %v4883_v63 }
 0x887   :  { %v4887_v26 = vadd.f32 %v4886_v20, %v4885_v1 }
 0x889   :  { %v4889_v27 = vadd.f32 %v4888_v34, %v4887_v26 }
 0x88b   :  { %v4891_v21 = vadd.f32 %v4890_v40, %v4889_v27 }
 0x88d   :  { %v4893_v37 = vadd.f32 %v4892_v35, %v4891_v21 }
 0x88f   :  { %v4895_v39 = vadd.f32 %v4894_v38, %v4893_v37 }
 0x891   :  { %v4896_v44 = vrot.slane %v4895_v39, 4 }
 0x893   :  { %v4897_v45 = vadd.f32 %v4896_v44, %v4895_v39 }
 0x895   :  { %v4898_v46 = vrot.slane %v4897_v45, 2 }
 0x897   :  { %v4899_v53 = vadd.f32 %v4898_v46, %v4897_v45 }
 0x899   :  { %v4900_v54 = vrot.slane %v4899_v53, 1 }
 0x89b   :  { %v4901_v12 = vadd.f32 %v4900_v54, %v4899_v53 }
 0x89d   :  { %5984 = vlog2.f32 %v4901_v12 }
 0x8a7   :  { %v5985_v42 = vpop.eup %5984 }
 0x8a8   :  { %v4903_v43 = vmul.f32 0.6931472, %v5985_v42 }
 0x8aa   :  { %v4904_v56 = vsub.f32 %v7875_v0, %v4903_v43  ;;  %v4905_v57 = vsub.f32 %v7878_v22, %v4903_v43  ;;  %v4906_v58 = vsub.f32 %v7881_v3, %v4903_v43  ;;  %v4907_v9 = vsub.f32 %v7884_v5, %v4903_v43 }
 0x8ab   :  { %v4908_v14 = vsub.f32 %v7887_v6, %v4903_v43  ;;  %v4909_v61 = vsub.f32 %v7890_v7, %v4903_v43  ;;  %v4910_v11 = vsub.f32 %v7892_v8, %v4903_v43  ;;  %v4911_v13 = vsub.f32 %v7895_v55, %v4903_v43 }
 0x8ac   :  { %v4912_v17 = vsub.f32 %v7897_v10, %v4903_v43  ;;  %v4913_v15 = vsub.f32 %v7899_v52, %v4903_v43  ;;  %v4914_v0 = vsub.f32 %v7901_v62, %v4903_v43  ;;  %v4915_v22 = vsub.f32 %v7903_v18, %v4903_v43  ;;  %4920 = vst.msk [vmem:[%s8039_s14] sm:$0xff] %vm4779_vm7, %v4904_v56 }
 0x8ad   :  { %4921 = vst.msk [vmem:[%s8039_s14 + $0x8] sm:$0xff] %vm4779_vm7, %v4905_v57  ;;  %4922 = vst.msk [vmem:[%s8039_s14 + $0x10] sm:$0xff] %vm4779_vm7, %v4906_v58  ;;  %v4916_v3 = vsub.f32 %v7905_v36, %v4903_v43  ;;  %v4917_v5 = vsub.f32 %v7907_v31, %v4903_v43  ;;  %v4918_v6 = vsub.f32 %v7909_v19, %v4903_v43 }
 0x8ae   :  { %4923 = vst.msk [vmem:[%s8039_s14 + $0x18] sm:$0xff] %vm4779_vm7, %v4907_v9  ;;  %v4919_v7 = vsub.f32 %v7911_v28, %v4903_v43  ;;  %4924 = vst.msk [vmem:[%s8039_s14 + $0x20] sm:$0xff] %vm4779_vm7, %v4908_v14 }
 0x8af   :  { %4925 = vst.msk [vmem:[%s8039_s14 + $0x28] sm:$0xff] %vm4779_vm7, %v4909_v61  ;;  %4926 = vst.msk [vmem:[%s8039_s14 + $0x30] sm:$0xff] %vm4779_vm7, %v4910_v11 }
 0x8b0   :  { %4927 = vst.msk [vmem:[%s8039_s14 + $0x38] sm:$0xff] %vm4779_vm7, %v4911_v13  ;;  %4928 = vst.msk [vmem:[%s8039_s14 + $0x40] sm:$0xff] %vm4779_vm7, %v4912_v17 }
 0x8b1   :  { %4929 = vst.msk [vmem:[%s8039_s14 + $0x48] sm:$0xff] %vm4779_vm7, %v4913_v15  ;;  %4930 = vst.msk [vmem:[%s8039_s14 + $0x50] sm:$0xff] %vm4779_vm7, %v4914_v0 }
 0x8b2   :  { %4931 = vst.msk [vmem:[%s8039_s14 + $0x58] sm:$0xff] %vm4779_vm7, %v4915_v22  ;;  %4932 = vst.msk [vmem:[%s8039_s14 + $0x60] sm:$0xff] %vm4779_vm7, %v4916_v3 }
 0x8b3   :  { %4933 = vst.msk [vmem:[%s8039_s14 + $0x68] sm:$0xff] %vm4779_vm7, %v4917_v5  ;;  %4934 = vst.msk [vmem:[%s8039_s14 + $0x70] sm:$0xff] %vm4779_vm7, %v4918_v6 }
 0x8b4   :  { %4935 = vst.msk [vmem:[%s8039_s14 + $0x78] sm:$0xff] %vm4779_vm7, %v4919_v7 }

</bundles_post_ra>
